<compile_context>
chip_gen: v7x
topology: tpu7x:2x2x1
jax: 0.10.0
libtpu: 0.0.40
codegen_flags: <defaults>
</compile_context>

<pallas_src>
import functools
import math

import jax
import jax.numpy as jnp
from jax import lax
from jax.experimental import pallas as pl
from jax.experimental.pallas import tpu as pltpu

EPS = 1e-5
_LANE = 128
_SUBLANE = 8


@functools.lru_cache(maxsize=None)
def _vmem_capacity_bytes():
    try:
        return int(pltpu.get_tpu_info().vmem_capacity_bytes)
    except Exception:
        return 64 * 1024 * 1024   # conservative fallback (v7x per-TC VMEM)


def _vmem_limit_bytes():
    return int(min(_vmem_capacity_bytes(), 128 * 1024 * 1024)) * 3 // 4


def _gelu(x):
    # Exact GELU, matching torch.nn.GELU() default (erf formulation).
    return 0.5 * x * (1.0 + lax.erf(x * (1.0 / math.sqrt(2.0))))


def _pick_tile(size, target, align, prefer_multi=True):
    """Largest multiple of `align` dividing `size`, <= target; when possible
    also <= size/2 so every grid has >= 2 steps (pipelining / megacore)."""
    if size % align != 0:
        return size
    cap = min(target, size)
    if prefer_multi and size > align:
        cap = min(cap, size // 2)
    cap = max(align, (cap // align) * align)
    t = cap
    while t >= align:
        if size % t == 0:
            return t
        t -= align
    return size


def _bn_affine(sums, sumsqs, gamma, beta, count):
    """Combine per-tile partial stats into the BN (scale, shift) affine."""
    total = jnp.sum(sums, axis=0)          # (1, C)
    total_sq = jnp.sum(sumsqs, axis=0)     # (1, C)
    mean = total / count
    var = jnp.maximum(total_sq / count - mean * mean, 0.0)  # biased, train mode
    scale = gamma.reshape(1, -1) * lax.rsqrt(var + EPS)
    shift = beta.reshape(1, -1) - mean * scale
    return scale, shift


# ---------------------------------------------------------------------------
# Kernel 1: matmul (+bias) + GELU, emitting per-tile BN partial stats.
# Grid: (M_tiles,) "parallel"; the (K, C) weight is VMEM-resident.
# The residual variant fuses the pending BN affines of both input streams and
# the residual add into the prologue (ConvMixer block: 1x1 conv input is
# BN_dw(GELU(dwconv(x))) + x).
# ---------------------------------------------------------------------------
def _mm_epilogue(v_bf16, w_ref, b_ref, y_ref, s_ref, ss_ref):
    z = jnp.dot(v_bf16, w_ref[...], preferred_element_type=jnp.float32)
    y = _gelu(z + b_ref[...])
    y_ref[...] = y.astype(y_ref.dtype)
    s_ref[...] = jnp.sum(y, axis=0, keepdims=True)[None]        # (1, 1, C)
    ss_ref[...] = jnp.sum(y * y, axis=0, keepdims=True)[None]   # (1, 1, C)


def _mm_gelu_stats_kernel(x_ref, w_ref, b_ref, y_ref, s_ref, ss_ref):
    _mm_epilogue(x_ref[...], w_ref, b_ref, y_ref, s_ref, ss_ref)


def _mm_res_gelu_stats_kernel(x_ref, r_ref, scx_ref, shx_ref, scr_ref, shr_ref,
                              w_ref, b_ref, y_ref, s_ref, ss_ref):
    v = (x_ref[...].astype(jnp.float32) * scx_ref[...] + shx_ref[...]
         + r_ref[...].astype(jnp.float32) * scr_ref[...] + shr_ref[...])
    _mm_epilogue(v.astype(jnp.bfloat16), w_ref, b_ref, y_ref, s_ref, ss_ref)


def matmul_gelu_stats(x, w, b, *, res=None, aff_x=None, aff_res=None,
                      out_dtype=jnp.bfloat16):
    M, K = x.shape
    C = w.shape[1]
    tm_target = 512 if _vmem_capacity_bytes() >= 96 * 1024 * 1024 else 256
    tm = _pick_tile(M, tm_target, _SUBLANE)
    nm = M // tm

    row = pl.BlockSpec((1, K), lambda i: (0, 0))
    in_specs = [pl.BlockSpec((tm, K), lambda i: (i, 0))]
    args = [x]
    if res is not None:
        in_specs += [pl.BlockSpec((tm, K), lambda i: (i, 0)), row, row, row, row]
        args += [res,
                 aff_x[0].reshape(1, K), aff_x[1].reshape(1, K),
                 aff_res[0].reshape(1, K), aff_res[1].reshape(1, K)]
        kernel = _mm_res_gelu_stats_kernel
    else:
        kernel = _mm_gelu_stats_kernel
    in_specs += [pl.BlockSpec((K, C), lambda i: (0, 0)),   # weight: VMEM-resident
                 pl.BlockSpec((1, C), lambda i: (0, 0))]
    args += [w, b.reshape(1, C)]

    y, s, ss = pl.pallas_call(
        kernel,
        out_shape=(jax.ShapeDtypeStruct((M, C), out_dtype),
                   jax.ShapeDtypeStruct((nm, 1, C), jnp.float32),
                   jax.ShapeDtypeStruct((nm, 1, C), jnp.float32)),
        grid=(nm,),
        in_specs=in_specs,
        out_specs=(pl.BlockSpec((tm, C), lambda i: (i, 0)),
                   pl.BlockSpec((1, 1, C), lambda i: (i, 0, 0)),
                   pl.BlockSpec((1, 1, C), lambda i: (i, 0, 0))),
        compiler_params=pltpu.CompilerParams(
            dimension_semantics=("parallel",),
            vmem_limit_bytes=_vmem_limit_bytes()),
    )(*args)
    return y, s, ss


# ---------------------------------------------------------------------------
# Kernel 2: (previous BN affine) + depthwise KxK 'same' conv + bias + GELU,
# emitting per-tile BN partial stats.  Grid: (batch_tiles, channel_tiles),
# both "parallel".  'same' zero padding is handled by statically bounded tap
# windows — no padded halo scratch, no full-block zeroing.
# ---------------------------------------------------------------------------
def _dwconv_gelu_stats_kernel(x_ref, sc_ref, sh_ref, w_ref, b_ref,
                              u_ref, s_ref, ss_ref, a_ref, acc_ref, *, K):
    tb, Hp, Wp, tc = x_ref.shape
    pad = (K - 1) // 2
    sc = sc_ref[...].reshape(1, 1, 1, tc)
    sh = sh_ref[...].reshape(1, 1, 1, tc)
    # BN affine of the previous layer, fused into this kernel's prologue.
    a_ref[...] = x_ref[...].astype(jnp.float32) * sc + sh

    # Centre tap initialises the accumulator (full extent, no boundary logic).
    acc_ref[...] = a_ref[...] * w_ref[pad * K + pad, :]
    for dy in range(K):
        oy = dy - pad
        h_lo, h_hi = max(0, -oy), min(Hp, Hp - oy)
        if h_hi <= h_lo:
            continue
        for dx in range(K):
            ox = dx - pad
            if oy == 0 and ox == 0:
                continue
            w_lo, w_hi = max(0, -ox), min(Wp, Wp - ox)
            if w_hi <= w_lo:
                continue
            win = a_ref[:, h_lo + oy:h_hi + oy, w_lo + ox:w_hi + ox, :]
            acc_ref[:, h_lo:h_hi, w_lo:w_hi, :] += win * w_ref[dy * K + dx, :]

    u = _gelu(acc_ref[...] + b_ref[...].reshape(1, 1, 1, tc))
    u_ref[...] = u.astype(u_ref.dtype)
    u2 = u.reshape(-1, tc)
    s_ref[...] = jnp.sum(u2, axis=0, keepdims=True)[None]
    ss_ref[...] = jnp.sum(u2 * u2, axis=0, keepdims=True)[None]


def dwconv_gelu_stats(x, scale, shift, w, b, kernel_size):
    N, Hp, Wp, C = x.shape
    kk = kernel_size * kernel_size
    tc_target = 2 * _LANE if _vmem_capacity_bytes() >= 96 * 1024 * 1024 else _LANE
    tc = _pick_tile(C, tc_target, _LANE, prefer_multi=False)
    # Batch tile sized so double-buffered in/out blocks + two f32 scratches fit.
    per_sample = Hp * Wp * tc * 16
    tb = _pick_tile(N, max(1, (6 * 1024 * 1024) // per_sample), 1)
    nb, nc = N // tb, C // tc

    kernel = functools.partial(_dwconv_gelu_stats_kernel, K=kernel_size)
    u, s, ss = pl.pallas_call(
        kernel,
        out_shape=(jax.ShapeDtypeStruct((N, Hp, Wp, C), x.dtype),
                   jax.ShapeDtypeStruct((nb, 1, C), jnp.float32),
                   jax.ShapeDtypeStruct((nb, 1, C), jnp.float32)),
        grid=(nb, nc),
        in_specs=[
            pl.BlockSpec((tb, Hp, Wp, tc), lambda i, j: (i, 0, 0, j)),
            pl.BlockSpec((1, tc), lambda i, j: (0, j)),
            pl.BlockSpec((1, tc), lambda i, j: (0, j)),
            pl.BlockSpec((kk, tc), lambda i, j: (0, j)),
            pl.BlockSpec((1, tc), lambda i, j: (0, j)),
        ],
        out_specs=(pl.BlockSpec((tb, Hp, Wp, tc), lambda i, j: (i, 0, 0, j)),
                   pl.BlockSpec((1, 1, tc), lambda i, j: (i, 0, j)),
                   pl.BlockSpec((1, 1, tc), lambda i, j: (i, 0, j))),
        scratch_shapes=[pltpu.VMEM((tb, Hp, Wp, tc), jnp.float32),   # affine'd in
                        pltpu.VMEM((tb, Hp, Wp, tc), jnp.float32)],  # accumulator
        compiler_params=pltpu.CompilerParams(
            dimension_semantics=("parallel", "parallel"),
            vmem_limit_bytes=_vmem_limit_bytes()),
    )(x, scale.reshape(1, C), shift.reshape(1, C), w, b.reshape(1, C))
    return u, s, ss


# ---------------------------------------------------------------------------
# Kernel 3: final BN affine + AdaptiveAvgPool2d((1,1)) + Flatten (fused).
# BN is affine per channel so pool(BN(x)) == mean(x)*scale + shift.
# ---------------------------------------------------------------------------
def _pool_bn_kernel(x_ref, sc_ref, sh_ref, o_ref):
    m = jnp.mean(x_ref[...].astype(jnp.float32), axis=1, keepdims=True)
    o_ref[...] = (m * sc_ref[...] + sh_ref[...]).astype(o_ref.dtype)


def pool_bn(x, scale, shift):
    N, HW, C = x.shape
    tb = _pick_tile(N, max(1, (4 * 1024 * 1024) // (HW * C * 2)), 1)
    out = pl.pallas_call(
        _pool_bn_kernel,
        out_shape=jax.ShapeDtypeStruct((N, 1, C), jnp.float32),
        grid=(N // tb,),
        in_specs=[pl.BlockSpec((tb, HW, C), lambda i: (i, 0, 0)),
                  pl.BlockSpec((1, 1, C), lambda i: (0, 0, 0)),
                  pl.BlockSpec((1, 1, C), lambda i: (0, 0, 0))],
        out_specs=pl.BlockSpec((tb, 1, C), lambda i: (i, 0, 0)),
        compiler_params=pltpu.CompilerParams(
            dimension_semantics=("parallel",),
            vmem_limit_bytes=_vmem_limit_bytes()),
    )(x, scale.reshape(1, 1, C), shift.reshape(1, 1, C))
    return out.reshape(N, C)


# ---------------------------------------------------------------------------
# Parameter init (deterministic, PyTorch-like; matmul weights pre-cast to bf16)
# ---------------------------------------------------------------------------
def init_params(key, dim, depth, kernel_size, patch_size, in_ch=1):
    keys = iter(jax.random.split(key, 2 + depth * 4))

    def uinit(k, fan_in, shape):
        bound = 1.0 / math.sqrt(fan_in)
        return jax.random.uniform(k, shape, jnp.float32, minval=-bound,
                                  maxval=bound)

    fan_stem = in_ch * patch_size * patch_size
    params = {
        # stem_w[i, c] == torch_weight[c, :, :, :].flatten()[i]
        "stem_w": uinit(next(keys), fan_stem, (fan_stem, dim)).astype(jnp.bfloat16),
        "stem_b": uinit(next(keys), fan_stem, (dim,)),
        "stem_gamma": jnp.ones((dim,), jnp.float32),
        "stem_beta": jnp.zeros((dim,), jnp.float32),
        "blocks": [],
    }
    for _ in range(depth):
        fan_dw = kernel_size * kernel_size
        fan_pw = dim
        params["blocks"].append({
            # dw_w[dy*K+dx, c] == torch_weight[c, 0, dy, dx]
            "dw_w": uinit(next(keys), fan_dw, (kernel_size * kernel_size, dim)),
            "dw_b": uinit(next(keys), fan_dw, (dim,)),
            "dw_gamma": jnp.ones((dim,), jnp.float32),
            "dw_beta": jnp.zeros((dim,), jnp.float32),
            # pw_w[cin, cout] == torch_weight[cout, cin, 0, 0]
            "pw_w": uinit(next(keys), fan_pw, (dim, dim)).astype(jnp.bfloat16),
            "pw_b": uinit(next(keys), fan_pw, (dim,)),
            "pw_gamma": jnp.ones((dim,), jnp.float32),
            "pw_beta": jnp.zeros((dim,), jnp.float32),
        })
    return params


# ---------------------------------------------------------------------------
# Full ConvMixer forward
# ---------------------------------------------------------------------------
def conv_mixer_forward(x_nchw, params, *, patch_size, kernel_size,
                       stop_at=None):
    if stop_at == 0:
        return x_nchw
    N, Cin, H, W = x_nchw.shape
    p = patch_size
    Hp, Wp = H // p, W // p
    M = N * Hp * Wp

    # Patch extraction (glue): NCHW -> (M, Cin*p*p), matching the flattening
    # order of the PyTorch stem conv weight (Cin, kh, kw).
    patches = x_nchw.reshape(N, Cin, Hp, p, Wp, p)
    patches = patches.transpose(0, 2, 4, 1, 3, 5).reshape(M, Cin * p * p)
    patches = patches.astype(jnp.bfloat16)

    # Stem: patch conv + GELU (pre-BN output + partial stats).
    y, s, ss = matmul_gelu_stats(patches, params["stem_w"], params["stem_b"])
    C = y.shape[-1]
    sc, sh = _bn_affine(s, ss, params["stem_gamma"], params["stem_beta"], M)

    for blk in params["blocks"]:
        # Depthwise conv + GELU; previous BN affine fused into its prologue.
        u, s_dw, ss_dw = dwconv_gelu_stats(y.reshape(N, Hp, Wp, C), sc, sh,
                                           blk["dw_w"], blk["dw_b"], kernel_size)
        sc_dw, sh_dw = _bn_affine(s_dw, ss_dw, blk["dw_gamma"], blk["dw_beta"], M)
        # Pointwise 1x1 conv + GELU; both pending BN affines and the residual
        # add are fused into the prologue (each activation read exactly once).
        y, s_pw, ss_pw = matmul_gelu_stats(
            u.reshape(M, C), blk["pw_w"], blk["pw_b"],
            res=y, aff_x=(sc_dw, sh_dw), aff_res=(sc, sh))
        sc, sh = _bn_affine(s_pw, ss_pw, blk["pw_gamma"], blk["pw_beta"], M)

    # Final BN affine + AdaptiveAvgPool2d((1,1)) + Flatten.
    return pool_bn(y.reshape(N, Hp * Wp, C), sc, sh)


if __name__ == "__main__":
    # dim is a multiple of 128 so every kernel's channel axis is lane-dense.
    dim, depth, kernel_size, patch_size = 128, 2, 5, 4
    key = jax.random.PRNGKey(0)
    kx, kp = jax.random.split(key)

    x = jax.random.normal(kx, (2, 1, 32, 32), dtype=jnp.float32)  # NCHW input
    params = init_params(kp, dim, depth, kernel_size, patch_size)

    fwd = jax.jit(functools.partial(conv_mixer_forward, patch_size=patch_size,
                                    kernel_size=kernel_size))
    out = fwd(x, params)
    jax.block_until_ready(out)
    assert out.shape == (2, dim) and out.dtype == jnp.float32
    print("KERNEL_OK")
</pallas_src>

<mosaic_0001>
module attributes {stable_mosaic.version = 11 : i64} {
  func.func @_mm_gelu_stats_kernel(%arg0: i32, %arg1: memref<64x16xbf16, #tpu.memory_space<vmem>>, %arg2: memref<16x128xbf16, #tpu.memory_space<vmem>>, %arg3: memref<1x128xf32, #tpu.memory_space<vmem>>, %arg4: memref<64x128xbf16, #tpu.memory_space<vmem>>, %arg5: memref<1x1x128xf32, #tpu.memory_space<vmem>>, %arg6: memref<1x1x128xf32, #tpu.memory_space<vmem>>) attributes {dimension_semantics = [#tpu.dimension_semantics<parallel>], iteration_bounds = array<i64: 2>, scalar_prefetch = 0 : i64, scratch_operands = 0 : i64, tpu.core_type = #tpu.core_type<tc>, window_params = [{transform_indices = @transform_0, window_bounds = array<i64: 64, 16>}, {pipeline_mode = #tpu.pipeline_mode<synchronous>, transform_indices = @transform_1, window_bounds = array<i64: 16, 128>}, {pipeline_mode = #tpu.pipeline_mode<synchronous>, transform_indices = @transform_2, window_bounds = array<i64: 1, 128>}, {transform_indices = @transform_3, window_bounds = array<i64: 64, 128>}, {transform_indices = @transform_4, window_bounds = array<i64: 1, 1, 128>}, {transform_indices = @transform_5, window_bounds = array<i64: 1, 1, 128>}]} {
    %c0 = arith.constant 0 : index
    %c0_0 = arith.constant 0 : index
    %0 = vector.load %arg1[%c0, %c0_0] : memref<64x16xbf16, #tpu.memory_space<vmem>>, vector<64x16xbf16>
    %c0_1 = arith.constant 0 : index
    %c0_2 = arith.constant 0 : index
    %1 = vector.load %arg2[%c0_1, %c0_2] : memref<16x128xbf16, #tpu.memory_space<vmem>>, vector<16x128xbf16>
    %cst = arith.constant dense<0.000000e+00> : vector<64x128xf32>
    %2 = tpu.matmul %0, %1, %cst {dimension_numbers = #tpu.dot_dimension_numbers<[1], [0], [0], [1], [0, 0, 1, 1], [], []>} : vector<64x16xbf16>, vector<16x128xbf16>, vector<64x128xf32> -> vector<64x128xf32>
    %c0_3 = arith.constant 0 : index
    %c0_4 = arith.constant 0 : index
    %3 = vector.load %arg3[%c0_3, %c0_4] : memref<1x128xf32, #tpu.memory_space<vmem>>, vector<1x128xf32>
    %4 = vector.broadcast %3 : vector<1x128xf32> to vector<64x128xf32>
    %5 = arith.addf %2, %4 : vector<64x128xf32>
    %cst_5 = arith.constant 5.000000e-01 : f32
    %6 = vector.broadcast %cst_5 : f32 to vector<64x128xf32>
    %7 = arith.mulf %6, %5 : vector<64x128xf32>
    %cst_6 = arith.constant 0.707106769 : f32
    %8 = vector.broadcast %cst_6 : f32 to vector<64x128xf32>
    %9 = arith.mulf %5, %8 : vector<64x128xf32>
    %10 = math.erf %9 : vector<64x128xf32>
    %cst_7 = arith.constant 1.000000e+00 : f32
    %11 = vector.broadcast %cst_7 : f32 to vector<64x128xf32>
    %12 = arith.addf %11, %10 : vector<64x128xf32>
    %13 = arith.mulf %7, %12 : vector<64x128xf32>
    %14 = arith.truncf %13 : vector<64x128xf32> to vector<64x128xbf16>
    %c0_8 = arith.constant 0 : index
    %c0_9 = arith.constant 0 : index
    %15 = vector.load %arg4[%c0_8, %c0_9] : memref<64x128xbf16, #tpu.memory_space<vmem>>, vector<64x128xbf16>
    tpu.vector_store %arg4[%c0_8, %c0_9], %14 {strides = array<i32>} : memref<64x128xbf16, #tpu.memory_space<vmem>>, vector<64x128xbf16>,
    %cst_10 = arith.constant dense<0.000000e+00> : vector<128xf32>
    %16 = vector.multi_reduction <add>, %13, %cst_10 [0] : vector<64x128xf32> to vector<128xf32>
    %17 = vector.shape_cast %16 : vector<128xf32> to vector<1x128xf32>
    %18 = vector.shape_cast %17 : vector<1x128xf32> to vector<1x1x128xf32>
    %c0_11 = arith.constant 0 : index
    %c0_12 = arith.constant 0 : index
    %c0_13 = arith.constant 0 : index
    %19 = vector.load %arg5[%c0_11, %c0_12, %c0_13] : memref<1x1x128xf32, #tpu.memory_space<vmem>>, vector<1x1x128xf32>
    tpu.vector_store %arg5[%c0_11, %c0_12, %c0_13], %18 {strides = array<i32>} : memref<1x1x128xf32, #tpu.memory_space<vmem>>, vector<1x1x128xf32>,
    %20 = arith.mulf %13, %13 : vector<64x128xf32>
    %cst_14 = arith.constant dense<0.000000e+00> : vector<128xf32>
    %21 = vector.multi_reduction <add>, %20, %cst_14 [0] : vector<64x128xf32> to vector<128xf32>
    %22 = vector.shape_cast %21 : vector<128xf32> to vector<1x128xf32>
    %23 = vector.shape_cast %22 : vector<1x128xf32> to vector<1x1x128xf32>
    %c0_15 = arith.constant 0 : index
    %c0_16 = arith.constant 0 : index
    %c0_17 = arith.constant 0 : index
    %24 = vector.load %arg6[%c0_15, %c0_16, %c0_17] : memref<1x1x128xf32, #tpu.memory_space<vmem>>, vector<1x1x128xf32>
    tpu.vector_store %arg6[%c0_15, %c0_16, %c0_17], %23 {strides = array<i32>} : memref<1x1x128xf32, #tpu.memory_space<vmem>>, vector<1x1x128xf32>,
    return
  }
  func.func @transform_0(%arg0: i32) -> (i32, i32) {
    %c0_i32 = arith.constant 0 : i32
    %c0_i32_0 = arith.constant 0 : i32
    return %arg0, %c0_i32 : i32, i32
  }
  func.func @transform_1(%arg0: i32) -> (i32, i32) {
    %c0_i32 = arith.constant 0 : i32
    %c0_i32_0 = arith.constant 0 : i32
    %c0_i32_1 = arith.constant 0 : i32
    return %c0_i32, %c0_i32_0 : i32, i32
  }
  func.func @transform_2(%arg0: i32) -> (i32, i32) {
    %c0_i32 = arith.constant 0 : i32
    %c0_i32_0 = arith.constant 0 : i32
    %c0_i32_1 = arith.constant 0 : i32
    return %c0_i32, %c0_i32_0 : i32, i32
  }
  func.func @transform_3(%arg0: i32) -> (i32, i32) {
    %c0_i32 = arith.constant 0 : i32
    %c0_i32_0 = arith.constant 0 : i32
    return %arg0, %c0_i32 : i32, i32
  }
  func.func @transform_4(%arg0: i32) -> (i32, i32, i32) {
    %c0_i32 = arith.constant 0 : i32
    %c0_i32_0 = arith.constant 0 : i32
    %c0_i32_1 = arith.constant 0 : i32
    return %arg0, %c0_i32, %c0_i32_0 : i32, i32, i32
  }
  func.func @transform_5(%arg0: i32) -> (i32, i32, i32) {
    %c0_i32 = arith.constant 0 : i32
    %c0_i32_0 = arith.constant 0 : i32
    %c0_i32_1 = arith.constant 0 : i32
    return %arg0, %c0_i32, %c0_i32_0 : i32, i32, i32
  }
}

module attributes {stable_mosaic.version = 11 : i64} {
  func.func @_mm_res_gelu_stats_kernel(%arg0: i32, %arg1: memref<64x128xbf16, #tpu.memory_space<vmem>>, %arg2: memref<64x128xbf16, #tpu.memory_space<vmem>>, %arg3: memref<1x128xf32, #tpu.memory_space<vmem>>, %arg4: memref<1x128xf32, #tpu.memory_space<vmem>>, %arg5: memref<1x128xf32, #tpu.memory_space<vmem>>, %arg6: memref<1x128xf32, #tpu.memory_space<vmem>>, %arg7: memref<128x128xbf16, #tpu.memory_space<vmem>>, %arg8: memref<1x128xf32, #tpu.memory_space<vmem>>, %arg9: memref<64x128xbf16, #tpu.memory_space<vmem>>, %arg10: memref<1x1x128xf32, #tpu.memory_space<vmem>>, %arg11: memref<1x1x128xf32, #tpu.memory_space<vmem>>) attributes {dimension_semantics = [#tpu.dimension_semantics<parallel>], iteration_bounds = array<i64: 2>, scalar_prefetch = 0 : i64, scratch_operands = 0 : i64, tpu.core_type = #tpu.core_type<tc>, window_params = [{transform_indices = @transform_0, window_bounds = array<i64: 64, 128>}, {transform_indices = @transform_1, window_bounds = array<i64: 64, 128>}, {pipeline_mode = #tpu.pipeline_mode<synchronous>, transform_indices = @transform_2, window_bounds = array<i64: 1, 128>}, {pipeline_mode = #tpu.pipeline_mode<synchronous>, transform_indices = @transform_3, window_bounds = array<i64: 1, 128>}, {pipeline_mode = #tpu.pipeline_mode<synchronous>, transform_indices = @transform_4, window_bounds = array<i64: 1, 128>}, {pipeline_mode = #tpu.pipeline_mode<synchronous>, transform_indices = @transform_5, window_bounds = array<i64: 1, 128>}, {pipeline_mode = #tpu.pipeline_mode<synchronous>, transform_indices = @transform_6, window_bounds = array<i64: 128, 128>}, {pipeline_mode = #tpu.pipeline_mode<synchronous>, transform_indices = @transform_7, window_bounds = array<i64: 1, 128>}, {transform_indices = @transform_8, window_bounds = array<i64: 64, 128>}, {transform_indices = @transform_9, window_bounds = array<i64: 1, 1, 128>}, {transform_indices = @transform_10, window_bounds = array<i64: 1, 1, 128>}]} {
    %c0 = arith.constant 0 : index
    %c0_0 = arith.constant 0 : index
    %0 = vector.load %arg1[%c0, %c0_0] : memref<64x128xbf16, #tpu.memory_space<vmem>>, vector<64x128xbf16>
    %1 = arith.extf %0 : vector<64x128xbf16> to vector<64x128xf32>
    %c0_1 = arith.constant 0 : index
    %c0_2 = arith.constant 0 : index
    %2 = vector.load %arg3[%c0_1, %c0_2] : memref<1x128xf32, #tpu.memory_space<vmem>>, vector<1x128xf32>
    %3 = vector.broadcast %2 : vector<1x128xf32> to vector<64x128xf32>
    %4 = arith.mulf %1, %3 : vector<64x128xf32>
    %c0_3 = arith.constant 0 : index
    %c0_4 = arith.constant 0 : index
    %5 = vector.load %arg4[%c0_3, %c0_4] : memref<1x128xf32, #tpu.memory_space<vmem>>, vector<1x128xf32>
    %6 = vector.broadcast %5 : vector<1x128xf32> to vector<64x128xf32>
    %7 = arith.addf %4, %6 : vector<64x128xf32>
    %c0_5 = arith.constant 0 : index
    %c0_6 = arith.constant 0 : index
    %8 = vector.load %arg2[%c0_5, %c0_6] : memref<64x128xbf16, #tpu.memory_space<vmem>>, vector<64x128xbf16>
    %9 = arith.extf %8 : vector<64x128xbf16> to vector<64x128xf32>
    %c0_7 = arith.constant 0 : index
    %c0_8 = arith.constant 0 : index
    %10 = vector.load %arg5[%c0_7, %c0_8] : memref<1x128xf32, #tpu.memory_space<vmem>>, vector<1x128xf32>
    %11 = vector.broadcast %10 : vector<1x128xf32> to vector<64x128xf32>
    %12 = arith.mulf %9, %11 : vector<64x128xf32>
    %13 = arith.addf %7, %12 : vector<64x128xf32>
    %c0_9 = arith.constant 0 : index
    %c0_10 = arith.constant 0 : index
    %14 = vector.load %arg6[%c0_9, %c0_10] : memref<1x128xf32, #tpu.memory_space<vmem>>, vector<1x128xf32>
    %15 = vector.broadcast %14 : vector<1x128xf32> to vector<64x128xf32>
    %16 = arith.addf %13, %15 : vector<64x128xf32>
    %17 = arith.truncf %16 : vector<64x128xf32> to vector<64x128xbf16>
    %c0_11 = arith.constant 0 : index
    %c0_12 = arith.constant 0 : index
    %18 = vector.load %arg7[%c0_11, %c0_12] : memref<128x128xbf16, #tpu.memory_space<vmem>>, vector<128x128xbf16>
    %cst = arith.constant dense<0.000000e+00> : vector<64x128xf32>
    %19 = tpu.matmul %17, %18, %cst {dimension_numbers = #tpu.dot_dimension_numbers<[1], [0], [0], [1], [0, 0, 1, 1], [], []>} : vector<64x128xbf16>, vector<128x128xbf16>, vector<64x128xf32> -> vector<64x128xf32>
    %c0_13 = arith.constant 0 : index
    %c0_14 = arith.constant 0 : index
    %20 = vector.load %arg8[%c0_13, %c0_14] : memref<1x128xf32, #tpu.memory_space<vmem>>, vector<1x128xf32>
    %21 = vector.broadcast %20 : vector<1x128xf32> to vector<64x128xf32>
    %22 = arith.addf %19, %21 : vector<64x128xf32>
    %cst_15 = arith.constant 5.000000e-01 : f32
    %23 = vector.broadcast %cst_15 : f32 to vector<64x128xf32>
    %24 = arith.mulf %23, %22 : vector<64x128xf32>
    %cst_16 = arith.constant 0.707106769 : f32
    %25 = vector.broadcast %cst_16 : f32 to vector<64x128xf32>
    %26 = arith.mulf %22, %25 : vector<64x128xf32>
    %27 = math.erf %26 : vector<64x128xf32>
    %cst_17 = arith.constant 1.000000e+00 : f32
    %28 = vector.broadcast %cst_17 : f32 to vector<64x128xf32>
    %29 = arith.addf %28, %27 : vector<64x128xf32>
    %30 = arith.mulf %24, %29 : vector<64x128xf32>
    %31 = arith.truncf %30 : vector<64x128xf32> to vector<64x128xbf16>
    %c0_18 = arith.constant 0 : index
    %c0_19 = arith.constant 0 : index
    %32 = vector.load %arg9[%c0_18, %c0_19] : memref<64x128xbf16, #tpu.memory_space<vmem>>, vector<64x128xbf16>
    tpu.vector_store %arg9[%c0_18, %c0_19], %31 {strides = array<i32>} : memref<64x128xbf16, #tpu.memory_space<vmem>>, vector<64x128xbf16>,
    %cst_20 = arith.constant dense<0.000000e+00> : vector<128xf32>
    %33 = vector.multi_reduction <add>, %30, %cst_20 [0] : vector<64x128xf32> to vector<128xf32>
    %34 = vector.shape_cast %33 : vector<128xf32> to vector<1x128xf32>
    %35 = vector.shape_cast %34 : vector<1x128xf32> to vector<1x1x128xf32>
    %c0_21 = arith.constant 0 : index
    %c0_22 = arith.constant 0 : index
    %c0_23 = arith.constant 0 : index
    %36 = vector.load %arg10[%c0_21, %c0_22, %c0_23] : memref<1x1x128xf32, #tpu.memory_space<vmem>>, vector<1x1x128xf32>
    tpu.vector_store %arg10[%c0_21, %c0_22, %c0_23], %35 {strides = array<i32>} : memref<1x1x128xf32, #tpu.memory_space<vmem>>, vector<1x1x128xf32>,
    %37 = arith.mulf %30, %30 : vector<64x128xf32>
    %cst_24 = arith.constant dense<0.000000e+00> : vector<128xf32>
    %38 = vector.multi_reduction <add>, %37, %cst_24 [0] : vector<64x128xf32> to vector<128xf32>
    %39 = vector.shape_cast %38 : vector<128xf32> to vector<1x128xf32>
    %40 = vector.shape_cast %39 : vector<1x128xf32> to vector<1x1x128xf32>
    %c0_25 = arith.constant 0 : index
    %c0_26 = arith.constant 0 : index
    %c0_27 = arith.constant 0 : index
    %41 = vector.load %arg11[%c0_25, %c0_26, %c0_27] : memref<1x1x128xf32, #tpu.memory_space<vmem>>, vector<1x1x128xf32>
    tpu.vector_store %arg11[%c0_25, %c0_26, %c0_27], %40 {strides = array<i32>} : memref<1x1x128xf32, #tpu.memory_space<vmem>>, vector<1x1x128xf32>,
    return
  }
  func.func @transform_0(%arg0: i32) -> (i32, i32) {
    %c0_i32 = arith.constant 0 : i32
    %c0_i32_0 = arith.constant 0 : i32
    return %arg0, %c0_i32 : i32, i32
  }
  func.func @transform_1(%arg0: i32) -> (i32, i32) {
    %c0_i32 = arith.constant 0 : i32
    %c0_i32_0 = arith.constant 0 : i32
    return %arg0, %c0_i32 : i32, i32
  }
  func.func @transform_2(%arg0: i32) -> (i32, i32) {
    %c0_i32 = arith.constant 0 : i32
    %c0_i32_0 = arith.constant 0 : i32
    %c0_i32_1 = arith.constant 0 : i32
    return %c0_i32, %c0_i32_0 : i32, i32
  }
  func.func @transform_3(%arg0: i32) -> (i32, i32) {
    %c0_i32 = arith.constant 0 : i32
    %c0_i32_0 = arith.constant 0 : i32
    %c0_i32_1 = arith.constant 0 : i32
    return %c0_i32, %c0_i32_0 : i32, i32
  }
  func.func @transform_4(%arg0: i32) -> (i32, i32) {
    %c0_i32 = arith.constant 0 : i32
    %c0_i32_0 = arith.constant 0 : i32
    %c0_i32_1 = arith.constant 0 : i32
    return %c0_i32, %c0_i32_0 : i32, i32
  }
  func.func @transform_5(%arg0: i32) -> (i32, i32) {
    %c0_i32 = arith.constant 0 : i32
    %c0_i32_0 = arith.constant 0 : i32
    %c0_i32_1 = arith.constant 0 : i32
    return %c0_i32, %c0_i32_0 : i32, i32
  }
  func.func @transform_6(%arg0: i32) -> (i32, i32) {
    %c0_i32 = arith.constant 0 : i32
    %c0_i32_0 = arith.constant 0 : i32
    %c0_i32_1 = arith.constant 0 : i32
    return %c0_i32, %c0_i32_0 : i32, i32
  }
  func.func @transform_7(%arg0: i32) -> (i32, i32) {
    %c0_i32 = arith.constant 0 : i32
    %c0_i32_0 = arith.constant 0 : i32
    %c0_i32_1 = arith.constant 0 : i32
    return %c0_i32, %c0_i32_0 : i32, i32
  }
  func.func @transform_8(%arg0: i32) -> (i32, i32) {
    %c0_i32 = arith.constant 0 : i32
    %c0_i32_0 = arith.constant 0 : i32
    return %arg0, %c0_i32 : i32, i32
  }
  func.func @transform_9(%arg0: i32) -> (i32, i32, i32) {
    %c0_i32 = arith.constant 0 : i32
    %c0_i32_0 = arith.constant 0 : i32
    %c0_i32_1 = arith.constant 0 : i32
    return %arg0, %c0_i32, %c0_i32_0 : i32, i32, i32
  }
  func.func @transform_10(%arg0: i32) -> (i32, i32, i32) {
    %c0_i32 = arith.constant 0 : i32
    %c0_i32_0 = arith.constant 0 : i32
    %c0_i32_1 = arith.constant 0 : i32
    return %arg0, %c0_i32, %c0_i32_0 : i32, i32, i32
  }
}

module attributes {stable_mosaic.version = 11 : i64} {
  func.func @_pool_bn_kernel(%arg0: i32, %arg1: memref<1x64x128xbf16, #tpu.memory_space<vmem>>, %arg2: memref<1x1x128xf32, #tpu.memory_space<vmem>>, %arg3: memref<1x1x128xf32, #tpu.memory_space<vmem>>, %arg4: memref<1x1x128xf32, #tpu.memory_space<vmem>>) attributes {dimension_semantics = [#tpu.dimension_semantics<parallel>], iteration_bounds = array<i64: 2>, scalar_prefetch = 0 : i64, scratch_operands = 0 : i64, tpu.core_type = #tpu.core_type<tc>, window_params = [{transform_indices = @transform_0, window_bounds = array<i64: 1, 64, 128>}, {pipeline_mode = #tpu.pipeline_mode<synchronous>, transform_indices = @transform_1, window_bounds = array<i64: 1, 1, 128>}, {pipeline_mode = #tpu.pipeline_mode<synchronous>, transform_indices = @transform_2, window_bounds = array<i64: 1, 1, 128>}, {transform_indices = @transform_3, window_bounds = array<i64: 1, 1, 128>}]} {
    %c0 = arith.constant 0 : index
    %c0_0 = arith.constant 0 : index
    %c0_1 = arith.constant 0 : index
    %0 = vector.load %arg1[%c0, %c0_0, %c0_1] : memref<1x64x128xbf16, #tpu.memory_space<vmem>>, vector<1x64x128xbf16>
    %1 = arith.extf %0 : vector<1x64x128xbf16> to vector<1x64x128xf32>
    %cst = arith.constant dense<0.000000e+00> : vector<1x128xf32>
    %2 = vector.multi_reduction <add>, %1, %cst [1] : vector<1x64x128xf32> to vector<1x128xf32>
    %3 = vector.shape_cast %2 : vector<1x128xf32> to vector<1x1x128xf32>
    %cst_2 = arith.constant 6.400000e+01 : f32
    %4 = vector.broadcast %cst_2 : f32 to vector<1x1x128xf32>
    %5 = arith.divf %3, %4 : vector<1x1x128xf32>
    %c0_3 = arith.constant 0 : index
    %c0_4 = arith.constant 0 : index
    %c0_5 = arith.constant 0 : index
    %6 = vector.load %arg2[%c0_3, %c0_4, %c0_5] : memref<1x1x128xf32, #tpu.memory_space<vmem>>, vector<1x1x128xf32>
    %7 = arith.mulf %5, %6 : vector<1x1x128xf32>
    %c0_6 = arith.constant 0 : index
    %c0_7 = arith.constant 0 : index
    %c0_8 = arith.constant 0 : index
    %8 = vector.load %arg3[%c0_6, %c0_7, %c0_8] : memref<1x1x128xf32, #tpu.memory_space<vmem>>, vector<1x1x128xf32>
    %9 = arith.addf %7, %8 : vector<1x1x128xf32>
    %c0_9 = arith.constant 0 : index
    %c0_10 = arith.constant 0 : index
    %c0_11 = arith.constant 0 : index
    %10 = vector.load %arg4[%c0_9, %c0_10, %c0_11] : memref<1x1x128xf32, #tpu.memory_space<vmem>>, vector<1x1x128xf32>
    tpu.vector_store %arg4[%c0_9, %c0_10, %c0_11], %9 {strides = array<i32>} : memref<1x1x128xf32, #tpu.memory_space<vmem>>, vector<1x1x128xf32>,
    return
  }
  func.func @transform_0(%arg0: i32) -> (i32, i32, i32) {
    %c0_i32 = arith.constant 0 : i32
    %c0_i32_0 = arith.constant 0 : i32
    %c0_i32_1 = arith.constant 0 : i32
    return %arg0, %c0_i32, %c0_i32_0 : i32, i32, i32
  }
  func.func @transform_1(%arg0: i32) -> (i32, i32, i32) {
    %c0_i32 = arith.constant 0 : i32
    %c0_i32_0 = arith.constant 0 : i32
    %c0_i32_1 = arith.constant 0 : i32
    %c0_i32_2 = arith.constant 0 : i32
    return %c0_i32, %c0_i32_0, %c0_i32_1 : i32, i32, i32
  }
  func.func @transform_2(%arg0: i32) -> (i32, i32, i32) {
    %c0_i32 = arith.constant 0 : i32
    %c0_i32_0 = arith.constant 0 : i32
    %c0_i32_1 = arith.constant 0 : i32
    %c0_i32_2 = arith.constant 0 : i32
    return %c0_i32, %c0_i32_0, %c0_i32_1 : i32, i32, i32
  }
  func.func @transform_3(%arg0: i32) -> (i32, i32, i32) {
    %c0_i32 = arith.constant 0 : i32
    %c0_i32_0 = arith.constant 0 : i32
    %c0_i32_1 = arith.constant 0 : i32
    return %arg0, %c0_i32, %c0_i32_0 : i32, i32, i32
  }
}

module attributes {stable_mosaic.version = 11 : i64} {
  func.func @_dwconv_gelu_stats_kernel(%arg0: i32, %arg1: i32, %arg2: memref<1x8x8x128xbf16, #tpu.memory_space<vmem>>, %arg3: memref<1x128xf32, #tpu.memory_space<vmem>>, %arg4: memref<1x128xf32, #tpu.memory_space<vmem>>, %arg5: memref<25x128xf32, #tpu.memory_space<vmem>>, %arg6: memref<1x128xf32, #tpu.memory_space<vmem>>, %arg7: memref<1x8x8x128xbf16, #tpu.memory_space<vmem>>, %arg8: memref<1x1x128xf32, #tpu.memory_space<vmem>>, %arg9: memref<1x1x128xf32, #tpu.memory_space<vmem>>, %arg10: memref<1x8x8x128xf32, #tpu.memory_space<vmem>>, %arg11: memref<1x8x8x128xf32, #tpu.memory_space<vmem>>) attributes {dimension_semantics = [#tpu.dimension_semantics<parallel>, #tpu.dimension_semantics<parallel>], iteration_bounds = array<i64: 2, 1>, scalar_prefetch = 0 : i64, scratch_operands = 2 : i64, tpu.core_type = #tpu.core_type<tc>, window_params = [{transform_indices = @transform_0, window_bounds = array<i64: 1, 8, 8, 128>}, {transform_indices = @transform_1, window_bounds = array<i64: 1, 128>}, {transform_indices = @transform_2, window_bounds = array<i64: 1, 128>}, {transform_indices = @transform_3, window_bounds = array<i64: 25, 128>}, {transform_indices = @transform_4, window_bounds = array<i64: 1, 128>}, {transform_indices = @transform_5, window_bounds = array<i64: 1, 8, 8, 128>}, {transform_indices = @transform_6, window_bounds = array<i64: 1, 1, 128>}, {transform_indices = @transform_7, window_bounds = array<i64: 1, 1, 128>}]} {
    %c0 = arith.constant 0 : index
    %c0_0 = arith.constant 0 : index
    %0 = vector.load %arg3[%c0, %c0_0] : memref<1x128xf32, #tpu.memory_space<vmem>>, vector<1x128xf32>
    %1 = vector.shape_cast %0 : vector<1x128xf32> to vector<1x1x1x128xf32>
    %c0_1 = arith.constant 0 : index
    %c0_2 = arith.constant 0 : index
    %2 = vector.load %arg4[%c0_1, %c0_2] : memref<1x128xf32, #tpu.memory_space<vmem>>, vector<1x128xf32>
    %3 = vector.shape_cast %2 : vector<1x128xf32> to vector<1x1x1x128xf32>
    %c0_3 = arith.constant 0 : index
    %c0_4 = arith.constant 0 : index
    %c0_5 = arith.constant 0 : index
    %c0_6 = arith.constant 0 : index
    %4 = vector.load %arg2[%c0_3, %c0_4, %c0_5, %c0_6] : memref<1x8x8x128xbf16, #tpu.memory_space<vmem>>, vector<1x8x8x128xbf16>
    %5 = arith.extf %4 : vector<1x8x8x128xbf16> to vector<1x8x8x128xf32>
    %6 = vector.broadcast %1 : vector<1x1x1x128xf32> to vector<1x8x8x128xf32>
    %7 = arith.mulf %5, %6 : vector<1x8x8x128xf32>
    %8 = vector.broadcast %3 : vector<1x1x1x128xf32> to vector<1x8x8x128xf32>
    %9 = arith.addf %7, %8 : vector<1x8x8x128xf32>
    %c0_7 = arith.constant 0 : index
    %c0_8 = arith.constant 0 : index
    %c0_9 = arith.constant 0 : index
    %c0_10 = arith.constant 0 : index
    %10 = vector.load %arg10[%c0_7, %c0_8, %c0_9, %c0_10] : memref<1x8x8x128xf32, #tpu.memory_space<vmem>>, vector<1x8x8x128xf32>
    tpu.vector_store %arg10[%c0_7, %c0_8, %c0_9, %c0_10], %9 {strides = array<i32>} : memref<1x8x8x128xf32, #tpu.memory_space<vmem>>, vector<1x8x8x128xf32>,
    %c0_11 = arith.constant 0 : index
    %c0_12 = arith.constant 0 : index
    %c0_13 = arith.constant 0 : index
    %c0_14 = arith.constant 0 : index
    %11 = vector.load %arg10[%c0_11, %c0_12, %c0_13, %c0_14] : memref<1x8x8x128xf32, #tpu.memory_space<vmem>>, vector<1x8x8x128xf32>
    %c12 = arith.constant 12 : index
    %c0_15 = arith.constant 0 : index
    %12 = vector.load %arg5[%c12, %c0_15] : memref<25x128xf32, #tpu.memory_space<vmem>>, vector<1x128xf32>
    %13 = vector.shape_cast %12 : vector<1x128xf32> to vector<128xf32>
    %14 = vector.shape_cast %13 : vector<128xf32> to vector<1x1x1x128xf32>
    %15 = vector.broadcast %14 : vector<1x1x1x128xf32> to vector<1x8x8x128xf32>
    %16 = arith.mulf %11, %15 : vector<1x8x8x128xf32>
    %c0_16 = arith.constant 0 : index
    %c0_17 = arith.constant 0 : index
    %c0_18 = arith.constant 0 : index
    %c0_19 = arith.constant 0 : index
    %17 = vector.load %arg11[%c0_16, %c0_17, %c0_18, %c0_19] : memref<1x8x8x128xf32, #tpu.memory_space<vmem>>, vector<1x8x8x128xf32>
    tpu.vector_store %arg11[%c0_16, %c0_17, %c0_18, %c0_19], %16 {strides = array<i32>} : memref<1x8x8x128xf32, #tpu.memory_space<vmem>>, vector<1x8x8x128xf32>,
    %c0_20 = arith.constant 0 : index
    %c0_21 = arith.constant 0 : index
    %c0_22 = arith.constant 0 : index
    %c0_23 = arith.constant 0 : index
    %18 = vector.load %arg10[%c0_20, %c0_21, %c0_22, %c0_23] : memref<1x8x8x128xf32, #tpu.memory_space<vmem>>, vector<1x6x6x128xf32>
    %c0_24 = arith.constant 0 : index
    %c2 = arith.constant 2 : index
    %c2_25 = arith.constant 2 : index
    %c0_26 = arith.constant 0 : index
    %19 = vector.load %arg11[%c0_24, %c2, %c2_25, %c0_26] : memref<1x8x8x128xf32, #tpu.memory_space<vmem>>, vector<1x6x6x128xf32>
    %c0_27 = arith.constant 0 : index
    %c0_28 = arith.constant 0 : index
    %20 = vector.load %arg5[%c0_27, %c0_28] : memref<25x128xf32, #tpu.memory_space<vmem>>, vector<1x128xf32>
    %21 = vector.shape_cast %20 : vector<1x128xf32> to vector<128xf32>
    %22 = vector.shape_cast %21 : vector<128xf32> to vector<1x1x1x128xf32>
    %23 = vector.broadcast %22 : vector<1x1x1x128xf32> to vector<1x6x6x128xf32>
    %24 = arith.mulf %18, %23 : vector<1x6x6x128xf32>
    %25 = arith.addf %19, %24 : vector<1x6x6x128xf32>
    %c0_29 = arith.constant 0 : index
    %c2_30 = arith.constant 2 : index
    %c2_31 = arith.constant 2 : index
    %c0_32 = arith.constant 0 : index
    %26 = vector.load %arg11[%c0_29, %c2_30, %c2_31, %c0_32] : memref<1x8x8x128xf32, #tpu.memory_space<vmem>>, vector<1x6x6x128xf32>
    tpu.vector_store %arg11[%c0_29, %c2_30, %c2_31, %c0_32], %25 {strides = array<i32>} : memref<1x8x8x128xf32, #tpu.memory_space<vmem>>, vector<1x6x6x128xf32>,
    %c0_33 = arith.constant 0 : index
    %c0_34 = arith.constant 0 : index
    %c0_35 = arith.constant 0 : index
    %c0_36 = arith.constant 0 : index
    %27 = vector.load %arg10[%c0_33, %c0_34, %c0_35, %c0_36] : memref<1x8x8x128xf32, #tpu.memory_space<vmem>>, vector<1x6x7x128xf32>
    %c0_37 = arith.constant 0 : index
    %c2_38 = arith.constant 2 : index
    %c1 = arith.constant 1 : index
    %c0_39 = arith.constant 0 : index
    %28 = vector.load %arg11[%c0_37, %c2_38, %c1, %c0_39] : memref<1x8x8x128xf32, #tpu.memory_space<vmem>>, vector<1x6x7x128xf32>
    %c1_40 = arith.constant 1 : index
    %c0_41 = arith.constant 0 : index
    %29 = vector.load %arg5[%c1_40, %c0_41] : memref<25x128xf32, #tpu.memory_space<vmem>>, vector<1x128xf32>
    %30 = vector.shape_cast %29 : vector<1x128xf32> to vector<128xf32>
    %31 = vector.shape_cast %30 : vector<128xf32> to vector<1x1x1x128xf32>
    %32 = vector.broadcast %31 : vector<1x1x1x128xf32> to vector<1x6x7x128xf32>
    %33 = arith.mulf %27, %32 : vector<1x6x7x128xf32>
    %34 = arith.addf %28, %33 : vector<1x6x7x128xf32>
    %c0_42 = arith.constant 0 : index
    %c2_43 = arith.constant 2 : index
    %c1_44 = arith.constant 1 : index
    %c0_45 = arith.constant 0 : index
    %35 = vector.load %arg11[%c0_42, %c2_43, %c1_44, %c0_45] : memref<1x8x8x128xf32, #tpu.memory_space<vmem>>, vector<1x6x7x128xf32>
    tpu.vector_store %arg11[%c0_42, %c2_43, %c1_44, %c0_45], %34 {strides = array<i32>} : memref<1x8x8x128xf32, #tpu.memory_space<vmem>>, vector<1x6x7x128xf32>,
    %c0_46 = arith.constant 0 : index
    %c0_47 = arith.constant 0 : index
    %c0_48 = arith.constant 0 : index
    %c0_49 = arith.constant 0 : index
    %36 = vector.load %arg10[%c0_46, %c0_47, %c0_48, %c0_49] : memref<1x8x8x128xf32, #tpu.memory_space<vmem>>, vector<1x6x8x128xf32>
    %c0_50 = arith.constant 0 : index
    %c2_51 = arith.constant 2 : index
    %c0_52 = arith.constant 0 : index
    %c0_53 = arith.constant 0 : index
    %37 = vector.load %arg11[%c0_50, %c2_51, %c0_52, %c0_53] : memref<1x8x8x128xf32, #tpu.memory_space<vmem>>, vector<1x6x8x128xf32>
    %c2_54 = arith.constant 2 : index
    %c0_55 = arith.constant 0 : index
    %38 = vector.load %arg5[%c2_54, %c0_55] : memref<25x128xf32, #tpu.memory_space<vmem>>, vector<1x128xf32>
    %39 = vector.shape_cast %38 : vector<1x128xf32> to vector<128xf32>
    %40 = vector.shape_cast %39 : vector<128xf32> to vector<1x1x1x128xf32>
    %41 = vector.broadcast %40 : vector<1x1x1x128xf32> to vector<1x6x8x128xf32>
    %42 = arith.mulf %36, %41 : vector<1x6x8x128xf32>
    %43 = arith.addf %37, %42 : vector<1x6x8x128xf32>
    %c0_56 = arith.constant 0 : index
    %c2_57 = arith.constant 2 : index
    %c0_58 = arith.constant 0 : index
    %c0_59 = arith.constant 0 : index
    %44 = vector.load %arg11[%c0_56, %c2_57, %c0_58, %c0_59] : memref<1x8x8x128xf32, #tpu.memory_space<vmem>>, vector<1x6x8x128xf32>
    tpu.vector_store %arg11[%c0_56, %c2_57, %c0_58, %c0_59], %43 {strides = array<i32>} : memref<1x8x8x128xf32, #tpu.memory_space<vmem>>, vector<1x6x8x128xf32>,
    %c0_60 = arith.constant 0 : index
    %c0_61 = arith.constant 0 : index
    %c1_62 = arith.constant 1 : index
    %c0_63 = arith.constant 0 : index
    %45 = vector.load %arg10[%c0_60, %c0_61, %c1_62, %c0_63] : memref<1x8x8x128xf32, #tpu.memory_space<vmem>>, vector<1x6x7x128xf32>
    %c0_64 = arith.constant 0 : index
    %c2_65 = arith.constant 2 : index
    %c0_66 = arith.constant 0 : index
    %c0_67 = arith.constant 0 : index
    %46 = vector.load %arg11[%c0_64, %c2_65, %c0_66, %c0_67] : memref<1x8x8x128xf32, #tpu.memory_space<vmem>>, vector<1x6x7x128xf32>
    %c3 = arith.constant 3 : index
    %c0_68 = arith.constant 0 : index
    %47 = vector.load %arg5[%c3, %c0_68] : memref<25x128xf32, #tpu.memory_space<vmem>>, vector<1x128xf32>
    %48 = vector.shape_cast %47 : vector<1x128xf32> to vector<128xf32>
    %49 = vector.shape_cast %48 : vector<128xf32> to vector<1x1x1x128xf32>
    %50 = vector.broadcast %49 : vector<1x1x1x128xf32> to vector<1x6x7x128xf32>
    %51 = arith.mulf %45, %50 : vector<1x6x7x128xf32>
    %52 = arith.addf %46, %51 : vector<1x6x7x128xf32>
    %c0_69 = arith.constant 0 : index
    %c2_70 = arith.constant 2 : index
    %c0_71 = arith.constant 0 : index
    %c0_72 = arith.constant 0 : index
    %53 = vector.load %arg11[%c0_69, %c2_70, %c0_71, %c0_72] : memref<1x8x8x128xf32, #tpu.memory_space<vmem>>, vector<1x6x7x128xf32>
    tpu.vector_store %arg11[%c0_69, %c2_70, %c0_71, %c0_72], %52 {strides = array<i32>} : memref<1x8x8x128xf32, #tpu.memory_space<vmem>>, vector<1x6x7x128xf32>,
    %c0_73 = arith.constant 0 : index
    %c0_74 = arith.constant 0 : index
    %c2_75 = arith.constant 2 : index
    %c0_76 = arith.constant 0 : index
    %54 = vector.load %arg10[%c0_73, %c0_74, %c2_75, %c0_76] : memref<1x8x8x128xf32, #tpu.memory_space<vmem>>, vector<1x6x6x128xf32>
    %c0_77 = arith.constant 0 : index
    %c2_78 = arith.constant 2 : index
    %c0_79 = arith.constant 0 : index
    %c0_80 = arith.constant 0 : index
    %55 = vector.load %arg11[%c0_77, %c2_78, %c0_79, %c0_80] : memref<1x8x8x128xf32, #tpu.memory_space<vmem>>, vector<1x6x6x128xf32>
    %c4 = arith.constant 4 : index
    %c0_81 = arith.constant 0 : index
    %56 = vector.load %arg5[%c4, %c0_81] : memref<25x128xf32, #tpu.memory_space<vmem>>, vector<1x128xf32>
    %57 = vector.shape_cast %56 : vector<1x128xf32> to vector<128xf32>
    %58 = vector.shape_cast %57 : vector<128xf32> to vector<1x1x1x128xf32>
    %59 = vector.broadcast %58 : vector<1x1x1x128xf32> to vector<1x6x6x128xf32>
    %60 = arith.mulf %54, %59 : vector<1x6x6x128xf32>
    %61 = arith.addf %55, %60 : vector<1x6x6x128xf32>
    %c0_82 = arith.constant 0 : index
    %c2_83 = arith.constant 2 : index
    %c0_84 = arith.constant 0 : index
    %c0_85 = arith.constant 0 : index
    %62 = vector.load %arg11[%c0_82, %c2_83, %c0_84, %c0_85] : memref<1x8x8x128xf32, #tpu.memory_space<vmem>>, vector<1x6x6x128xf32>
    tpu.vector_store %arg11[%c0_82, %c2_83, %c0_84, %c0_85], %61 {strides = array<i32>} : memref<1x8x8x128xf32, #tpu.memory_space<vmem>>, vector<1x6x6x128xf32>,
    %c0_86 = arith.constant 0 : index
    %c0_87 = arith.constant 0 : index
    %c0_88 = arith.constant 0 : index
    %c0_89 = arith.constant 0 : index
    %63 = vector.load %arg10[%c0_86, %c0_87, %c0_88, %c0_89] : memref<1x8x8x128xf32, #tpu.memory_space<vmem>>, vector<1x7x6x128xf32>
    %c0_90 = arith.constant 0 : index
    %c1_91 = arith.constant 1 : index
    %c2_92 = arith.constant 2 : index
    %c0_93 = arith.constant 0 : index
    %64 = vector.load %arg11[%c0_90, %c1_91, %c2_92, %c0_93] : memref<1x8x8x128xf32, #tpu.memory_space<vmem>>, vector<1x7x6x128xf32>
    %c5 = arith.constant 5 : index
    %c0_94 = arith.constant 0 : index
    %65 = vector.load %arg5[%c5, %c0_94] : memref<25x128xf32, #tpu.memory_space<vmem>>, vector<1x128xf32>
    %66 = vector.shape_cast %65 : vector<1x128xf32> to vector<128xf32>
    %67 = vector.shape_cast %66 : vector<128xf32> to vector<1x1x1x128xf32>
    %68 = vector.broadcast %67 : vector<1x1x1x128xf32> to vector<1x7x6x128xf32>
    %69 = arith.mulf %63, %68 : vector<1x7x6x128xf32>
    %70 = arith.addf %64, %69 : vector<1x7x6x128xf32>
    %c0_95 = arith.constant 0 : index
    %c1_96 = arith.constant 1 : index
    %c2_97 = arith.constant 2 : index
    %c0_98 = arith.constant 0 : index
    %71 = vector.load %arg11[%c0_95, %c1_96, %c2_97, %c0_98] : memref<1x8x8x128xf32, #tpu.memory_space<vmem>>, vector<1x7x6x128xf32>
    tpu.vector_store %arg11[%c0_95, %c1_96, %c2_97, %c0_98], %70 {strides = array<i32>} : memref<1x8x8x128xf32, #tpu.memory_space<vmem>>, vector<1x7x6x128xf32>,
    %c0_99 = arith.constant 0 : index
    %c0_100 = arith.constant 0 : index
    %c0_101 = arith.constant 0 : index
    %c0_102 = arith.constant 0 : index
    %72 = vector.load %arg10[%c0_99, %c0_100, %c0_101, %c0_102] : memref<1x8x8x128xf32, #tpu.memory_space<vmem>>, vector<1x7x7x128xf32>
    %c0_103 = arith.constant 0 : index
    %c1_104 = arith.constant 1 : index
    %c1_105 = arith.constant 1 : index
    %c0_106 = arith.constant 0 : index
    %73 = vector.load %arg11[%c0_103, %c1_104, %c1_105, %c0_106] : memref<1x8x8x128xf32, #tpu.memory_space<vmem>>, vector<1x7x7x128xf32>
    %c6 = arith.constant 6 : index
    %c0_107 = arith.constant 0 : index
    %74 = vector.load %arg5[%c6, %c0_107] : memref<25x128xf32, #tpu.memory_space<vmem>>, vector<1x128xf32>
    %75 = vector.shape_cast %74 : vector<1x128xf32> to vector<128xf32>
    %76 = vector.shape_cast %75 : vector<128xf32> to vector<1x1x1x128xf32>
    %77 = vector.broadcast %76 : vector<1x1x1x128xf32> to vector<1x7x7x128xf32>
    %78 = arith.mulf %72, %77 : vector<1x7x7x128xf32>
    %79 = arith.addf %73, %78 : vector<1x7x7x128xf32>
    %c0_108 = arith.constant 0 : index
    %c1_109 = arith.constant 1 : index
    %c1_110 = arith.constant 1 : index
    %c0_111 = arith.constant 0 : index
    %80 = vector.load %arg11[%c0_108, %c1_109, %c1_110, %c0_111] : memref<1x8x8x128xf32, #tpu.memory_space<vmem>>, vector<1x7x7x128xf32>
    tpu.vector_store %arg11[%c0_108, %c1_109, %c1_110, %c0_111], %79 {strides = array<i32>} : memref<1x8x8x128xf32, #tpu.memory_space<vmem>>, vector<1x7x7x128xf32>,
    %c0_112 = arith.constant 0 : index
    %c0_113 = arith.constant 0 : index
    %c0_114 = arith.constant 0 : index
    %c0_115 = arith.constant 0 : index
    %81 = vector.load %arg10[%c0_112, %c0_113, %c0_114, %c0_115] : memref<1x8x8x128xf32, #tpu.memory_space<vmem>>, vector<1x7x8x128xf32>
    %c0_116 = arith.constant 0 : index
    %c1_117 = arith.constant 1 : index
    %c0_118 = arith.constant 0 : index
    %c0_119 = arith.constant 0 : index
    %82 = vector.load %arg11[%c0_116, %c1_117, %c0_118, %c0_119] : memref<1x8x8x128xf32, #tpu.memory_space<vmem>>, vector<1x7x8x128xf32>
    %c7 = arith.constant 7 : index
    %c0_120 = arith.constant 0 : index
    %83 = vector.load %arg5[%c7, %c0_120] : memref<25x128xf32, #tpu.memory_space<vmem>>, vector<1x128xf32>
    %84 = vector.shape_cast %83 : vector<1x128xf32> to vector<128xf32>
    %85 = vector.shape_cast %84 : vector<128xf32> to vector<1x1x1x128xf32>
    %86 = vector.broadcast %85 : vector<1x1x1x128xf32> to vector<1x7x8x128xf32>
    %87 = arith.mulf %81, %86 : vector<1x7x8x128xf32>
    %88 = arith.addf %82, %87 : vector<1x7x8x128xf32>
    %c0_121 = arith.constant 0 : index
    %c1_122 = arith.constant 1 : index
    %c0_123 = arith.constant 0 : index
    %c0_124 = arith.constant 0 : index
    %89 = vector.load %arg11[%c0_121, %c1_122, %c0_123, %c0_124] : memref<1x8x8x128xf32, #tpu.memory_space<vmem>>, vector<1x7x8x128xf32>
    tpu.vector_store %arg11[%c0_121, %c1_122, %c0_123, %c0_124], %88 {strides = array<i32>} : memref<1x8x8x128xf32, #tpu.memory_space<vmem>>, vector<1x7x8x128xf32>,
    %c0_125 = arith.constant 0 : index
    %c0_126 = arith.constant 0 : index
    %c1_127 = arith.constant 1 : index
    %c0_128 = arith.constant 0 : index
    %90 = vector.load %arg10[%c0_125, %c0_126, %c1_127, %c0_128] : memref<1x8x8x128xf32, #tpu.memory_space<vmem>>, vector<1x7x7x128xf32>
    %c0_129 = arith.constant 0 : index
    %c1_130 = arith.constant 1 : index
    %c0_131 = arith.constant 0 : index
    %c0_132 = arith.constant 0 : index
    %91 = vector.load %arg11[%c0_129, %c1_130, %c0_131, %c0_132] : memref<1x8x8x128xf32, #tpu.memory_space<vmem>>, vector<1x7x7x128xf32>
    %c8 = arith.constant 8 : index
    %c0_133 = arith.constant 0 : index
    %92 = vector.load %arg5[%c8, %c0_133] : memref<25x128xf32, #tpu.memory_space<vmem>>, vector<1x128xf32>
    %93 = vector.shape_cast %92 : vector<1x128xf32> to vector<128xf32>
    %94 = vector.shape_cast %93 : vector<128xf32> to vector<1x1x1x128xf32>
    %95 = vector.broadcast %94 : vector<1x1x1x128xf32> to vector<1x7x7x128xf32>
    %96 = arith.mulf %90, %95 : vector<1x7x7x128xf32>
    %97 = arith.addf %91, %96 : vector<1x7x7x128xf32>
    %c0_134 = arith.constant 0 : index
    %c1_135 = arith.constant 1 : index
    %c0_136 = arith.constant 0 : index
    %c0_137 = arith.constant 0 : index
    %98 = vector.load %arg11[%c0_134, %c1_135, %c0_136, %c0_137] : memref<1x8x8x128xf32, #tpu.memory_space<vmem>>, vector<1x7x7x128xf32>
    tpu.vector_store %arg11[%c0_134, %c1_135, %c0_136, %c0_137], %97 {strides = array<i32>} : memref<1x8x8x128xf32, #tpu.memory_space<vmem>>, vector<1x7x7x128xf32>,
    %c0_138 = arith.constant 0 : index
    %c0_139 = arith.constant 0 : index
    %c2_140 = arith.constant 2 : index
    %c0_141 = arith.constant 0 : index
    %99 = vector.load %arg10[%c0_138, %c0_139, %c2_140, %c0_141] : memref<1x8x8x128xf32, #tpu.memory_space<vmem>>, vector<1x7x6x128xf32>
    %c0_142 = arith.constant 0 : index
    %c1_143 = arith.constant 1 : index
    %c0_144 = arith.constant 0 : index
    %c0_145 = arith.constant 0 : index
    %100 = vector.load %arg11[%c0_142, %c1_143, %c0_144, %c0_145] : memref<1x8x8x128xf32, #tpu.memory_space<vmem>>, vector<1x7x6x128xf32>
    %c9 = arith.constant 9 : index
    %c0_146 = arith.constant 0 : index
    %101 = vector.load %arg5[%c9, %c0_146] : memref<25x128xf32, #tpu.memory_space<vmem>>, vector<1x128xf32>
    %102 = vector.shape_cast %101 : vector<1x128xf32> to vector<128xf32>
    %103 = vector.shape_cast %102 : vector<128xf32> to vector<1x1x1x128xf32>
    %104 = vector.broadcast %103 : vector<1x1x1x128xf32> to vector<1x7x6x128xf32>
    %105 = arith.mulf %99, %104 : vector<1x7x6x128xf32>
    %106 = arith.addf %100, %105 : vector<1x7x6x128xf32>
    %c0_147 = arith.constant 0 : index
    %c1_148 = arith.constant 1 : index
    %c0_149 = arith.constant 0 : index
    %c0_150 = arith.constant 0 : index
    %107 = vector.load %arg11[%c0_147, %c1_148, %c0_149, %c0_150] : memref<1x8x8x128xf32, #tpu.memory_space<vmem>>, vector<1x7x6x128xf32>
    tpu.vector_store %arg11[%c0_147, %c1_148, %c0_149, %c0_150], %106 {strides = array<i32>} : memref<1x8x8x128xf32, #tpu.memory_space<vmem>>, vector<1x7x6x128xf32>,
    %c0_151 = arith.constant 0 : index
    %c0_152 = arith.constant 0 : index
    %c0_153 = arith.constant 0 : index
    %c0_154 = arith.constant 0 : index
    %108 = vector.load %arg10[%c0_151, %c0_152, %c0_153, %c0_154] : memref<1x8x8x128xf32, #tpu.memory_space<vmem>>, vector<1x8x6x128xf32>
    %c0_155 = arith.constant 0 : index
    %c0_156 = arith.constant 0 : index
    %c2_157 = arith.constant 2 : index
    %c0_158 = arith.constant 0 : index
    %109 = vector.load %arg11[%c0_155, %c0_156, %c2_157, %c0_158] : memref<1x8x8x128xf32, #tpu.memory_space<vmem>>, vector<1x8x6x128xf32>
    %c10 = arith.constant 10 : index
    %c0_159 = arith.constant 0 : index
    %110 = vector.load %arg5[%c10, %c0_159] : memref<25x128xf32, #tpu.memory_space<vmem>>, vector<1x128xf32>
    %111 = vector.shape_cast %110 : vector<1x128xf32> to vector<128xf32>
    %112 = vector.shape_cast %111 : vector<128xf32> to vector<1x1x1x128xf32>
    %113 = vector.broadcast %112 : vector<1x1x1x128xf32> to vector<1x8x6x128xf32>
    %114 = arith.mulf %108, %113 : vector<1x8x6x128xf32>
    %115 = arith.addf %109, %114 : vector<1x8x6x128xf32>
    %c0_160 = arith.constant 0 : index
    %c0_161 = arith.constant 0 : index
    %c2_162 = arith.constant 2 : index
    %c0_163 = arith.constant 0 : index
    %116 = vector.load %arg11[%c0_160, %c0_161, %c2_162, %c0_163] : memref<1x8x8x128xf32, #tpu.memory_space<vmem>>, vector<1x8x6x128xf32>
    tpu.vector_store %arg11[%c0_160, %c0_161, %c2_162, %c0_163], %115 {strides = array<i32>} : memref<1x8x8x128xf32, #tpu.memory_space<vmem>>, vector<1x8x6x128xf32>,
    %c0_164 = arith.constant 0 : index
    %c0_165 = arith.constant 0 : index
    %c0_166 = arith.constant 0 : index
    %c0_167 = arith.constant 0 : index
    %117 = vector.load %arg10[%c0_164, %c0_165, %c0_166, %c0_167] : memref<1x8x8x128xf32, #tpu.memory_space<vmem>>, vector<1x8x7x128xf32>
    %c0_168 = arith.constant 0 : index
    %c0_169 = arith.constant 0 : index
    %c1_170 = arith.constant 1 : index
    %c0_171 = arith.constant 0 : index
    %118 = vector.load %arg11[%c0_168, %c0_169, %c1_170, %c0_171] : memref<1x8x8x128xf32, #tpu.memory_space<vmem>>, vector<1x8x7x128xf32>
    %c11 = arith.constant 11 : index
    %c0_172 = arith.constant 0 : index
    %119 = vector.load %arg5[%c11, %c0_172] : memref<25x128xf32, #tpu.memory_space<vmem>>, vector<1x128xf32>
    %120 = vector.shape_cast %119 : vector<1x128xf32> to vector<128xf32>
    %121 = vector.shape_cast %120 : vector<128xf32> to vector<1x1x1x128xf32>
    %122 = vector.broadcast %121 : vector<1x1x1x128xf32> to vector<1x8x7x128xf32>
    %123 = arith.mulf %117, %122 : vector<1x8x7x128xf32>
    %124 = arith.addf %118, %123 : vector<1x8x7x128xf32>
    %c0_173 = arith.constant 0 : index
    %c0_174 = arith.constant 0 : index
    %c1_175 = arith.constant 1 : index
    %c0_176 = arith.constant 0 : index
    %125 = vector.load %arg11[%c0_173, %c0_174, %c1_175, %c0_176] : memref<1x8x8x128xf32, #tpu.memory_space<vmem>>, vector<1x8x7x128xf32>
    tpu.vector_store %arg11[%c0_173, %c0_174, %c1_175, %c0_176], %124 {strides = array<i32>} : memref<1x8x8x128xf32, #tpu.memory_space<vmem>>, vector<1x8x7x128xf32>,
    %c0_177 = arith.constant 0 : index
    %c0_178 = arith.constant 0 : index
    %c1_179 = arith.constant 1 : index
    %c0_180 = arith.constant 0 : index
    %126 = vector.load %arg10[%c0_177, %c0_178, %c1_179, %c0_180] : memref<1x8x8x128xf32, #tpu.memory_space<vmem>>, vector<1x8x7x128xf32>
    %c0_181 = arith.constant 0 : index
    %c0_182 = arith.constant 0 : index
    %c0_183 = arith.constant 0 : index
    %c0_184 = arith.constant 0 : index
    %127 = vector.load %arg11[%c0_181, %c0_182, %c0_183, %c0_184] : memref<1x8x8x128xf32, #tpu.memory_space<vmem>>, vector<1x8x7x128xf32>
    %c13 = arith.constant 13 : index
    %c0_185 = arith.constant 0 : index
    %128 = vector.load %arg5[%c13, %c0_185] : memref<25x128xf32, #tpu.memory_space<vmem>>, vector<1x128xf32>
    %129 = vector.shape_cast %128 : vector<1x128xf32> to vector<128xf32>
    %130 = vector.shape_cast %129 : vector<128xf32> to vector<1x1x1x128xf32>
    %131 = vector.broadcast %130 : vector<1x1x1x128xf32> to vector<1x8x7x128xf32>
    %132 = arith.mulf %126, %131 : vector<1x8x7x128xf32>
    %133 = arith.addf %127, %132 : vector<1x8x7x128xf32>
    %c0_186 = arith.constant 0 : index
    %c0_187 = arith.constant 0 : index
    %c0_188 = arith.constant 0 : index
    %c0_189 = arith.constant 0 : index
    %134 = vector.load %arg11[%c0_186, %c0_187, %c0_188, %c0_189] : memref<1x8x8x128xf32, #tpu.memory_space<vmem>>, vector<1x8x7x128xf32>
    tpu.vector_store %arg11[%c0_186, %c0_187, %c0_188, %c0_189], %133 {strides = array<i32>} : memref<1x8x8x128xf32, #tpu.memory_space<vmem>>, vector<1x8x7x128xf32>,
    %c0_190 = arith.constant 0 : index
    %c0_191 = arith.constant 0 : index
    %c2_192 = arith.constant 2 : index
    %c0_193 = arith.constant 0 : index
    %135 = vector.load %arg10[%c0_190, %c0_191, %c2_192, %c0_193] : memref<1x8x8x128xf32, #tpu.memory_space<vmem>>, vector<1x8x6x128xf32>
    %c0_194 = arith.constant 0 : index
    %c0_195 = arith.constant 0 : index
    %c0_196 = arith.constant 0 : index
    %c0_197 = arith.constant 0 : index
    %136 = vector.load %arg11[%c0_194, %c0_195, %c0_196, %c0_197] : memref<1x8x8x128xf32, #tpu.memory_space<vmem>>, vector<1x8x6x128xf32>
    %c14 = arith.constant 14 : index
    %c0_198 = arith.constant 0 : index
    %137 = vector.load %arg5[%c14, %c0_198] : memref<25x128xf32, #tpu.memory_space<vmem>>, vector<1x128xf32>
    %138 = vector.shape_cast %137 : vector<1x128xf32> to vector<128xf32>
    %139 = vector.shape_cast %138 : vector<128xf32> to vector<1x1x1x128xf32>
    %140 = vector.broadcast %139 : vector<1x1x1x128xf32> to vector<1x8x6x128xf32>
    %141 = arith.mulf %135, %140 : vector<1x8x6x128xf32>
    %142 = arith.addf %136, %141 : vector<1x8x6x128xf32>
    %c0_199 = arith.constant 0 : index
    %c0_200 = arith.constant 0 : index
    %c0_201 = arith.constant 0 : index
    %c0_202 = arith.constant 0 : index
    %143 = vector.load %arg11[%c0_199, %c0_200, %c0_201, %c0_202] : memref<1x8x8x128xf32, #tpu.memory_space<vmem>>, vector<1x8x6x128xf32>
    tpu.vector_store %arg11[%c0_199, %c0_200, %c0_201, %c0_202], %142 {strides = array<i32>} : memref<1x8x8x128xf32, #tpu.memory_space<vmem>>, vector<1x8x6x128xf32>,
    %c0_203 = arith.constant 0 : index
    %c1_204 = arith.constant 1 : index
    %c0_205 = arith.constant 0 : index
    %c0_206 = arith.constant 0 : index
    %144 = vector.load %arg10[%c0_203, %c1_204, %c0_205, %c0_206] : memref<1x8x8x128xf32, #tpu.memory_space<vmem>>, vector<1x7x6x128xf32>
    %c0_207 = arith.constant 0 : index
    %c0_208 = arith.constant 0 : index
    %c2_209 = arith.constant 2 : index
    %c0_210 = arith.constant 0 : index
    %145 = vector.load %arg11[%c0_207, %c0_208, %c2_209, %c0_210] : memref<1x8x8x128xf32, #tpu.memory_space<vmem>>, vector<1x7x6x128xf32>
    %c15 = arith.constant 15 : index
    %c0_211 = arith.constant 0 : index
    %146 = vector.load %arg5[%c15, %c0_211] : memref<25x128xf32, #tpu.memory_space<vmem>>, vector<1x128xf32>
    %147 = vector.shape_cast %146 : vector<1x128xf32> to vector<128xf32>
    %148 = vector.shape_cast %147 : vector<128xf32> to vector<1x1x1x128xf32>
    %149 = vector.broadcast %148 : vector<1x1x1x128xf32> to vector<1x7x6x128xf32>
    %150 = arith.mulf %144, %149 : vector<1x7x6x128xf32>
    %151 = arith.addf %145, %150 : vector<1x7x6x128xf32>
    %c0_212 = arith.constant 0 : index
    %c0_213 = arith.constant 0 : index
    %c2_214 = arith.constant 2 : index
    %c0_215 = arith.constant 0 : index
    %152 = vector.load %arg11[%c0_212, %c0_213, %c2_214, %c0_215] : memref<1x8x8x128xf32, #tpu.memory_space<vmem>>, vector<1x7x6x128xf32>
    tpu.vector_store %arg11[%c0_212, %c0_213, %c2_214, %c0_215], %151 {strides = array<i32>} : memref<1x8x8x128xf32, #tpu.memory_space<vmem>>, vector<1x7x6x128xf32>,
    %c0_216 = arith.constant 0 : index
    %c1_217 = arith.constant 1 : index
    %c0_218 = arith.constant 0 : index
    %c0_219 = arith.constant 0 : index
    %153 = vector.load %arg10[%c0_216, %c1_217, %c0_218, %c0_219] : memref<1x8x8x128xf32, #tpu.memory_space<vmem>>, vector<1x7x7x128xf32>
    %c0_220 = arith.constant 0 : index
    %c0_221 = arith.constant 0 : index
    %c1_222 = arith.constant 1 : index
    %c0_223 = arith.constant 0 : index
    %154 = vector.load %arg11[%c0_220, %c0_221, %c1_222, %c0_223] : memref<1x8x8x128xf32, #tpu.memory_space<vmem>>, vector<1x7x7x128xf32>
    %c16 = arith.constant 16 : index
    %c0_224 = arith.constant 0 : index
    %155 = vector.load %arg5[%c16, %c0_224] : memref<25x128xf32, #tpu.memory_space<vmem>>, vector<1x128xf32>
    %156 = vector.shape_cast %155 : vector<1x128xf32> to vector<128xf32>
    %157 = vector.shape_cast %156 : vector<128xf32> to vector<1x1x1x128xf32>
    %158 = vector.broadcast %157 : vector<1x1x1x128xf32> to vector<1x7x7x128xf32>
    %159 = arith.mulf %153, %158 : vector<1x7x7x128xf32>
    %160 = arith.addf %154, %159 : vector<1x7x7x128xf32>
    %c0_225 = arith.constant 0 : index
    %c0_226 = arith.constant 0 : index
    %c1_227 = arith.constant 1 : index
    %c0_228 = arith.constant 0 : index
    %161 = vector.load %arg11[%c0_225, %c0_226, %c1_227, %c0_228] : memref<1x8x8x128xf32, #tpu.memory_space<vmem>>, vector<1x7x7x128xf32>
    tpu.vector_store %arg11[%c0_225, %c0_226, %c1_227, %c0_228], %160 {strides = array<i32>} : memref<1x8x8x128xf32, #tpu.memory_space<vmem>>, vector<1x7x7x128xf32>,
    %c0_229 = arith.constant 0 : index
    %c1_230 = arith.constant 1 : index
    %c0_231 = arith.constant 0 : index
    %c0_232 = arith.constant 0 : index
    %162 = vector.load %arg10[%c0_229, %c1_230, %c0_231, %c0_232] : memref<1x8x8x128xf32, #tpu.memory_space<vmem>>, vector<1x7x8x128xf32>
    %c0_233 = arith.constant 0 : index
    %c0_234 = arith.constant 0 : index
    %c0_235 = arith.constant 0 : index
    %c0_236 = arith.constant 0 : index
    %163 = vector.load %arg11[%c0_233, %c0_234, %c0_235, %c0_236] : memref<1x8x8x128xf32, #tpu.memory_space<vmem>>, vector<1x7x8x128xf32>
    %c17 = arith.constant 17 : index
    %c0_237 = arith.constant 0 : index
    %164 = vector.load %arg5[%c17, %c0_237] : memref<25x128xf32, #tpu.memory_space<vmem>>, vector<1x128xf32>
    %165 = vector.shape_cast %164 : vector<1x128xf32> to vector<128xf32>
    %166 = vector.shape_cast %165 : vector<128xf32> to vector<1x1x1x128xf32>
    %167 = vector.broadcast %166 : vector<1x1x1x128xf32> to vector<1x7x8x128xf32>
    %168 = arith.mulf %162, %167 : vector<1x7x8x128xf32>
    %169 = arith.addf %163, %168 : vector<1x7x8x128xf32>
    %c0_238 = arith.constant 0 : index
    %c0_239 = arith.constant 0 : index
    %c0_240 = arith.constant 0 : index
    %c0_241 = arith.constant 0 : index
    %170 = vector.load %arg11[%c0_238, %c0_239, %c0_240, %c0_241] : memref<1x8x8x128xf32, #tpu.memory_space<vmem>>, vector<1x7x8x128xf32>
    tpu.vector_store %arg11[%c0_238, %c0_239, %c0_240, %c0_241], %169 {strides = array<i32>} : memref<1x8x8x128xf32, #tpu.memory_space<vmem>>, vector<1x7x8x128xf32>,
    %c0_242 = arith.constant 0 : index
    %c1_243 = arith.constant 1 : index
    %c1_244 = arith.constant 1 : index
    %c0_245 = arith.constant 0 : index
    %171 = vector.load %arg10[%c0_242, %c1_243, %c1_244, %c0_245] : memref<1x8x8x128xf32, #tpu.memory_space<vmem>>, vector<1x7x7x128xf32>
    %c0_246 = arith.constant 0 : index
    %c0_247 = arith.constant 0 : index
    %c0_248 = arith.constant 0 : index
    %c0_249 = arith.constant 0 : index
    %172 = vector.load %arg11[%c0_246, %c0_247, %c0_248, %c0_249] : memref<1x8x8x128xf32, #tpu.memory_space<vmem>>, vector<1x7x7x128xf32>
    %c18 = arith.constant 18 : index
    %c0_250 = arith.constant 0 : index
    %173 = vector.load %arg5[%c18, %c0_250] : memref<25x128xf32, #tpu.memory_space<vmem>>, vector<1x128xf32>
    %174 = vector.shape_cast %173 : vector<1x128xf32> to vector<128xf32>
    %175 = vector.shape_cast %174 : vector<128xf32> to vector<1x1x1x128xf32>
    %176 = vector.broadcast %175 : vector<1x1x1x128xf32> to vector<1x7x7x128xf32>
    %177 = arith.mulf %171, %176 : vector<1x7x7x128xf32>
    %178 = arith.addf %172, %177 : vector<1x7x7x128xf32>
    %c0_251 = arith.constant 0 : index
    %c0_252 = arith.constant 0 : index
    %c0_253 = arith.constant 0 : index
    %c0_254 = arith.constant 0 : index
    %179 = vector.load %arg11[%c0_251, %c0_252, %c0_253, %c0_254] : memref<1x8x8x128xf32, #tpu.memory_space<vmem>>, vector<1x7x7x128xf32>
    tpu.vector_store %arg11[%c0_251, %c0_252, %c0_253, %c0_254], %178 {strides = array<i32>} : memref<1x8x8x128xf32, #tpu.memory_space<vmem>>, vector<1x7x7x128xf32>,
    %c0_255 = arith.constant 0 : index
    %c1_256 = arith.constant 1 : index
    %c2_257 = arith.constant 2 : index
    %c0_258 = arith.constant 0 : index
    %180 = vector.load %arg10[%c0_255, %c1_256, %c2_257, %c0_258] : memref<1x8x8x128xf32, #tpu.memory_space<vmem>>, vector<1x7x6x128xf32>
    %c0_259 = arith.constant 0 : index
    %c0_260 = arith.constant 0 : index
    %c0_261 = arith.constant 0 : index
    %c0_262 = arith.constant 0 : index
    %181 = vector.load %arg11[%c0_259, %c0_260, %c0_261, %c0_262] : memref<1x8x8x128xf32, #tpu.memory_space<vmem>>, vector<1x7x6x128xf32>
    %c19 = arith.constant 19 : index
    %c0_263 = arith.constant 0 : index
    %182 = vector.load %arg5[%c19, %c0_263] : memref<25x128xf32, #tpu.memory_space<vmem>>, vector<1x128xf32>
    %183 = vector.shape_cast %182 : vector<1x128xf32> to vector<128xf32>
    %184 = vector.shape_cast %183 : vector<128xf32> to vector<1x1x1x128xf32>
    %185 = vector.broadcast %184 : vector<1x1x1x128xf32> to vector<1x7x6x128xf32>
    %186 = arith.mulf %180, %185 : vector<1x7x6x128xf32>
    %187 = arith.addf %181, %186 : vector<1x7x6x128xf32>
    %c0_264 = arith.constant 0 : index
    %c0_265 = arith.constant 0 : index
    %c0_266 = arith.constant 0 : index
    %c0_267 = arith.constant 0 : index
    %188 = vector.load %arg11[%c0_264, %c0_265, %c0_266, %c0_267] : memref<1x8x8x128xf32, #tpu.memory_space<vmem>>, vector<1x7x6x128xf32>
    tpu.vector_store %arg11[%c0_264, %c0_265, %c0_266, %c0_267], %187 {strides = array<i32>} : memref<1x8x8x128xf32, #tpu.memory_space<vmem>>, vector<1x7x6x128xf32>,
    %c0_268 = arith.constant 0 : index
    %c2_269 = arith.constant 2 : index
    %c0_270 = arith.constant 0 : index
    %c0_271 = arith.constant 0 : index
    %189 = vector.load %arg10[%c0_268, %c2_269, %c0_270, %c0_271] : memref<1x8x8x128xf32, #tpu.memory_space<vmem>>, vector<1x6x6x128xf32>
    %c0_272 = arith.constant 0 : index
    %c0_273 = arith.constant 0 : index
    %c2_274 = arith.constant 2 : index
    %c0_275 = arith.constant 0 : index
    %190 = vector.load %arg11[%c0_272, %c0_273, %c2_274, %c0_275] : memref<1x8x8x128xf32, #tpu.memory_space<vmem>>, vector<1x6x6x128xf32>
    %c20 = arith.constant 20 : index
    %c0_276 = arith.constant 0 : index
    %191 = vector.load %arg5[%c20, %c0_276] : memref<25x128xf32, #tpu.memory_space<vmem>>, vector<1x128xf32>
    %192 = vector.shape_cast %191 : vector<1x128xf32> to vector<128xf32>
    %193 = vector.shape_cast %192 : vector<128xf32> to vector<1x1x1x128xf32>
    %194 = vector.broadcast %193 : vector<1x1x1x128xf32> to vector<1x6x6x128xf32>
    %195 = arith.mulf %189, %194 : vector<1x6x6x128xf32>
    %196 = arith.addf %190, %195 : vector<1x6x6x128xf32>
    %c0_277 = arith.constant 0 : index
    %c0_278 = arith.constant 0 : index
    %c2_279 = arith.constant 2 : index
    %c0_280 = arith.constant 0 : index
    %197 = vector.load %arg11[%c0_277, %c0_278, %c2_279, %c0_280] : memref<1x8x8x128xf32, #tpu.memory_space<vmem>>, vector<1x6x6x128xf32>
    tpu.vector_store %arg11[%c0_277, %c0_278, %c2_279, %c0_280], %196 {strides = array<i32>} : memref<1x8x8x128xf32, #tpu.memory_space<vmem>>, vector<1x6x6x128xf32>,
    %c0_281 = arith.constant 0 : index
    %c2_282 = arith.constant 2 : index
    %c0_283 = arith.constant 0 : index
    %c0_284 = arith.constant 0 : index
    %198 = vector.load %arg10[%c0_281, %c2_282, %c0_283, %c0_284] : memref<1x8x8x128xf32, #tpu.memory_space<vmem>>, vector<1x6x7x128xf32>
    %c0_285 = arith.constant 0 : index
    %c0_286 = arith.constant 0 : index
    %c1_287 = arith.constant 1 : index
    %c0_288 = arith.constant 0 : index
    %199 = vector.load %arg11[%c0_285, %c0_286, %c1_287, %c0_288] : memref<1x8x8x128xf32, #tpu.memory_space<vmem>>, vector<1x6x7x128xf32>
    %c21 = arith.constant 21 : index
    %c0_289 = arith.constant 0 : index
    %200 = vector.load %arg5[%c21, %c0_289] : memref<25x128xf32, #tpu.memory_space<vmem>>, vector<1x128xf32>
    %201 = vector.shape_cast %200 : vector<1x128xf32> to vector<128xf32>
    %202 = vector.shape_cast %201 : vector<128xf32> to vector<1x1x1x128xf32>
    %203 = vector.broadcast %202 : vector<1x1x1x128xf32> to vector<1x6x7x128xf32>
    %204 = arith.mulf %198, %203 : vector<1x6x7x128xf32>
    %205 = arith.addf %199, %204 : vector<1x6x7x128xf32>
    %c0_290 = arith.constant 0 : index
    %c0_291 = arith.constant 0 : index
    %c1_292 = arith.constant 1 : index
    %c0_293 = arith.constant 0 : index
    %206 = vector.load %arg11[%c0_290, %c0_291, %c1_292, %c0_293] : memref<1x8x8x128xf32, #tpu.memory_space<vmem>>, vector<1x6x7x128xf32>
    tpu.vector_store %arg11[%c0_290, %c0_291, %c1_292, %c0_293], %205 {strides = array<i32>} : memref<1x8x8x128xf32, #tpu.memory_space<vmem>>, vector<1x6x7x128xf32>,
    %c0_294 = arith.constant 0 : index
    %c2_295 = arith.constant 2 : index
    %c0_296 = arith.constant 0 : index
    %c0_297 = arith.constant 0 : index
    %207 = vector.load %arg10[%c0_294, %c2_295, %c0_296, %c0_297] : memref<1x8x8x128xf32, #tpu.memory_space<vmem>>, vector<1x6x8x128xf32>
    %c0_298 = arith.constant 0 : index
    %c0_299 = arith.constant 0 : index
    %c0_300 = arith.constant 0 : index
    %c0_301 = arith.constant 0 : index
    %208 = vector.load %arg11[%c0_298, %c0_299, %c0_300, %c0_301] : memref<1x8x8x128xf32, #tpu.memory_space<vmem>>, vector<1x6x8x128xf32>
    %c22 = arith.constant 22 : index
    %c0_302 = arith.constant 0 : index
    %209 = vector.load %arg5[%c22, %c0_302] : memref<25x128xf32, #tpu.memory_space<vmem>>, vector<1x128xf32>
    %210 = vector.shape_cast %209 : vector<1x128xf32> to vector<128xf32>
    %211 = vector.shape_cast %210 : vector<128xf32> to vector<1x1x1x128xf32>
    %212 = vector.broadcast %211 : vector<1x1x1x128xf32> to vector<1x6x8x128xf32>
    %213 = arith.mulf %207, %212 : vector<1x6x8x128xf32>
    %214 = arith.addf %208, %213 : vector<1x6x8x128xf32>
    %c0_303 = arith.constant 0 : index
    %c0_304 = arith.constant 0 : index
    %c0_305 = arith.constant 0 : index
    %c0_306 = arith.constant 0 : index
    %215 = vector.load %arg11[%c0_303, %c0_304, %c0_305, %c0_306] : memref<1x8x8x128xf32, #tpu.memory_space<vmem>>, vector<1x6x8x128xf32>
    tpu.vector_store %arg11[%c0_303, %c0_304, %c0_305, %c0_306], %214 {strides = array<i32>} : memref<1x8x8x128xf32, #tpu.memory_space<vmem>>, vector<1x6x8x128xf32>,
    %c0_307 = arith.constant 0 : index
    %c2_308 = arith.constant 2 : index
    %c1_309 = arith.constant 1 : index
    %c0_310 = arith.constant 0 : index
    %216 = vector.load %arg10[%c0_307, %c2_308, %c1_309, %c0_310] : memref<1x8x8x128xf32, #tpu.memory_space<vmem>>, vector<1x6x7x128xf32>
    %c0_311 = arith.constant 0 : index
    %c0_312 = arith.constant 0 : index
    %c0_313 = arith.constant 0 : index
    %c0_314 = arith.constant 0 : index
    %217 = vector.load %arg11[%c0_311, %c0_312, %c0_313, %c0_314] : memref<1x8x8x128xf32, #tpu.memory_space<vmem>>, vector<1x6x7x128xf32>
    %c23 = arith.constant 23 : index
    %c0_315 = arith.constant 0 : index
    %218 = vector.load %arg5[%c23, %c0_315] : memref<25x128xf32, #tpu.memory_space<vmem>>, vector<1x128xf32>
    %219 = vector.shape_cast %218 : vector<1x128xf32> to vector<128xf32>
    %220 = vector.shape_cast %219 : vector<128xf32> to vector<1x1x1x128xf32>
    %221 = vector.broadcast %220 : vector<1x1x1x128xf32> to vector<1x6x7x128xf32>
    %222 = arith.mulf %216, %221 : vector<1x6x7x128xf32>
    %223 = arith.addf %217, %222 : vector<1x6x7x128xf32>
    %c0_316 = arith.constant 0 : index
    %c0_317 = arith.constant 0 : index
    %c0_318 = arith.constant 0 : index
    %c0_319 = arith.constant 0 : index
    %224 = vector.load %arg11[%c0_316, %c0_317, %c0_318, %c0_319] : memref<1x8x8x128xf32, #tpu.memory_space<vmem>>, vector<1x6x7x128xf32>
    tpu.vector_store %arg11[%c0_316, %c0_317, %c0_318, %c0_319], %223 {strides = array<i32>} : memref<1x8x8x128xf32, #tpu.memory_space<vmem>>, vector<1x6x7x128xf32>,
    %c0_320 = arith.constant 0 : index
    %c2_321 = arith.constant 2 : index
    %c2_322 = arith.constant 2 : index
    %c0_323 = arith.constant 0 : index
    %225 = vector.load %arg10[%c0_320, %c2_321, %c2_322, %c0_323] : memref<1x8x8x128xf32, #tpu.memory_space<vmem>>, vector<1x6x6x128xf32>
    %c0_324 = arith.constant 0 : index
    %c0_325 = arith.constant 0 : index
    %c0_326 = arith.constant 0 : index
    %c0_327 = arith.constant 0 : index
    %226 = vector.load %arg11[%c0_324, %c0_325, %c0_326, %c0_327] : memref<1x8x8x128xf32, #tpu.memory_space<vmem>>, vector<1x6x6x128xf32>
    %c24 = arith.constant 24 : index
    %c0_328 = arith.constant 0 : index
    %227 = vector.load %arg5[%c24, %c0_328] : memref<25x128xf32, #tpu.memory_space<vmem>>, vector<1x128xf32>
    %228 = vector.shape_cast %227 : vector<1x128xf32> to vector<128xf32>
    %229 = vector.shape_cast %228 : vector<128xf32> to vector<1x1x1x128xf32>
    %230 = vector.broadcast %229 : vector<1x1x1x128xf32> to vector<1x6x6x128xf32>
    %231 = arith.mulf %225, %230 : vector<1x6x6x128xf32>
    %232 = arith.addf %226, %231 : vector<1x6x6x128xf32>
    %c0_329 = arith.constant 0 : index
    %c0_330 = arith.constant 0 : index
    %c0_331 = arith.constant 0 : index
    %c0_332 = arith.constant 0 : index
    %233 = vector.load %arg11[%c0_329, %c0_330, %c0_331, %c0_332] : memref<1x8x8x128xf32, #tpu.memory_space<vmem>>, vector<1x6x6x128xf32>
    tpu.vector_store %arg11[%c0_329, %c0_330, %c0_331, %c0_332], %232 {strides = array<i32>} : memref<1x8x8x128xf32, #tpu.memory_space<vmem>>, vector<1x6x6x128xf32>,
    %c0_333 = arith.constant 0 : index
    %c0_334 = arith.constant 0 : index
    %c0_335 = arith.constant 0 : index
    %c0_336 = arith.constant 0 : index
    %234 = vector.load %arg11[%c0_333, %c0_334, %c0_335, %c0_336] : memref<1x8x8x128xf32, #tpu.memory_space<vmem>>, vector<1x8x8x128xf32>
    %c0_337 = arith.constant 0 : index
    %c0_338 = arith.constant 0 : index
    %235 = vector.load %arg6[%c0_337, %c0_338] : memref<1x128xf32, #tpu.memory_space<vmem>>, vector<1x128xf32>
    %236 = vector.shape_cast %235 : vector<1x128xf32> to vector<1x1x1x128xf32>
    %237 = vector.broadcast %236 : vector<1x1x1x128xf32> to vector<1x8x8x128xf32>
    %238 = arith.addf %234, %237 : vector<1x8x8x128xf32>
    %cst = arith.constant 5.000000e-01 : f32
    %239 = vector.broadcast %cst : f32 to vector<1x8x8x128xf32>
    %240 = arith.mulf %239, %238 : vector<1x8x8x128xf32>
    %cst_339 = arith.constant 0.707106769 : f32
    %241 = vector.broadcast %cst_339 : f32 to vector<1x8x8x128xf32>
    %242 = arith.mulf %238, %241 : vector<1x8x8x128xf32>
    %243 = math.erf %242 : vector<1x8x8x128xf32>
    %cst_340 = arith.constant 1.000000e+00 : f32
    %244 = vector.broadcast %cst_340 : f32 to vector<1x8x8x128xf32>
    %245 = arith.addf %244, %243 : vector<1x8x8x128xf32>
    %246 = arith.mulf %240, %245 : vector<1x8x8x128xf32>
    %247 = arith.truncf %246 : vector<1x8x8x128xf32> to vector<1x8x8x128xbf16>
    %c0_341 = arith.constant 0 : index
    %c0_342 = arith.constant 0 : index
    %c0_343 = arith.constant 0 : index
    %c0_344 = arith.constant 0 : index
    %248 = vector.load %arg7[%c0_341, %c0_342, %c0_343, %c0_344] : memref<1x8x8x128xbf16, #tpu.memory_space<vmem>>, vector<1x8x8x128xbf16>
    tpu.vector_store %arg7[%c0_341, %c0_342, %c0_343, %c0_344], %247 {strides = array<i32>} : memref<1x8x8x128xbf16, #tpu.memory_space<vmem>>, vector<1x8x8x128xbf16>,
    %249 = vector.shape_cast %246 : vector<1x8x8x128xf32> to vector<64x128xf32>
    %cst_345 = arith.constant dense<0.000000e+00> : vector<128xf32>
    %250 = vector.multi_reduction <add>, %249, %cst_345 [0] : vector<64x128xf32> to vector<128xf32>
    %251 = vector.shape_cast %250 : vector<128xf32> to vector<1x128xf32>
    %252 = vector.shape_cast %251 : vector<1x128xf32> to vector<1x1x128xf32>
    %c0_346 = arith.constant 0 : index
    %c0_347 = arith.constant 0 : index
    %c0_348 = arith.constant 0 : index
    %253 = vector.load %arg8[%c0_346, %c0_347, %c0_348] : memref<1x1x128xf32, #tpu.memory_space<vmem>>, vector<1x1x128xf32>
    tpu.vector_store %arg8[%c0_346, %c0_347, %c0_348], %252 {strides = array<i32>} : memref<1x1x128xf32, #tpu.memory_space<vmem>>, vector<1x1x128xf32>,
    %254 = arith.mulf %249, %249 : vector<64x128xf32>
    %cst_349 = arith.constant dense<0.000000e+00> : vector<128xf32>
    %255 = vector.multi_reduction <add>, %254, %cst_349 [0] : vector<64x128xf32> to vector<128xf32>
    %256 = vector.shape_cast %255 : vector<128xf32> to vector<1x128xf32>
    %257 = vector.shape_cast %256 : vector<1x128xf32> to vector<1x1x128xf32>
    %c0_350 = arith.constant 0 : index
    %c0_351 = arith.constant 0 : index
    %c0_352 = arith.constant 0 : index
    %258 = vector.load %arg9[%c0_350, %c0_351, %c0_352] : memref<1x1x128xf32, #tpu.memory_space<vmem>>, vector<1x1x128xf32>
    tpu.vector_store %arg9[%c0_350, %c0_351, %c0_352], %257 {strides = array<i32>} : memref<1x1x128xf32, #tpu.memory_space<vmem>>, vector<1x1x128xf32>,
    return
  }
  func.func @transform_0(%arg0: i32, %arg1: i32) -> (i32, i32, i32, i32) {
    %c0_i32 = arith.constant 0 : i32
    %c0_i32_0 = arith.constant 0 : i32
    %c0_i32_1 = arith.constant 0 : i32
    return %arg0, %c0_i32, %c0_i32_0, %arg1 : i32, i32, i32, i32
  }
  func.func @transform_1(%arg0: i32, %arg1: i32) -> (i32, i32) {
    %c0_i32 = arith.constant 0 : i32
    %c0_i32_0 = arith.constant 0 : i32
    return %c0_i32, %arg1 : i32, i32
  }
  func.func @transform_2(%arg0: i32, %arg1: i32) -> (i32, i32) {
    %c0_i32 = arith.constant 0 : i32
    %c0_i32_0 = arith.constant 0 : i32
    return %c0_i32, %arg1 : i32, i32
  }
  func.func @transform_3(%arg0: i32, %arg1: i32) -> (i32, i32) {
    %c0_i32 = arith.constant 0 : i32
    %c0_i32_0 = arith.constant 0 : i32
    return %c0_i32, %arg1 : i32, i32
  }
  func.func @transform_4(%arg0: i32, %arg1: i32) -> (i32, i32) {
    %c0_i32 = arith.constant 0 : i32
    %c0_i32_0 = arith.constant 0 : i32
    return %c0_i32, %arg1 : i32, i32
  }
  func.func @transform_5(%arg0: i32, %arg1: i32) -> (i32, i32, i32, i32) {
    %c0_i32 = arith.constant 0 : i32
    %c0_i32_0 = arith.constant 0 : i32
    %c0_i32_1 = arith.constant 0 : i32
    return %arg0, %c0_i32, %c0_i32_0, %arg1 : i32, i32, i32, i32
  }
  func.func @transform_6(%arg0: i32, %arg1: i32) -> (i32, i32, i32) {
    %c0_i32 = arith.constant 0 : i32
    %c0_i32_0 = arith.constant 0 : i32
    return %arg0, %c0_i32, %arg1 : i32, i32, i32
  }
  func.func @transform_7(%arg0: i32, %arg1: i32) -> (i32, i32, i32) {
    %c0_i32 = arith.constant 0 : i32
    %c0_i32_0 = arith.constant 0 : i32
    return %arg0, %c0_i32, %arg1 : i32, i32, i32
  }
}

</mosaic_0001>

<bundles_post_ra>
// kernel: conv_mixer_forward.11
= control target key start
LH: loop header
LB: loop body
LE: loop exit
PB: predicated region body
PF: predicated region fallthrough
CT: control target
= control target key end

     0   :  { %8 = vsyncpa [#allocation3], 0  ;;  %s531_s0 = inlined_call_operand.vmem [shape: bf16[2,64,128], index: 0, kind: input, shape index: {}]   ;;  %s532_s1 = inlined_call_operand.vmem [shape: f32[1,1,128], index: 1, kind: input, shape index: {}]   ;;  %s533_s2 = inlined_call_operand.vmem [shape: f32[1,1,128], index: 2, kind: input, shape index: {}]   ;;  %s534_s3 = inlined_call_operand.hbm [shape: f32[2,1,128], index: 3, kind: output, shape index: {}]  }
   0x1   :  { %10 = vsyncpa [#allocation3 + $0x1], 0  ;;  %s425_s12 = smov 0   ;;  %s427_s13 = smov 0  }
   0x2   :  { %s429_s14 = smov 0   ;;  %s431_s15 = smov 0  }
   0x3 LB: > { %s446_s16 = sadd.s32 4294967295, %s402_s15   ;;  %s272_s17 = sadd.s32 4294967294, %s402_s15   ;;  %s402_s15 = sphi %s431_s15, %s540_s15   ;;  %s398_s14 = sphi %s429_s14, %s539_s14   ;;  %s394_s13 = sphi %s427_s13, %s538_s13   ;;  %s390_s12 = sphi %s425_s12, %s537_s12  }
   0x4   : > { %s450_s18 = sadd.s32 1, %s402_s15   ;;  %s91_s19 = sadd.s32 1, %s398_s14 }
   0x5   : > { %s88_s20 = ssub.s32 %s402_s15, %s450_s18  ;;  %p101_p0 = scmp.ne.s32.totalorder %s398_s14, %s394_s13 }
   0x6   : > { %p89_p1 = scmp.eq.s32.totalorder %s88_s20, 0  ;;  %p102_p2 = scmp.eq.s32.totalorder %s446_s16, 1 }
   0x7   : > { %p107_p3 = scmp.ne.s32.totalorder %s394_s13, %s390_s12  ;;  %p108_p4 = scmp.eq.s32.totalorder %s272_s17, 1 }
   0x8   : > { %s461_s21 = scalar_select %p89_p1, %s398_s14, %s91_s19  }
   0x9   : > { %p463_p5 = por %p102_p2, %p101_p0  ;;  %p467_p6 = por %p108_p4, %p107_p3 }
   0xa   : > { %p275_p7 = scmp.ge.s32.totalorder %s402_s15, 1  ;;  %p140_p8 = scmp.lt.s32.totalorder %s402_s15, 3 }
   0xc   : > { %p141_p9 = pnand %p275_p7, %p140_p8 }
   0xd   : > { %p163_p10 = scmp.lt.s32.totalorder (!%p141_p9), %s446_s16, 1  ;;  %s161_s29 = sand.u32 (!%p141_p9), 1, %s394_s13   ;;  %v199_v25 = vld [vmem:[%s532_s1] sm:$0x1] (!%p141_p9) }
   0xe   : > { %144 = sbr.rel (%p141_p9) target bundleno = 74 (0x4a), region = 32  ;;  %v201_v27 = vld [vmem:[%s533_s2] sm:$0x1] (!%p141_p9)  ;;  %s162_s7 = scalar_lea.vmem (!%p141_p9), [#allocation2], %s161_s29 }
   0xf   : > { %s217_s8 = sshll.u32 (!%p141_p9), %s162_s7, 4  ;;  %s278_s9 = sshll.u32 (!%p141_p9), %s446_s16, 4  ;;  %s486_s8 = int_to_ptr.vmem [resolvable:$true] %s217_s8 }
  0x10   : > { %s491_s17 = scalar_lea.hbm (!%p141_p9), %s534_s3, %s278_s9  ;;  %s205_s19 = scalar_lea.sflag (!%p141_p9), [#allocation3], %s161_s29 }
  0x11   : > { %s340_s20 = scalar_lea.vmem (!%p141_p9), %s486_s8, 16 }
  0x12   : > { %p341_p11 = scmp.ne.s32.totalorder (!%p141_p9), %s486_s8, %s340_s20 }
  0x14   : > { %p342_p12 = pnand (!%p141_p9), %p341_p11, %p463_p5 }
  0x15   : > { %s164_s24 = scalar_select %p163_p10, %s446_s16, 1 }
  0x16   : > { %p343_p13 = pneg %p342_p12  ;;  %s404_s16 = smov [#allocation2]  }
  0x17   : > { %s281_s25 = sshll.u32 %s164_s24, 5  ;;  %s344_s24 = sshll.u32 %s404_s16, 4  ;;  %s345_s24 = int_to_ptr.vmem [resolvable:$false] %s344_s24 }
  0x18   : > { %s167_s28 = scalar_lea.vmem %s531_s0, %s281_s25  ;;  %s346_s25 = scalar_lea.vmem %s345_s24, 32 }
  0x19   : > { %v283_v0 = vld [vmem:[%s167_s28] sm:$0xff]   ;;  %v298_v1 = vld [vmem:[%s167_s28 + $0x8] sm:$0xff]   ;;  %v299_v5 = vld [vmem:[%s167_s28 + $0x10] sm:$0xff]   ;;  %p347_p0 = scmp.lt.s32.totalorder %s486_s8, %s345_s24  ;;  %p348_p1 = scmp.lt.s32.totalorder %s346_s25, %s340_s20 }
  0x1a   : > { %v284_v2 = vunpack.c.l.bf16 %v283_v0  ;;  %v285_v3 = vunpack.c.h.bf16 %v283_v0  ;;  %v288_v4 = vunpack.c.l.bf16 %v298_v1  ;;  %v289_v6 = vunpack.c.h.bf16 %v298_v1  ;;  %v300_v10 = vld [vmem:[%s167_s28 + $0x18] sm:$0xff]  }
  0x1b   : > { %v292_v8 = vunpack.c.l.bf16 %v299_v5  ;;  %v293_v11 = vunpack.c.h.bf16 %v299_v5  ;;  %v296_v13 = vunpack.c.l.bf16 %v300_v10  ;;  %v297_v15 = vunpack.c.h.bf16 %v300_v10  ;;  %p349_p2 = por %p348_p1, %p347_p0 }
  0x1c   : > { %v184_v7 = vadd.f32 %v285_v3, %v284_v2 }
  0x1d   : > { %p350_p3 = pnand %p349_p2, %p343_p13 }
  0x1e   : > { %v185_v9 = vadd.f32 %v288_v4, %v184_v7 }
  0x20   : > { %v186_v12 = vadd.f32 %v289_v6, %v185_v9 }
  0x22   : > { %v187_v14 = vadd.f32 %v292_v8, %v186_v12 }
  0x24   : > { %v188_v16 = vadd.f32 %v293_v11, %v187_v14 }
  0x26   : > { %v189_v17 = vadd.f32 %v296_v13, %v188_v16 }
  0x28   : > { %v190_v18 = vadd.f32 %v297_v15, %v189_v17 }
  0x2a   : > { %v191_v19 = vrot.slane %v190_v18, 4 }
  0x2c   : > { %v192_v20 = vadd.f32 %v191_v19, %v190_v18 }
  0x2e   : > { %v193_v21 = vrot.slane %v192_v20, 2 }
  0x30   : > { %v194_v22 = vadd.f32 %v193_v21, %v192_v20 }
  0x32   : > { %v195_v23 = vrot.slane %v194_v22, 1 }
  0x34   : > { %v196_v24 = vadd.f32 %v195_v23, %v194_v22 }
  0x36   : > { %v198_v26 = vmul.f32 0.015625, %v196_v24 }
  0x38   : > { %v200_v28 = vmul.f32 %v199_v25, %v198_v26 }
  0x3a   : > { %v202_v29 = vadd.f32 %v201_v27, %v200_v28 }
  0x3c   : > { %203 = vst [vmem:[%s162_s7] sm:$0x1] %v202_v29 }
  0x3d   : > { %353 = shalt.err (!%p350_p3)
}
  0x3e   : > { %s354_s26 = scalar_lea.hbm %s491_s17, 16  ;;  %s358_s29 = scalar_lea.hbm %s534_s3, 32 }
  0x3f   : > { %p355_p4 = scmp.ne.s32.totalorder %s491_s17, %s354_s26  ;;  %p359_p9 = scmp.lt.u32.totalorder %s491_s17, %s534_s3 }
  0x40   : > { %p360_p10 = scmp.lt.u32.totalorder %s358_s29, %s354_s26  ;;  %p362_p12 = scmp.lt.u32.totalorder %s354_s26, %s491_s17 }
  0x41   : > { %p356_p7 = pnand %p355_p4, %p463_p5 }
  0x42   : > { %p361_p11 = por %p360_p10, %p359_p9 }
  0x43   : > { %p357_p8 = pneg %p356_p7 }
  0x44   : > { %p363_p13 = por %p362_p12, %p361_p11 }
  0x46   : > { %p364_p0 = pnand %p363_p13, %p357_p8 }
  0x48   : > { %367 = shalt.err (!%p364_p0)
}
  0x49   : > { %301 = dma.vmem_to_hbm [thread:$0]  (%p463_p5), %s486_s8, 16, %s491_s17, %s205_s19  }
  0x4a PF: > { %p307_p1 = scmp.ge.s32.totalorder %s402_s15, 2  ;;  %s229_s5 = sand.u32 1, %s390_s12  }
  0x4b   : > { %s230_s6 = scalar_lea.sflag [#allocation3], %s229_s5 }
  0x4c   : > { %p304_p2 = pnand %p307_p1, %p467_p6 }
  0x4e   : > { %385 = dma.done.wait (!%p304_p2), %s230_s6, 16  }
  0x4f   : > { %387 = vsyncadd (!%p304_p2), %s230_s6, 4294967280  ;;  %p13_p3 = scmp.ge.s32.totalorder %s450_s18, 4   ;;  %s537_s12 = smov %s394_s13 }
  0x50   : > { %s538_s13 = smov %s398_s14  ;;  %s539_s14 = smov %s461_s21 }
  0x51   : > { %s540_s15 = smov %s450_s18  ;;  %15 = sbr.rel (!%p13_p3) target bundleno = 3 (0x3), region = 67 }
  0x58   :  { %234 = vsyncpa [#allocation3], 1 }
  0x59   :  { %236 = vsyncpa [#allocation3 + $0x1], 1 }

// kernel: conv_mixer_forward.6
= control target key start
LH: loop header
LB: loop body
LE: loop exit
PB: predicated region body
PF: predicated region fallthrough
CT: control target
= control target key end

     0   :  { %s733_s18 = smov 0   ;;  %s774_s0 = inlined_call_operand.vmem [shape: bf16[128,16], index: 0, kind: input, shape index: {}]   ;;  %s775_s1 = inlined_call_operand.vmem [shape: bf16[16,128], index: 1, kind: input, shape index: {}]   ;;  %s776_s2 = inlined_call_operand.vmem [shape: f32[1,128], index: 2, kind: input, shape index: {}]   ;;  %s777_s3 = inlined_call_operand.vmem [shape: bf16[128,128], index: 3, kind: output, shape index: {0}]   ;;  %s778_s4 = inlined_call_operand.vmem [shape: f32[2,1,128], index: 4, kind: output, shape index: {1}]   ;;  %s779_s5 = inlined_call_operand.vmem [shape: f32[2,1,128], index: 5, kind: output, shape index: {2}]  }
   0x1 LB: > { %s739_s19 = sadd.s32 4294967295, %s701_s18   ;;  %p593_p0 = scmp.ge.s32.totalorder %s701_s18, 1  ;;  %s701_s18 = sphi %s733_s18, %s16_s18  }
   0x2   : > { %p193_p1 = scmp.lt.s32.totalorder %s701_s18, 3 }
   0x4   : > { %p194_p2 = pnand %p593_p0, %p193_p1 }
   0x5   : > { %v674_v0 = vld [vmem:[%s775_s1] sm:$0xff] (!%p194_p2)   ;;  %s594_s22 = sshll.u32 (!%p194_p2), %s739_s19, 3  ;;  %vm289_vm0 = vcmask (!%p194_p2), 130048   ;;  %p239_p4 = scmp.lt.s32.totalorder (!%p194_p2), %s739_s19, 1 }
   0x6   : > { %197 = sbr.rel (%p194_p2) target bundleno = 284 (0x11c), region = 32  ;;  %p228_p3 = scmp.lt.s32.totalorder (!%p194_p2), %s594_s22, 15  ;;  %654 = vmatprep.subr.bf16.mxu0 (!%p194_p2), %v674_v0  ;;  %664 = vmatprep.subr.bf16.mxu1 (!%p194_p2), %v674_v0  ;;  %v598_v5 = vld [vmem:[%s776_s2] ss:$0 sm:$0xff] (!%p194_p2) }
   0x7   : > { %655 = vmatpush3.bf16.msra.mxu0 (!%p194_p2), %v674_v0  ;;  %665 = vmatpush3.bf16.msra.mxu1 (!%p194_p2), %v674_v0 }
   0xd   : > { %s781_s22 = smov (!%p228_p3, %s594_s22), 15  ;;  %s783_s19 = smov (!%p239_p4, %s739_s19), 1 }
   0xe   : > { %s595_s23 = sshll.u32 %s781_s22, 2  ;;  %s241_s9 = scalar_lea.vmem %s778_s4, %s783_s19 }
   0xf   : > { %s231_s26 = scalar_lea.vmem %s774_s0, %s595_s23  ;;  %s237_s6 = scalar_lea.vmem %s777_s3, %s595_s23 }
  0x10   : > { %v675_v1 = vld [vmem:[%s231_s26] sm:$0xff]   ;;  %v676_v2 = vld [vmem:[%s231_s26 + $0x10] sm:$0xff]   ;;  %v677_v3 = vld [vmem:[%s231_s26 + $0x8] sm:$0xff]   ;;  %s244_s12 = scalar_lea.vmem %s779_s5, %s783_s19 }
  0x11   : > { %656 = vmatprep.mubr.msk.bf16.mxu0 %vm289_vm0, %v675_v1  ;;  %660 = vmatprep.mubr.msk.bf16.mxu1 %vm289_vm0, %v676_v2  ;;  %v678_v4 = vld [vmem:[%s231_s26 + $0x18] sm:$0xff]  }
  0x12   : > { %657 = vmatmul.mubr.msk.bf16.vlgmr.msra.gmra.mrb[0].mxu0 %vm289_vm0, %v677_v3  ;;  %661 = vmatmul.mubr.msk.bf16.vlgmr.msra.gmra.mrb[0].mxu1 %vm289_vm0, %v678_v4 }
  0xe5   : > { %v658_v6 = vpop.f32.mrb[0].mxu0  ;;  %v662_v8 = vpop.f32.mrb[0].mxu1 }
  0xe6   : > { %v345_v7 = vadd.f32 %v658_v6, %v598_v5  ;;  %v336_v9 = vpop.f32.mrb[1].mxu0  ;;  %v361_v10 = vadd.f32 %v662_v8, %v598_v5  ;;  %v352_v12 = vpop.f32.mrb[1].mxu1 }
  0xe7   : > { %v337_v11 = vadd.f32 %v598_v5, %v336_v9  ;;  %v659_v13 = vpop.f32.mrb[2].mxu0  ;;  %v353_v15 = vadd.f32 %v598_v5, %v352_v12  ;;  %v663_v17 = vpop.f32.mrb[2].mxu1 }
  0xe8   : > { %v377_v14 = vmul.f32 0.70710677, %v345_v7  ;;  %v348_v16 = vadd.f32 %v659_v13, %v598_v5  ;;  %v339_v18 = vpop.f32.mrb[3].mxu0  ;;  %v381_v19 = vmul.f32 0.70710677, %v361_v10  ;;  %v355_v22 = vpop.f32.mrb[3].mxu1  ;;  %v364_v24 = vadd.f32 %v663_v17, %v598_v5 }
  0xe9   : > { %v375_v20 = vmul.f32 0.70710677, %v337_v11  ;;  %v379_v21 = vmul.f32 0.70710677, %v353_v15  ;;  %v340_v25 = vadd.f32 %v598_v5, %v339_v18  ;;  %v356_v26 = vadd.f32 %v598_v5, %v355_v22 }
  0xea   : > { %679 = verf.f32 %v377_v14  ;;  %v378_v23 = vmul.f32 0.70710677, %v348_v16  ;;  %v382_v27 = vmul.f32 0.70710677, %v364_v24  ;;  %v369_v37 = vmul.f32 0.5, %v345_v7 }
  0xeb   : > { %681 = verf.f32 %v381_v19  ;;  %v376_v28 = vmul.f32 0.70710677, %v340_v25  ;;  %v380_v29 = vmul.f32 0.70710677, %v356_v26  ;;  %v373_v38 = vmul.f32 0.5, %v361_v10 }
  0xec   : > { %683 = verf.f32 %v375_v20  ;;  %v367_v41 = vmul.f32 0.5, %v337_v11  ;;  %v371_v42 = vmul.f32 0.5, %v353_v15  ;;  %v370_v43 = vmul.f32 0.5, %v348_v16 }
  0xed   : > { %685 = verf.f32 %v379_v21  ;;  %v374_v47 = vmul.f32 0.5, %v364_v24  ;;  %v368_v49 = vmul.f32 0.5, %v340_v25  ;;  %v372_v57 = vmul.f32 0.5, %v356_v26 }
  0xee   : > { %687 = verf.f32 %v378_v23 }
  0xef   : > { %689 = verf.f32 %v382_v27 }
  0xf0   : > { %691 = verf.f32 %v376_v28 }
  0xf1   : > { %693 = verf.f32 %v380_v29 }
  0xf4   : > { %v680_v30 = vpop.eup %679 }
  0xf5   : > { %v682_v31 = vpop.eup %681  ;;  %v393_v34 = vadd.f32 1.0, %v680_v30 }
  0xf6   : > { %v684_v32 = vpop.eup %683  ;;  %v397_v39 = vadd.f32 1.0, %v682_v31 }
  0xf7   : > { %v686_v33 = vpop.eup %685  ;;  %v391_v35 = vadd.f32 1.0, %v684_v32  ;;  %v401_v51 = vmul.f32 %v393_v34, %v369_v37 }
  0xf8   : > { %v688_v36 = vpop.eup %687  ;;  %v395_v46 = vadd.f32 1.0, %v686_v33  ;;  %v405_v55 = vmul.f32 %v397_v39, %v373_v38 }
  0xf9   : > { %v690_v40 = vpop.eup %689  ;;  %v394_v44 = vadd.f32 1.0, %v688_v36  ;;  %v399_v52 = vmul.f32 %v391_v35, %v367_v41  ;;  %v463_v5 = vmul.f32 %v401_v51, %v401_v51 }
  0xfa   : > { %v692_v45 = vpop.eup %691  ;;  %v398_v48 = vadd.f32 1.0, %v690_v40  ;;  %v403_v61 = vmul.f32 %v395_v46, %v371_v42  ;;  %v467_v17 = vmul.f32 %v405_v55, %v405_v55 }
  0xfb   : > { %v694_v50 = vpop.eup %693  ;;  %v402_v53 = vmul.f32 %v394_v44, %v370_v43  ;;  %v392_v54 = vadd.f32 1.0, %v692_v45  ;;  %v461_v0 = vmul.f32 %v399_v52, %v399_v52 }
  0xfc   : > { %v406_v56 = vmul.f32 %v398_v48, %v374_v47  ;;  %v396_v58 = vadd.f32 1.0, %v694_v50  ;;  %v465_v11 = vmul.f32 %v403_v61, %v403_v61 }
  0xfd   : > { %v634_v59 = vpack.c.bf16 %v402_v53, %v401_v51  ;;  %v400_v60 = vmul.f32 %v392_v54, %v368_v49  ;;  %v464_v8 = vmul.f32 %v402_v53, %v402_v53 }
  0xfe   : > { %v644_v62 = vpack.c.bf16 %v406_v56, %v405_v55  ;;  %v404_v63 = vmul.f32 %v396_v58, %v372_v57  ;;  %v468_v20 = vmul.f32 %v406_v56, %v406_v56 }
  0xff   : > { %646 = vst [vmem:[%s237_s6 + $0x8] sm:$0xff] %v634_v59   ;;  %v629_v1 = vpack.c.bf16 %v400_v60, %v399_v52  ;;  %v447_v2 = vadd.f32 %v400_v60, %v399_v52  ;;  %v462_v3 = vmul.f32 %v400_v60, %v400_v60 }
 0x100   : > { %648 = vst [vmem:[%s237_s6 + $0x18] sm:$0xff] %v644_v62   ;;  %v639_v4 = vpack.c.bf16 %v404_v63, %v403_v61  ;;  %v466_v15 = vmul.f32 %v404_v63, %v404_v63 }
 0x101   : > { %630 = vst [vmem:[%s237_s6] sm:$0xff] %v629_v1   ;;  %v448_v6 = vadd.f32 %v447_v2, %v401_v51  ;;  %v469_v7 = vadd.f32 %v462_v3, %v461_v0 }
 0x102   : > { %647 = vst [vmem:[%s237_s6 + $0x10] sm:$0xff] %v639_v4  }
 0x103   : > { %v470_v9 = vadd.f32 %v469_v7, %v463_v5  ;;  %v449_v10 = vadd.f32 %v448_v6, %v402_v53 }
 0x105   : > { %v450_v12 = vadd.f32 %v449_v10, %v403_v61  ;;  %v471_v13 = vadd.f32 %v470_v9, %v464_v8 }
 0x107   : > { %v451_v14 = vadd.f32 %v450_v12, %v404_v63  ;;  %v472_v16 = vadd.f32 %v471_v13, %v465_v11 }
 0x109   : > { %v452_v18 = vadd.f32 %v451_v14, %v405_v55  ;;  %v473_v19 = vadd.f32 %v472_v16, %v466_v15 }
 0x10b   : > { %v453_v21 = vadd.f32 %v452_v18, %v406_v56  ;;  %v474_v22 = vadd.f32 %v473_v19, %v467_v17 }
 0x10d   : > { %v454_v23 = vrot.slane %v453_v21, 4  ;;  %v475_v24 = vadd.f32 %v474_v22, %v468_v20 }
 0x10f   : > { %v455_v25 = vadd.f32 %v454_v23, %v453_v21  ;;  %v476_v26 = vrot.slane %v475_v24, 4 }
 0x111   : > { %v456_v27 = vrot.slane %v455_v25, 2  ;;  %v477_v28 = vadd.f32 %v476_v26, %v475_v24 }
 0x113   : > { %v457_v29 = vadd.f32 %v456_v27, %v455_v25  ;;  %v478_v30 = vrot.slane %v477_v28, 2 }
 0x115   : > { %v458_v31 = vrot.slane %v457_v29, 1  ;;  %v479_v32 = vadd.f32 %v478_v30, %v477_v28 }
 0x117   : > { %v459_v33 = vadd.f32 %v458_v31, %v457_v29  ;;  %v480_v34 = vrot.slane %v479_v32, 1 }
 0x119   : > { %460 = vst [vmem:[%s241_s9] sm:$0x1] %v459_v33  ;;  %v481_v35 = vadd.f32 %v480_v34, %v479_v32 }
 0x11b   : > { %482 = vst [vmem:[%s244_s12] sm:$0x1] %v481_v35 }
 0x11c PF: > { %s16_s18 = sadd.s32 1, %s701_s18  }
 0x11d   : > { %p13_p5 = scmp.ge.s32.totalorder %s16_s18, 4  }
 0x11f   :  { %15 = sbr.rel (!%p13_p5) target bundleno = 1 (0x1), region = 86 }

// kernel: conv_mixer_forward.8
= control target key start
LH: loop header
LB: loop body
LE: loop exit
PB: predicated region body
PF: predicated region fallthrough
CT: control target
= control target key end

     0   :  { %s1127_s13 = smov 0   ;;  %s1254_s0 = inlined_call_operand.vmem [shape: bf16[128,128], index: 0, kind: input, shape index: {}]   ;;  %s1255_s1 = inlined_call_operand.vmem [shape: bf16[128,128], index: 1, kind: input, shape index: {}]   ;;  %s1256_s2 = inlined_call_operand.vmem [shape: f32[1,128], index: 2, kind: input, shape index: {}]   ;;  %s1257_s3 = inlined_call_operand.vmem [shape: f32[1,128], index: 3, kind: input, shape index: {}]   ;;  %s1258_s4 = inlined_call_operand.vmem [shape: f32[1,128], index: 4, kind: input, shape index: {}]   ;;  %s1259_s5 = inlined_call_operand.vmem [shape: f32[1,128], index: 5, kind: input, shape index: {}]   ;;  %s1260_s6 = inlined_call_operand.vmem [shape: bf16[128,128], index: 6, kind: input, shape index: {}]   ;;  %s1261_s7 = inlined_call_operand.vmem [shape: f32[1,128], index: 7, kind: input, shape index: {}]   ;;  %s1262_s8 = inlined_call_operand.vmem [shape: bf16[128,128], index: 8, kind: output, shape index: {0}]   ;;  %s1263_s9 = inlined_call_operand.vmem [shape: f32[2,1,128], index: 9, kind: output, shape index: {1}]   ;;  %s1264_s10 = inlined_call_operand.vmem [shape: f32[2,1,128], index: 10, kind: output, shape index: {2}]  }
   0x1 LB: > { %s1133_s14 = sadd.s32 4294967295, %s1070_s13   ;;  %p881_p0 = scmp.ge.s32.totalorder %s1070_s13, 1  ;;  %s1070_s13 = sphi %s1127_s13, %s21_s13  }
   0x2   : > { %p329_p1 = scmp.lt.s32.totalorder %s1070_s13, 3 }
   0x4   : > { %p330_p2 = pnand %p881_p0, %p329_p1 }
   0x5   : > { %v1040_v0 = vld [vmem:[%s1260_s6] sm:$0xff] (!%p330_p2)   ;;  %s882_s17 = sshll.u32 (!%p330_p2), %s1133_s14, 3  ;;  %v1041_v1 = vld [vmem:[%s1260_s6 + $0x8] sm:$0xff] (!%p330_p2)   ;;  %v1042_v2 = vld [vmem:[%s1260_s6 + $0x10] sm:$0xff] (!%p330_p2)   ;;  %p396_p4 = scmp.lt.s32.totalorder (!%p330_p2), %s1133_s14, 1 }
   0x6   : > { %333 = sbr.rel (%p330_p2) target bundleno = 304 (0x130), region = 52  ;;  %p379_p3 = scmp.lt.s32.totalorder (!%p330_p2), %s882_s17, 15  ;;  %992 = vmatprep.subr.bf16.mxu0 (!%p330_p2), %v1040_v0  ;;  %1016 = vmatprep.subr.bf16.mxu1 (!%p330_p2), %v1040_v0  ;;  %v1043_v3 = vld [vmem:[%s1260_s6 + $0x18] sm:$0xff] (!%p330_p2)   ;;  %v1168_v5 = vld [vmem:[%s1256_s2] ss:$0 sm:$0xff] (!%p330_p2)  ;;  %v1045_v39 = vld [vmem:[%s1260_s6 + $0x28] sm:$0xff] (!%p330_p2)  }
   0x7   : > { %993 = vmatpush3.bf16.msra.mxu0 (!%p330_p2), %v1040_v0  ;;  %1024 = vmatpush3.bf16.msra.mxu1 (!%p330_p2), %v1040_v0  ;;  %v1174_v9 = vld [vmem:[%s1258_s4] ss:$0 sm:$0xff] (!%p330_p2)  ;;  %v1046_v58 = vld [vmem:[%s1260_s6 + $0x30] sm:$0xff] (!%p330_p2)  }
   0x8   : > { %994 = vmatprep.subr.bf16.mxu0 (!%p330_p2), %v1041_v1  ;;  %1017 = vmatprep.subr.bf16.mxu1 (!%p330_p2), %v1041_v1  ;;  %v1179_v10 = vld [vmem:[%s1257_s3] ss:$0 sm:$0xff] (!%p330_p2) }
   0x9   : > { %v1044_v20 = vld [vmem:[%s1260_s6 + $0x20] sm:$0xff] (!%p330_p2)  }
   0xa   : > { %v1199_v30 = vld [vmem:[%s1259_s5] ss:$0 sm:$0xff] (!%p330_p2) }
   0xb   : > { %995 = vmatpush3.bf16.msra.mxu0 (!%p330_p2), %v1041_v1  ;;  %1025 = vmatpush3.bf16.msra.mxu1 (!%p330_p2), %v1041_v1 }
   0xc   : > { %996 = vmatprep.subr.bf16.mxu0 (!%p330_p2), %v1042_v2  ;;  %1018 = vmatprep.subr.bf16.mxu1 (!%p330_p2), %v1042_v2 }
   0xd   : > { %s1266_s17 = smov (!%p379_p3, %s882_s17), 15  ;;  %s1268_s14 = smov (!%p396_p4, %s1133_s14), 1 }
   0xe   : > { %s1147_s22 = sshll.u32 %s1266_s17, 2  ;;  %s398_s18 = scalar_lea.vmem %s1263_s9, %s1268_s14 }
   0xf   : > { %s1153_s25 = scalar_lea.vmem %s1254_s0, %s1147_s22  ;;  %s1159_s28 = scalar_lea.vmem %s1255_s1, %s1147_s22  ;;  %997 = vmatpush3.bf16.msra.mxu0 %v1042_v2  ;;  %1026 = vmatpush3.bf16.msra.mxu1 %v1042_v2 }
  0x10   : > { %v920_v4 = vld [vmem:[%s1153_s25] sm:$0xff]   ;;  %v972_v13 = vld [vmem:[%s1153_s25 + $0x10] sm:$0xff]   ;;  %v971_v19 = vld [vmem:[%s1153_s25 + $0x8] sm:$0xff]   ;;  %998 = vmatprep.subr.bf16.mxu0 %v1043_v3  ;;  %1019 = vmatprep.subr.bf16.mxu1 %v1043_v3  ;;  %s394_s16 = scalar_lea.vmem %s1262_s8, %s1147_s22  ;;  %s401_s21 = scalar_lea.vmem %s1264_s10, %s1268_s14 }
  0x11   : > { %v921_v6 = vunpack.c.l.bf16 %v920_v4  ;;  %v922_v7 = vunpack.c.h.bf16 %v920_v4  ;;  %v936_v8 = vld [vmem:[%s1159_s28] sm:$0xff]   ;;  %v975_v14 = vld [vmem:[%s1159_s28 + $0x10] sm:$0xff]   ;;  %v929_v17 = vunpack.c.l.bf16 %v972_v13  ;;  %v930_v18 = vunpack.c.h.bf16 %v972_v13  ;;  %v974_v25 = vld [vmem:[%s1159_s28 + $0x8] sm:$0xff]  }
  0x12   : > { %v937_v11 = vunpack.c.l.bf16 %v936_v8  ;;  %v938_v12 = vunpack.c.h.bf16 %v936_v8  ;;  %v945_v23 = vunpack.c.l.bf16 %v975_v14  ;;  %v946_v24 = vunpack.c.h.bf16 %v975_v14  ;;  %v973_v44 = vld [vmem:[%s1153_s25 + $0x18] sm:$0xff]  }
  0x13   : > { %v426_v15 = vmul.f32 %v921_v6, %v1168_v5  ;;  %v427_v16 = vmul.f32 %v922_v7, %v1168_v5  ;;  %v430_v28 = vmul.f32 %v929_v17, %v1168_v5  ;;  %v431_v29 = vmul.f32 %v930_v18, %v1168_v5  ;;  %999 = vmatpush3.bf16.msra.mxu0 %v1043_v3  ;;  %v976_v49 = vld [vmem:[%s1159_s28 + $0x18] sm:$0xff]  }
  0x14   : > { %v472_v21 = vmul.f32 %v937_v11, %v1174_v9  ;;  %v473_v22 = vmul.f32 %v938_v12, %v1174_v9  ;;  %v476_v31 = vmul.f32 %v945_v23, %v1174_v9  ;;  %v477_v32 = vmul.f32 %v946_v24, %v1174_v9  ;;  %1027 = vmatpush3.bf16.msra.mxu1 %v1043_v3 }
  0x15   : > { %v441_v26 = vadd.f32 %v1179_v10, %v426_v15  ;;  %v442_v27 = vadd.f32 %v1179_v10, %v427_v16  ;;  %v925_v33 = vunpack.c.l.bf16 %v971_v19  ;;  %v926_v34 = vunpack.c.h.bf16 %v971_v19  ;;  %1000 = vmatprep.subr.bf16.mxu0 %v1044_v20  ;;  %1020 = vmatprep.subr.bf16.mxu1 %v1044_v20  ;;  %v892_v16 = vld [vmem:[%s1261_s7] ss:$0 sm:$0xff] }
  0x16   : > { %v445_v37 = vadd.f32 %v1179_v10, %v430_v28  ;;  %v941_v38 = vunpack.c.l.bf16 %v974_v25  ;;  %v446_v40 = vadd.f32 %v1179_v10, %v431_v29  ;;  %v942_v43 = vunpack.c.h.bf16 %v974_v25 }
  0x17   : > { %v480_v35 = vadd.f32 %v472_v21, %v441_v26  ;;  %v481_v36 = vadd.f32 %v473_v22, %v442_v27  ;;  %v428_v41 = vmul.f32 %v925_v33, %v1168_v5  ;;  %v429_v42 = vmul.f32 %v926_v34, %v1168_v5  ;;  %1001 = vmatpush3.bf16.msra.mxu0 %v1044_v20 }
  0x18   : > { %v484_v47 = vadd.f32 %v476_v31, %v445_v37  ;;  %v474_v48 = vmul.f32 %v941_v38, %v1174_v9  ;;  %v485_v50 = vadd.f32 %v477_v32, %v446_v40  ;;  %v475_v53 = vmul.f32 %v942_v43, %v1174_v9  ;;  %1028 = vmatpush3.bf16.msra.mxu1 %v1044_v20 }
  0x19   : > { %v495_v45 = vadd.f32 %v1199_v30, %v480_v35  ;;  %v496_v46 = vadd.f32 %v1199_v30, %v481_v36  ;;  %v443_v51 = vadd.f32 %v1179_v10, %v428_v41  ;;  %v444_v52 = vadd.f32 %v1179_v10, %v429_v42  ;;  %1002 = vmatprep.subr.bf16.mxu0 %v1045_v39 }
  0x1a   : > { %v499_v55 = vadd.f32 %v1199_v30, %v484_v47  ;;  %v933_v56 = vunpack.c.l.bf16 %v973_v44  ;;  %v934_v57 = vunpack.c.h.bf16 %v973_v44  ;;  %1021 = vmatprep.subr.bf16.mxu1 %v1045_v39  ;;  %v500_v59 = vadd.f32 %v1199_v30, %v485_v50 }
  0x1b   : > { %v503_v54 = vpack.c.bf16 %v496_v46, %v495_v45  ;;  %v949_v60 = vunpack.c.l.bf16 %v976_v49  ;;  %v950_v63 = vunpack.c.h.bf16 %v976_v49  ;;  %v482_v1 = vadd.f32 %v474_v48, %v443_v51  ;;  %1003 = vmatpush3.bf16.msra.mxu0 %v1045_v39 }
  0x1c   : > { %v432_v61 = vmul.f32 %v933_v56, %v1168_v5  ;;  %v433_v62 = vmul.f32 %v934_v57, %v1168_v5  ;;  %v505_v0 = vpack.c.bf16 %v500_v59, %v499_v55  ;;  %v483_v2 = vadd.f32 %v475_v53, %v444_v52  ;;  %1029 = vmatpush3.bf16.msra.mxu1 %v1045_v39  ;;  %v1047_v5 = vld [vmem:[%s1260_s6 + $0x38] sm:$0xff]  }
  0x1d   : > { %1008 = vmatprep.mubr.bf16.mxu0 %v503_v54  ;;  %v478_v3 = vmul.f32 %v949_v60, %v1174_v9  ;;  %v479_v7 = vmul.f32 %v950_v63, %v1174_v9  ;;  %1004 = vmatprep.subr.bf16.mxu0 %v1046_v58  ;;  %v497_v12 = vadd.f32 %v1199_v30, %v482_v1 }
  0x1e   : > { %v447_v4 = vadd.f32 %v1179_v10, %v432_v61  ;;  %v448_v6 = vadd.f32 %v1179_v10, %v433_v62  ;;  %1022 = vmatprep.subr.bf16.mxu1 %v1046_v58  ;;  %1012 = vmatprep.mubr.bf16.mxu1 %v505_v0  ;;  %v498_v13 = vadd.f32 %v1199_v30, %v483_v2 }
  0x1f   : > { %1005 = vmatpush3.bf16.msra.mxu0 %v1046_v58 }
  0x20   : > { %v486_v8 = vadd.f32 %v478_v3, %v447_v4  ;;  %v487_v11 = vadd.f32 %v479_v7, %v448_v6  ;;  %1030 = vmatpush3.bf16.msra.mxu1 %v1046_v58  ;;  %1006 = vmatprep.subr.bf16.mxu0 %v1047_v5  ;;  %v504_v9 = vpack.c.bf16 %v498_v13, %v497_v12 }
  0x21   : > { %1023 = vmatprep.subr.bf16.mxu1 %v1047_v5 }
  0x22   : > { %v501_v14 = vadd.f32 %v1199_v30, %v486_v8  ;;  %v502_v10 = vadd.f32 %v1199_v30, %v487_v11 }
  0x23   : > { %1007 = vmatpush3.bf16.msra.mxu0 %v1047_v5 }
  0x24   : > { %v506_v15 = vpack.c.bf16 %v502_v10, %v501_v14  ;;  %1031 = vmatpush3.bf16.msra.mxu1 %v1047_v5 }
  0x26   : > { %1009 = vmatmul.mubr.bf16.vlgmr.msra.gmra.mrb[0].mxu0 %v504_v9 }
  0x27   : > { %1013 = vmatmul.mubr.bf16.vlgmr.msra.gmra.mrb[0].mxu1 %v506_v15 }
  0xf9   : > { %v1010_v17 = vpop.f32.mrb[0].mxu0 }
  0xfa   : > { %v1014_v18 = vpop.f32.mrb[0].mxu1  ;;  %v621_v19 = vadd.f32 %v1010_v17, %v892_v16  ;;  %v612_v21 = vpop.f32.mrb[1].mxu0 }
  0xfb   : > { %v637_v20 = vadd.f32 %v1014_v18, %v892_v16  ;;  %v628_v22 = vpop.f32.mrb[1].mxu1  ;;  %v613_v23 = vadd.f32 %v892_v16, %v612_v21  ;;  %v1011_v25 = vpop.f32.mrb[2].mxu0 }
  0xfc   : > { %v629_v24 = vadd.f32 %v892_v16, %v628_v22  ;;  %v1015_v26 = vpop.f32.mrb[2].mxu1  ;;  %v653_v27 = vmul.f32 0.70710677, %v621_v19  ;;  %v624_v31 = vadd.f32 %v1011_v25, %v892_v16  ;;  %v615_v33 = vpop.f32.mrb[3].mxu0  ;;  %v645_v48 = vmul.f32 0.5, %v621_v19 }
  0xfd   : > { %v657_v28 = vmul.f32 0.70710677, %v637_v20  ;;  %v651_v29 = vmul.f32 0.70710677, %v613_v23  ;;  %v640_v32 = vadd.f32 %v1015_v26, %v892_v16  ;;  %v631_v34 = vpop.f32.mrb[3].mxu1  ;;  %v616_v35 = vadd.f32 %v892_v16, %v615_v33 }
  0xfe   : > { %v655_v30 = vmul.f32 0.70710677, %v629_v24  ;;  %1048 = verf.f32 %v653_v27  ;;  %v632_v36 = vadd.f32 %v892_v16, %v631_v34  ;;  %v654_v37 = vmul.f32 0.70710677, %v624_v31 }
  0xff   : > { %1050 = verf.f32 %v657_v28  ;;  %v658_v38 = vmul.f32 0.70710677, %v640_v32  ;;  %v652_v39 = vmul.f32 0.70710677, %v616_v35  ;;  %v649_v49 = vmul.f32 0.5, %v637_v20 }
 0x100   : > { %1052 = verf.f32 %v651_v29  ;;  %v656_v40 = vmul.f32 0.70710677, %v632_v36  ;;  %v643_v52 = vmul.f32 0.5, %v613_v23  ;;  %v647_v53 = vmul.f32 0.5, %v629_v24 }
 0x101   : > { %1054 = verf.f32 %v655_v30  ;;  %v646_v54 = vmul.f32 0.5, %v624_v31  ;;  %v650_v58 = vmul.f32 0.5, %v640_v32  ;;  %v644_v60 = vmul.f32 0.5, %v616_v35 }
 0x102   : > { %1056 = verf.f32 %v654_v37  ;;  %v648_v4 = vmul.f32 0.5, %v632_v36 }
 0x103   : > { %1058 = verf.f32 %v658_v38 }
 0x104   : > { %1060 = verf.f32 %v652_v39 }
 0x105   : > { %1062 = verf.f32 %v656_v40 }
 0x108   : > { %v1049_v41 = vpop.eup %1048 }
 0x109   : > { %v1051_v42 = vpop.eup %1050  ;;  %v669_v45 = vadd.f32 1.0, %v1049_v41 }
 0x10a   : > { %v1053_v43 = vpop.eup %1052  ;;  %v673_v50 = vadd.f32 1.0, %v1051_v42 }
 0x10b   : > { %v1055_v44 = vpop.eup %1054  ;;  %v667_v46 = vadd.f32 1.0, %v1053_v43  ;;  %v677_v62 = vmul.f32 %v669_v45, %v645_v48 }
 0x10c   : > { %v1057_v47 = vpop.eup %1056  ;;  %v671_v57 = vadd.f32 1.0, %v1055_v44  ;;  %v681_v2 = vmul.f32 %v673_v50, %v649_v49 }
 0x10d   : > { %v1059_v51 = vpop.eup %1058  ;;  %v670_v55 = vadd.f32 1.0, %v1057_v47  ;;  %v675_v63 = vmul.f32 %v667_v46, %v643_v52  ;;  %v739_v16 = vmul.f32 %v677_v62, %v677_v62 }
 0x10e   : > { %v1061_v56 = vpop.eup %1060  ;;  %v674_v59 = vadd.f32 1.0, %v1059_v51  ;;  %v679_v8 = vmul.f32 %v671_v57, %v647_v53  ;;  %v743_v28 = vmul.f32 %v681_v2, %v681_v2 }
 0x10f   : > { %v1063_v61 = vpop.eup %1062  ;;  %v678_v0 = vmul.f32 %v670_v55, %v646_v54  ;;  %v668_v1 = vadd.f32 1.0, %v1061_v56  ;;  %v737_v13 = vmul.f32 %v675_v63, %v675_v63 }
 0x110   : > { %v682_v3 = vmul.f32 %v674_v59, %v650_v58  ;;  %v672_v6 = vadd.f32 1.0, %v1063_v61  ;;  %v741_v22 = vmul.f32 %v679_v8, %v679_v8 }
 0x111   : > { %v959_v7 = vpack.c.bf16 %v678_v0, %v677_v62  ;;  %v676_v5 = vmul.f32 %v668_v1, %v644_v60  ;;  %v740_v19 = vmul.f32 %v678_v0, %v678_v0 }
 0x112   : > { %v969_v11 = vpack.c.bf16 %v682_v3, %v681_v2  ;;  %v680_v12 = vmul.f32 %v672_v6, %v648_v4  ;;  %v744_v31 = vmul.f32 %v682_v3, %v682_v3 }
 0x113   : > { %977 = vst [vmem:[%s394_s16 + $0x8] sm:$0xff] %v959_v7   ;;  %v954_v14 = vpack.c.bf16 %v676_v5, %v675_v63  ;;  %v723_v10 = vadd.f32 %v676_v5, %v675_v63  ;;  %v738_v9 = vmul.f32 %v676_v5, %v676_v5 }
 0x114   : > { %979 = vst [vmem:[%s394_s16 + $0x18] sm:$0xff] %v969_v11   ;;  %v964_v15 = vpack.c.bf16 %v680_v12, %v679_v8  ;;  %v742_v26 = vmul.f32 %v680_v12, %v680_v12 }
 0x115   : > { %955 = vst [vmem:[%s394_s16] sm:$0xff] %v954_v14   ;;  %v724_v17 = vadd.f32 %v723_v10, %v677_v62  ;;  %v745_v18 = vadd.f32 %v738_v9, %v737_v13 }
 0x116   : > { %978 = vst [vmem:[%s394_s16 + $0x10] sm:$0xff] %v964_v15  }
 0x117   : > { %v746_v20 = vadd.f32 %v745_v18, %v739_v16  ;;  %v725_v21 = vadd.f32 %v724_v17, %v678_v0 }
 0x119   : > { %v726_v23 = vadd.f32 %v725_v21, %v679_v8  ;;  %v747_v24 = vadd.f32 %v746_v20, %v740_v19 }
 0x11b   : > { %v727_v25 = vadd.f32 %v726_v23, %v680_v12  ;;  %v748_v27 = vadd.f32 %v747_v24, %v741_v22 }
 0x11d   : > { %v728_v29 = vadd.f32 %v727_v25, %v681_v2  ;;  %v749_v30 = vadd.f32 %v748_v27, %v742_v26 }
 0x11f   : > { %v729_v32 = vadd.f32 %v728_v29, %v682_v3  ;;  %v750_v33 = vadd.f32 %v749_v30, %v743_v28 }
 0x121   : > { %v730_v34 = vrot.slane %v729_v32, 4  ;;  %v751_v35 = vadd.f32 %v750_v33, %v744_v31 }
 0x123   : > { %v731_v36 = vadd.f32 %v730_v34, %v729_v32  ;;  %v752_v37 = vrot.slane %v751_v35, 4 }
 0x125   : > { %v732_v38 = vrot.slane %v731_v36, 2  ;;  %v753_v39 = vadd.f32 %v752_v37, %v751_v35 }
 0x127   : > { %v733_v40 = vadd.f32 %v732_v38, %v731_v36  ;;  %v754_v41 = vrot.slane %v753_v39, 2 }
 0x129   : > { %v734_v42 = vrot.slane %v733_v40, 1  ;;  %v755_v43 = vadd.f32 %v754_v41, %v753_v39 }
 0x12b   : > { %v735_v44 = vadd.f32 %v734_v42, %v733_v40  ;;  %v756_v45 = vrot.slane %v755_v43, 1 }
 0x12d   : > { %736 = vst [vmem:[%s398_s18] sm:$0x1] %v735_v44  ;;  %v757_v46 = vadd.f32 %v756_v45, %v755_v43 }
 0x12f   : > { %758 = vst [vmem:[%s401_s21] sm:$0x1] %v757_v46 }
 0x130 PF: > { %s21_s13 = sadd.s32 1, %s1070_s13  }
 0x131   : > { %p18_p5 = scmp.ge.s32.totalorder %s21_s13, 4  }
 0x133   :  { %20 = sbr.rel (!%p18_p5) target bundleno = 1 (0x1), region = 109 }

// kernel: conv_mixer_forward.7
= control target key start
LH: loop header
LB: loop body
LE: loop exit
PB: predicated region body
PF: predicated region fallthrough
CT: control target
= control target key end

     0   :  { %s1932_s24 = smov 0   ;;  %s1934_s25 = smov 0   ;;  %s2351_s0 = inlined_call_operand.vmem [shape: bf16[2,8,8,128], index: 0, kind: input, shape index: {}]   ;;  %s2352_s1 = inlined_call_operand.vmem [shape: f32[1,128], index: 1, kind: input, shape index: {}]   ;;  %s2353_s2 = inlined_call_operand.vmem [shape: f32[1,128], index: 2, kind: input, shape index: {}]   ;;  %s2354_s3 = inlined_call_operand.vmem [shape: f32[25,128], index: 3, kind: input, shape index: {}]   ;;  %s2355_s4 = inlined_call_operand.vmem [shape: f32[1,128], index: 4, kind: input, shape index: {}]   ;;  %s2356_s5 = inlined_call_operand.vmem [shape: bf16[2,8,8,128], index: 5, kind: output, shape index: {0}]   ;;  %s2357_s6 = inlined_call_operand.vmem [shape: f32[2,1,128], index: 6, kind: output, shape index: {1}]   ;;  %s2358_s7 = inlined_call_operand.vmem [shape: f32[2,1,128], index: 7, kind: output, shape index: {2}]  }
   0x1   :  { %s1936_s26 = smov 0  }
   0x2 LB: > { %s30_s27 = sadd.s32 1, %s1886_s25  ;;  %p1747_p0 = scmp.ge.s32.totalorder %s1890_s26, 1  ;;  %s1890_s26 = sphi %s1936_s26, %s18_s26   ;;  %s1886_s25 = sphi %s1934_s25, %s2360_s25   ;;  %s1882_s24 = sphi %s1932_s24, %s2359_s24  }
   0x3   : > { %p32_p1 = scmp.ge.s32.totalorder %s30_s27, 2  ;;  %p298_p2 = scmp.lt.s32.totalorder %s1890_s26, 3 }
   0x5   : > { %s2362_s27 = smov (%p32_p1, %s30_s27), 0  ;;  %p299_p3 = pnand %p1747_p0, %p298_p2 }
   0x6   : > { %p361_p4 = scmp.lt.s32.totalorder (!%p299_p3), %s1882_s24, 1  ;;  %v1752_v0 = vld [vmem:[%s2352_s1] ss:$0 sm:$0xff] (!%p299_p3)  ;;  %v1975_v26 = vld [vmem:[%s2354_s3 + $0x11] ss:$0 sm:$0xff] (!%p299_p3) }
   0x7   : > { %302 = sbr.rel (%p299_p3) target bundleno = 323 (0x143), region = 40  ;;  %v1753_v9 = vld [vmem:[%s2353_s2] ss:$0 sm:$0xff] (!%p299_p3)  ;;  %v1989_v31 = vld [vmem:[%s2354_s3 + $0x16] ss:$0 sm:$0xff] (!%p299_p3) }
   0x8   : > { %v1754_v33 = vld [vmem:[%s2354_s3 + $0xc] ss:$0 sm:$0xff] (!%p299_p3)  ;;  %v1755_v51 = vld [vmem:[%s2354_s3] ss:$0 sm:$0xff] (!%p299_p3)  ;;  %v2045_v52 = vld [vmem:[%s2354_s3 + $0x5] ss:$0 sm:$0xff] (!%p299_p3) }
   0xe   : > { %s2364_s24 = smov (!%p361_p4, %s1882_s24), 1 }
   0xf   : > { %s1782_s28 = sshll.u32 %s2364_s24, 5  ;;  %s395_s17 = scalar_lea.vmem %s2357_s6, %s2364_s24 }
  0x10   : > { %s368_s8 = scalar_lea.vmem %s2351_s0, %s1782_s28  ;;  %s2293_s15 = scalar_lea.vmem %s2356_s5, %s1782_s28 }
  0x11   : > { %v1785_v1 = vld [vmem:[%s368_s8] sm:$0xff]   ;;  %v1820_v2 = vld [vmem:[%s368_s8 + $0x8] sm:$0xff]   ;;  %v1821_v3 = vld [vmem:[%s368_s8 + $0x10] sm:$0xff]   ;;  %s401_s20 = scalar_lea.vmem %s2358_s7, %s2364_s24 }
  0x12   : > { %v1786_v4 = vunpack.c.l.bf16 %v1785_v1  ;;  %v1787_v5 = vunpack.c.h.bf16 %v1785_v1  ;;  %v1790_v6 = vunpack.c.l.bf16 %v1820_v2  ;;  %v1791_v7 = vunpack.c.h.bf16 %v1820_v2  ;;  %v1822_v8 = vld [vmem:[%s368_s8 + $0x18] sm:$0xff]  }
  0x13   : > { %v1794_v10 = vunpack.c.l.bf16 %v1821_v3  ;;  %v1795_v11 = vunpack.c.h.bf16 %v1821_v3  ;;  %v1798_v12 = vunpack.c.l.bf16 %v1822_v8  ;;  %v1799_v13 = vunpack.c.h.bf16 %v1822_v8 }
  0x14   : > { %v426_v14 = vmul.f32 %v1786_v4, %v1752_v0  ;;  %v427_v15 = vmul.f32 %v1787_v5, %v1752_v0  ;;  %v428_v16 = vmul.f32 %v1790_v6, %v1752_v0  ;;  %v429_v17 = vmul.f32 %v1791_v7, %v1752_v0 }
  0x15   : > { %v430_v18 = vmul.f32 %v1794_v10, %v1752_v0  ;;  %v431_v19 = vmul.f32 %v1795_v11, %v1752_v0  ;;  %v432_v20 = vmul.f32 %v1798_v12, %v1752_v0  ;;  %v433_v21 = vmul.f32 %v1799_v13, %v1752_v0  ;;  %v2051_v13 = vld [vmem:[%s2354_s3 + $0xa] ss:$0 sm:$0xff] }
  0x16   : > { %v1964_v22 = vadd.f32 %v1753_v9, %v426_v14  ;;  %v1966_v23 = vadd.f32 %v1753_v9, %v427_v15  ;;  %v1968_v24 = vadd.f32 %v1753_v9, %v428_v16  ;;  %v1970_v25 = vadd.f32 %v1753_v9, %v429_v17 }
  0x17   : > { %v1977_v27 = vadd.f32 %v1753_v9, %v430_v18  ;;  %v1979_v28 = vadd.f32 %v1753_v9, %v431_v19  ;;  %v1981_v29 = vadd.f32 %v1753_v9, %v432_v20  ;;  %v447_v30 = vadd.f32 %v1753_v9, %v433_v21  ;;  %v1756_v20 = vld [vmem:[%s2354_s3 + $0x1] ss:$0 sm:$0xff] }
  0x18   : > { %448 = vst [vmem:[#allocation2] sm:$0xff] %v1964_v22  ;;  %449 = vst [vmem:[#allocation2 + $0x8] sm:$0xff] %v1966_v23  ;;  %v1994_v32 = vmul.f32 %v1975_v26, %v1970_v25  ;;  %v469_v42 = vmul.f32 %v1754_v33, %v1964_v22  ;;  %v470_v43 = vmul.f32 %v1754_v33, %v1966_v23 }
  0x19   : > { %450 = vst [vmem:[#allocation2 + $0x10] sm:$0xff] %v1968_v24  ;;  %451 = vst [vmem:[#allocation2 + $0x18] sm:$0xff] %v1970_v25  ;;  %v2002_v34 = vmul.f32 %v1975_v26, %v1977_v27  ;;  %v2006_v35 = vmul.f32 %v1989_v31, %v1977_v27  ;;  %v2011_v36 = vmul.f32 %v1975_v26, %v1979_v28 }
  0x1a   : > { %452 = vst [vmem:[#allocation2 + $0x20] sm:$0xff] %v1977_v27  ;;  %453 = vst [vmem:[#allocation2 + $0x28] sm:$0xff] %v1979_v28  ;;  %v2015_v37 = vmul.f32 %v1989_v31, %v1979_v28  ;;  %v2020_v38 = vmul.f32 %v1975_v26, %v1981_v29  ;;  %v2024_v39 = vmul.f32 %v1989_v31, %v1981_v29 }
  0x1b   : > { %454 = vst [vmem:[#allocation2 + $0x30] sm:$0xff] %v1981_v29  ;;  %455 = vst [vmem:[#allocation2 + $0x38] sm:$0xff] %v447_v30  ;;  %v2027_v40 = vmul.f32 %v1975_v26, %v447_v30  ;;  %v2030_v41 = vmul.f32 %v1989_v31, %v447_v30  ;;  %v471_v44 = vmul.f32 %v1754_v33, %v1968_v24 }
  0x1c   : > { %v472_v45 = vmul.f32 %v1754_v33, %v1970_v25  ;;  %v473_v46 = vmul.f32 %v1754_v33, %v1977_v27  ;;  %v474_v47 = vmul.f32 %v1754_v33, %v1979_v28  ;;  %v475_v48 = vmul.f32 %v1754_v33, %v1981_v29  ;;  %477 = vst [vmem:[#allocation3] sm:$0xff] %v469_v42 }
  0x1d   : > { %v476_v49 = vmul.f32 %v1754_v33, %v447_v30  ;;  %478 = vst [vmem:[#allocation3 + $0x8] sm:$0xff] %v470_v43  ;;  %479 = vst [vmem:[#allocation3 + $0x10] sm:$0xff] %v471_v44 }
  0x1e   : > { %480 = vst [vmem:[#allocation3 + $0x18] sm:$0xff] %v472_v45  ;;  %481 = vst [vmem:[#allocation3 + $0x20] sm:$0xff] %v473_v46 }
  0x1f   : > { %482 = vst [vmem:[#allocation3 + $0x28] sm:$0xff] %v474_v47  ;;  %483 = vst [vmem:[#allocation3 + $0x30] sm:$0xff] %v475_v48  ;;  %v485_v58 = vld [vmem:[#allocation2] sm:$0x3f]  ;;  %v486_v60 = vld [vmem:[#allocation2 + $0x8] sm:$0x3f] }
  0x20   : > { %484 = vst [vmem:[#allocation3 + $0x38] sm:$0xff] %v476_v49  ;;  %v503_v59 = vmul.f32 %v1755_v51, %v485_v58  ;;  %v487_v61 = vld [vmem:[#allocation2 + $0x10] sm:$0x3f]  ;;  %v488_v62 = vld [vmem:[#allocation2 + $0x18] sm:$0x3f]  ;;  %v504_v63 = vmul.f32 %v1755_v51, %v486_v60 }
  0x21   : > { %v505_v0 = vmul.f32 %v1755_v51, %v487_v61  ;;  %v506_v1 = vmul.f32 %v1755_v51, %v488_v62  ;;  %v489_v2 = vld [vmem:[#allocation2 + $0x20] sm:$0x3f]  ;;  %v490_v3 = vld [vmem:[#allocation2 + $0x28] sm:$0x3f]  ;;  %v523_v44 = vld [vmem:[#allocation2 + $0x10] sm:$0x7f] }
  0x22   : > { %v661_v4 = vld [vmem:[#allocation2] sm:$0x3f]  ;;  %v507_v7 = vmul.f32 %v1755_v51, %v489_v2  ;;  %v508_v8 = vmul.f32 %v1755_v51, %v490_v3  ;;  %v526_v33 = vld [vmem:[#allocation2 + $0x28] sm:$0x7f]  ;;  %v524_v45 = vld [vmem:[#allocation2 + $0x18] sm:$0x7f] }
  0x23   : > { %v681_v9 = vmul.f32 %v2045_v52, %v661_v4  ;;  %v862_v16 = vld [vmem:[#allocation2] sm:$0x3f]  ;;  %v522_v43 = vld [vmem:[#allocation2 + $0x8] sm:$0x7f]  ;;  %v543_v48 = vmul.f32 %v1756_v20, %v526_v33 }
  0x24   : > { %v492_v50 = vld [vmem:[#allocation3 + $0x12] sm:$0x3f]  ;;  %v669_v5 = vld [vmem:[#allocation3 + $0xa] sm:$0x3f]  ;;  %v870_v17 = vld [vmem:[#allocation3 + $0x2] sm:$0x3f]  ;;  %v883_v19 = vmul.f32 %v2051_v13, %v862_v16 }
  0x25   : > { %v493_v53 = vld [vmem:[#allocation3 + $0x1a] sm:$0x3f]  ;;  %v494_v54 = vld [vmem:[#allocation3 + $0x22] sm:$0x3f]  ;;  %v509_v6 = vadd.f32 %v503_v59, %v492_v50  ;;  %v688_v18 = vadd.f32 %v681_v9, %v669_v5 }
  0x26   : > { %v495_v55 = vld [vmem:[#allocation3 + $0x2a] sm:$0x3f]  ;;  %v496_v56 = vld [vmem:[#allocation3 + $0x32] sm:$0x3f]  ;;  %v510_v10 = vadd.f32 %v504_v63, %v493_v53  ;;  %v511_v11 = vadd.f32 %v505_v0, %v494_v54  ;;  %v521_v21 = vld [vmem:[#allocation2] sm:$0x7f]  ;;  %v891_v42 = vadd.f32 %v883_v19, %v870_v17  ;;  %v539_v53 = vmul.f32 %v1756_v20, %v522_v43 }
  0x27   : > { %v497_v57 = vld [vmem:[#allocation3 + $0x3a] sm:$0x3f]  ;;  %v512_v12 = vadd.f32 %v506_v1, %v495_v55  ;;  %515 = vst [vmem:[#allocation3 + $0x12] sm:$0x3f] %v509_v6  ;;  %v513_v14 = vadd.f32 %v507_v7, %v496_v56  ;;  %695 = vst [vmem:[#allocation3 + $0xa] sm:$0x3f] %v688_v18  ;;  %v538_v46 = vmul.f32 %v1756_v20, %v521_v21 }
  0x28   : > { %v514_v15 = vadd.f32 %v508_v8, %v497_v57  ;;  %516 = vst [vmem:[#allocation3 + $0x1a] sm:$0x3f] %v510_v10  ;;  %517 = vst [vmem:[#allocation3 + $0x22] sm:$0x3f] %v511_v11  ;;  %v525_v30 = vld [vmem:[#allocation2 + $0x20] sm:$0x7f]  ;;  %v540_v54 = vmul.f32 %v1756_v20, %v523_v44  ;;  %v541_v55 = vmul.f32 %v1756_v20, %v524_v45 }
  0x29   : > { %518 = vst [vmem:[#allocation3 + $0x2a] sm:$0x3f] %v512_v12  ;;  %519 = vst [vmem:[#allocation3 + $0x32] sm:$0x3f] %v513_v14  ;;  %v542_v47 = vmul.f32 %v1756_v20, %v525_v30  ;;  %v702_v49 = vld [vmem:[#allocation2] sm:$0x7f] }
  0x2a   : > { %520 = vst [vmem:[#allocation3 + $0x3a] sm:$0x3f] %v514_v15  ;;  %899 = vst [vmem:[#allocation3 + $0x2] sm:$0x3f] %v891_v42  ;;  %v2060_v50 = vld [vmem:[%s2354_s3 + $0x6] ss:$0 sm:$0xff] }
  0x2b   : > { %v2065_v56 = vld [vmem:[%s2354_s3 + $0xb] ss:$0 sm:$0xff]  ;;  %v721_v2 = vmul.f32 %v2060_v50, %v702_v49  ;;  %v907_v3 = vld [vmem:[#allocation2] sm:$0x7f]  ;;  %v2081_v19 = vld [vmem:[%s2354_s3 + $0x7] ss:$0 sm:$0xff] }
  0x2c   : > { %v1757_v8 = vld [vmem:[%s2354_s3 + $0x2] ss:$0 sm:$0xff]  ;;  %v928_v9 = vmul.f32 %v2065_v56, %v907_v3  ;;  %v2086_v20 = vld [vmem:[%s2354_s3 + $0xd] ss:$0 sm:$0xff]  ;;  %v761_v21 = vmul.f32 %v2081_v19, %v1964_v22 }
  0x2d   : > { %v573_v12 = vmul.f32 %v1757_v8, %v1964_v22  ;;  %v574_v14 = vmul.f32 %v1757_v8, %v1966_v23  ;;  %v575_v15 = vmul.f32 %v1757_v8, %v1968_v24  ;;  %v576_v16 = vmul.f32 %v1757_v8, %v1970_v25  ;;  %v952_v49 = vld [vmem:[#allocation2 + $0x1] sm:$0x7f] }
  0x2e   : > { %v527_v51 = vld [vmem:[#allocation3 + $0x11] sm:$0x7f]  ;;  %v709_v4 = vld [vmem:[#allocation3 + $0x9] sm:$0x7f]  ;;  %v577_v17 = vmul.f32 %v1757_v8, %v1977_v27  ;;  %v578_v18 = vmul.f32 %v1757_v8, %v1979_v28  ;;  %v973_v22 = vmul.f32 %v2086_v20, %v952_v49  ;;  %v1759_v49 = vld [vmem:[%s2354_s3 + $0x4] ss:$0 sm:$0xff] }
  0x2f   : > { %v528_v57 = vld [vmem:[#allocation3 + $0x19] sm:$0x7f]  ;;  %v529_v58 = vld [vmem:[#allocation3 + $0x21] sm:$0x7f]  ;;  %v544_v60 = vadd.f32 %v538_v46, %v527_v51  ;;  %v728_v7 = vadd.f32 %v721_v2, %v709_v4 }
  0x30   : > { %v530_v59 = vld [vmem:[#allocation3 + $0x29] sm:$0x7f]  ;;  %v531_v61 = vld [vmem:[#allocation3 + $0x31] sm:$0x7f]  ;;  %v545_v63 = vadd.f32 %v539_v53, %v528_v57  ;;  %v546_v0 = vadd.f32 %v540_v54, %v529_v58  ;;  %v591_v57 = vld [vmem:[#allocation2 + $0x1] sm:$0x7f] }
  0x31   : > { %v532_v62 = vld [vmem:[#allocation3 + $0x39] sm:$0x7f]  ;;  %v547_v1 = vadd.f32 %v541_v55, %v530_v59  ;;  %550 = vst [vmem:[#allocation3 + $0x11] sm:$0x7f] %v544_v60  ;;  %v548_v5 = vadd.f32 %v542_v47, %v531_v61  ;;  %v915_v10 = vld [vmem:[#allocation3 + $0x1] sm:$0x7f] }
  0x32   : > { %v549_v6 = vadd.f32 %v543_v48, %v532_v62  ;;  %551 = vst [vmem:[#allocation3 + $0x19] sm:$0x7f] %v545_v63  ;;  %552 = vst [vmem:[#allocation3 + $0x21] sm:$0x7f] %v546_v0  ;;  %v936_v11 = vadd.f32 %v928_v9, %v915_v10  ;;  %v1758_v58 = vld [vmem:[%s2354_s3 + $0x3] ss:$0 sm:$0xff] }
  0x33   : > { %553 = vst [vmem:[#allocation3 + $0x29] sm:$0x7f] %v547_v1  ;;  %554 = vst [vmem:[#allocation3 + $0x31] sm:$0x7f] %v548_v5  ;;  %v595_v60 = vld [vmem:[#allocation2 + $0x21] sm:$0x7f]  ;;  %v608_v2 = vmul.f32 %v1758_v58, %v591_v57 }
  0x34   : > { %555 = vst [vmem:[#allocation3 + $0x39] sm:$0x7f] %v549_v6  ;;  %735 = vst [vmem:[#allocation3 + $0x9] sm:$0x7f] %v728_v7  ;;  %v596_v61 = vld [vmem:[#allocation2 + $0x29] sm:$0x7f]  ;;  %v612_v3 = vmul.f32 %v1758_v58, %v595_v60 }
  0x35   : > { %944 = vst [vmem:[#allocation3 + $0x1] sm:$0x7f] %v936_v11  ;;  %v592_v63 = vld [vmem:[#allocation2 + $0x9] sm:$0x7f]  ;;  %v593_v0 = vld [vmem:[#allocation2 + $0x11] sm:$0x7f]  ;;  %v613_v4 = vmul.f32 %v1758_v58, %v596_v61 }
  0x36   : > { %v594_v1 = vld [vmem:[#allocation2 + $0x19] sm:$0x7f]  ;;  %v782_v5 = vld [vmem:[#allocation2 + $0x1] sm:$0x7f]  ;;  %v2097_v6 = vld [vmem:[%s2354_s3 + $0x8] ss:$0 sm:$0xff]  ;;  %v609_v9 = vmul.f32 %v1758_v58, %v592_v63  ;;  %v610_v10 = vmul.f32 %v1758_v58, %v593_v0 }
  0x37   : > { %v2102_v7 = vld [vmem:[%s2354_s3 + $0xe] ss:$0 sm:$0xff]  ;;  %v611_v11 = vmul.f32 %v1758_v58, %v594_v1  ;;  %v628_v57 = vld [vmem:[#allocation2 + $0x12] sm:$0x3f]  ;;  %v629_v58 = vld [vmem:[#allocation2 + $0x1a] sm:$0x3f] }
  0x38   : > { %v562_v23 = vld [vmem:[#allocation3 + $0x10] sm:$0xff]  ;;  %v2112_v63 = vld [vmem:[%s2354_s3 + $0x9] ss:$0 sm:$0xff]  ;;  %v2117_v0 = vld [vmem:[%s2354_s3 + $0xf] ss:$0 sm:$0xff] }
  0x39   : > { %v579_v30 = vadd.f32 %v573_v12, %v562_v23  ;;  %v563_v33 = vld [vmem:[#allocation3 + $0x18] sm:$0xff]  ;;  %v564_v42 = vld [vmem:[#allocation3 + $0x20] sm:$0xff] }
  0x3a   : > { %v565_v43 = vld [vmem:[#allocation3 + $0x28] sm:$0xff]  ;;  %v580_v44 = vadd.f32 %v574_v14, %v563_v33  ;;  %v581_v45 = vadd.f32 %v575_v15, %v564_v42  ;;  %v566_v47 = vld [vmem:[#allocation3 + $0x30] sm:$0xff]  ;;  %v801_v33 = vmul.f32 %v2097_v6, %v782_v5  ;;  %v997_v42 = vld [vmem:[#allocation2 + $0x2] sm:$0x3f] }
  0x3b   : > { %v582_v46 = vadd.f32 %v576_v16, %v565_v43  ;;  %v567_v48 = vld [vmem:[#allocation3 + $0x38] sm:$0xff]  ;;  %585 = vst [vmem:[#allocation3 + $0x10] sm:$0xff] %v579_v30  ;;  %v583_v51 = vadd.f32 %v577_v17, %v566_v47  ;;  %v749_v54 = vld [vmem:[#allocation3 + $0x8] sm:$0xff]  ;;  %v1018_v47 = vmul.f32 %v2102_v7, %v997_v42 }
  0x3c   : > { %v584_v53 = vadd.f32 %v578_v18, %v567_v48  ;;  %586 = vst [vmem:[#allocation3 + $0x18] sm:$0xff] %v580_v44  ;;  %587 = vst [vmem:[#allocation3 + $0x20] sm:$0xff] %v581_v45  ;;  %v768_v55 = vadd.f32 %v761_v21, %v749_v54  ;;  %v960_v59 = vld [vmem:[#allocation3] sm:$0x7f]  ;;  %v631_v54 = vld [vmem:[#allocation2 + $0x2a] sm:$0x3f] }
  0x3d   : > { %588 = vst [vmem:[#allocation3 + $0x28] sm:$0xff] %v582_v46  ;;  %589 = vst [vmem:[#allocation3 + $0x30] sm:$0xff] %v583_v51  ;;  %v981_v62 = vadd.f32 %v973_v22, %v960_v59  ;;  %v626_v48 = vld [vmem:[#allocation2 + $0x2] sm:$0x3f]  ;;  %v627_v22 = vld [vmem:[#allocation2 + $0xa] sm:$0x3f]  ;;  %v648_v61 = vmul.f32 %v1759_v49, %v631_v54 }
  0x3e   : > { %590 = vst [vmem:[#allocation3 + $0x38] sm:$0xff] %v584_v53  ;;  %775 = vst [vmem:[#allocation3 + $0x8] sm:$0xff] %v768_v55  ;;  %v630_v53 = vld [vmem:[#allocation2 + $0x22] sm:$0x3f]  ;;  %v643_v59 = vmul.f32 %v1759_v49, %v626_v48  ;;  %v663_v48 = vld [vmem:[#allocation2 + $0x10] sm:$0x3f] }
  0x3f   : > { %989 = vst [vmem:[#allocation3] sm:$0x7f] %v981_v62  ;;  %v647_v60 = vmul.f32 %v1759_v49, %v630_v53  ;;  %v822_v62 = vld [vmem:[#allocation2 + $0x2] sm:$0x3f]  ;;  %v863_v54 = vld [vmem:[#allocation2 + $0x8] sm:$0x3f] }
  0x42   : > { %v597_v8 = vld [vmem:[#allocation3 + $0x10] sm:$0x7f] }
  0x43   : > { %v614_v12 = vadd.f32 %v608_v2, %v597_v8  ;;  %v598_v14 = vld [vmem:[#allocation3 + $0x18] sm:$0x7f]  ;;  %v599_v15 = vld [vmem:[#allocation3 + $0x20] sm:$0x7f]  ;;  %v644_v2 = vmul.f32 %v1759_v49, %v627_v22 }
  0x44   : > { %v600_v16 = vld [vmem:[#allocation3 + $0x28] sm:$0x7f]  ;;  %v615_v17 = vadd.f32 %v609_v9, %v598_v14  ;;  %v616_v18 = vadd.f32 %v610_v10, %v599_v15  ;;  %v601_v21 = vld [vmem:[#allocation3 + $0x30] sm:$0x7f] }
  0x45   : > { %v617_v23 = vadd.f32 %v611_v11, %v600_v16  ;;  %v602_v30 = vld [vmem:[#allocation3 + $0x38] sm:$0x7f]  ;;  %620 = vst [vmem:[#allocation3 + $0x10] sm:$0x7f] %v614_v12  ;;  %v618_v43 = vadd.f32 %v612_v3, %v601_v21  ;;  %v789_v45 = vld [vmem:[#allocation3 + $0x8] sm:$0x7f]  ;;  %v645_v3 = vmul.f32 %v1759_v49, %v628_v57 }
  0x46   : > { %v619_v44 = vadd.f32 %v613_v4, %v602_v30  ;;  %621 = vst [vmem:[#allocation3 + $0x18] sm:$0x7f] %v615_v17  ;;  %622 = vst [vmem:[#allocation3 + $0x20] sm:$0x7f] %v616_v18  ;;  %v808_v46 = vadd.f32 %v801_v33, %v789_v45  ;;  %v1005_v51 = vld [vmem:[#allocation3] sm:$0x3f]  ;;  %v646_v4 = vmul.f32 %v1759_v49, %v629_v58 }
  0x47   : > { %623 = vst [vmem:[#allocation3 + $0x28] sm:$0x7f] %v617_v23  ;;  %624 = vst [vmem:[#allocation3 + $0x30] sm:$0x7f] %v618_v43  ;;  %v1026_v55 = vadd.f32 %v1018_v47, %v1005_v51  ;;  %v1043_v11 = vld [vmem:[#allocation2 + $0x8] sm:$0x3f]  ;;  %v841_v18 = vmul.f32 %v2112_v63, %v822_v62 }
  0x48   : > { %625 = vst [vmem:[#allocation3 + $0x38] sm:$0x7f] %v619_v44  ;;  %815 = vst [vmem:[#allocation3 + $0x8] sm:$0x7f] %v808_v46  ;;  %v1062_v42 = vmul.f32 %v2117_v0, %v1043_v11  ;;  %v662_v43 = vld [vmem:[#allocation2 + $0x8] sm:$0x3f] }
  0x49   : > { %1034 = vst [vmem:[#allocation3] sm:$0x3f] %v1026_v55  ;;  %v665_v44 = vld [vmem:[#allocation2 + $0x20] sm:$0x3f]  ;;  %v666_v45 = vld [vmem:[#allocation2 + $0x28] sm:$0x3f]  ;;  %v682_v55 = vmul.f32 %v2045_v52, %v662_v43 }
  0x4a   : > { %v667_v46 = vld [vmem:[#allocation2 + $0x30] sm:$0x3f]  ;;  %v664_v49 = vld [vmem:[#allocation2 + $0x18] sm:$0x3f]  ;;  %v685_v53 = vmul.f32 %v2045_v52, %v665_v44  ;;  %v686_v22 = vmul.f32 %v2045_v52, %v666_v45  ;;  %v706_v43 = vld [vmem:[#allocation2 + $0x20] sm:$0x7f] }
  0x4b   : > { %v687_v57 = vmul.f32 %v2045_v52, %v667_v46  ;;  %v2128_v58 = vld [vmem:[%s2354_s3 + $0x10] ss:$0 sm:$0xff]  ;;  %v908_v45 = vld [vmem:[#allocation2 + $0x8] sm:$0x7f] }
  0x4c   : > { %v632_v1 = vld [vmem:[#allocation3 + $0x10] sm:$0x3f] }
  0x4d   : > { %v649_v5 = vadd.f32 %v643_v59, %v632_v1  ;;  %v633_v8 = vld [vmem:[#allocation3 + $0x18] sm:$0x3f]  ;;  %v634_v9 = vld [vmem:[#allocation3 + $0x20] sm:$0x3f]  ;;  %v683_v59 = vmul.f32 %v2045_v52, %v663_v48 }
  0x4e   : > { %v635_v10 = vld [vmem:[#allocation3 + $0x28] sm:$0x3f]  ;;  %v650_v12 = vadd.f32 %v644_v2, %v633_v8  ;;  %v651_v14 = vadd.f32 %v645_v3, %v634_v9  ;;  %v636_v16 = vld [vmem:[#allocation3 + $0x30] sm:$0x3f] }
  0x4f   : > { %v652_v15 = vadd.f32 %v646_v4, %v635_v10  ;;  %v637_v17 = vld [vmem:[#allocation3 + $0x38] sm:$0x3f]  ;;  %655 = vst [vmem:[#allocation3 + $0x10] sm:$0x3f] %v649_v5  ;;  %v653_v23 = vadd.f32 %v647_v60, %v636_v16  ;;  %v829_v30 = vld [vmem:[#allocation3 + $0x8] sm:$0x3f]  ;;  %v684_v60 = vmul.f32 %v2045_v52, %v664_v49  ;;  %v884_v5 = vmul.f32 %v2051_v13, %v863_v54 }
  0x50   : > { %v654_v21 = vadd.f32 %v648_v61, %v637_v17  ;;  %656 = vst [vmem:[#allocation3 + $0x18] sm:$0x3f] %v650_v12  ;;  %657 = vst [vmem:[#allocation3 + $0x20] sm:$0x3f] %v651_v14  ;;  %v848_v33 = vadd.f32 %v841_v18, %v829_v30  ;;  %v1050_v47 = vld [vmem:[#allocation3 + $0x2] sm:$0x3f] }
  0x51   : > { %658 = vst [vmem:[#allocation3 + $0x28] sm:$0x3f] %v652_v15  ;;  %659 = vst [vmem:[#allocation3 + $0x30] sm:$0x3f] %v653_v23  ;;  %v1069_v51 = vadd.f32 %v1062_v42, %v1050_v47  ;;  %v1083_v4 = vld [vmem:[#allocation2 + $0x8] sm:$0x7f] }
  0x52   : > { %660 = vst [vmem:[#allocation3 + $0x38] sm:$0x3f] %v654_v21  ;;  %855 = vst [vmem:[#allocation3 + $0x8] sm:$0x3f] %v848_v33  ;;  %v703_v17 = vld [vmem:[#allocation2 + $0x8] sm:$0x7f]  ;;  %v1102_v18 = vmul.f32 %v2128_v58, %v1083_v4 }
  0x53   : > { %1076 = vst [vmem:[#allocation3 + $0x2] sm:$0x3f] %v1069_v51  ;;  %v707_v23 = vld [vmem:[#allocation2 + $0x28] sm:$0x7f]  ;;  %v708_v21 = vld [vmem:[#allocation2 + $0x30] sm:$0x7f]  ;;  %v722_v46 = vmul.f32 %v2060_v50, %v703_v17 }
  0x54   : > { %v704_v33 = vld [vmem:[#allocation2 + $0x10] sm:$0x7f]  ;;  %v705_v42 = vld [vmem:[#allocation2 + $0x18] sm:$0x7f]  ;;  %v726_v47 = vmul.f32 %v2060_v50, %v707_v23  ;;  %v727_v48 = vmul.f32 %v2060_v50, %v708_v21  ;;  %v1123_v4 = vld [vmem:[#allocation2 + $0x8] sm:$0xff]  ;;  %v767_v23 = vmul.f32 %v2081_v19, %v1981_v29 }
  0x55   : > { %v723_v49 = vmul.f32 %v2060_v50, %v704_v33  ;;  %v724_v51 = vmul.f32 %v2060_v50, %v705_v42  ;;  %v762_v17 = vmul.f32 %v2081_v19, %v1123_v4  ;;  %v2154_v21 = vld [vmem:[%s2354_s3 + $0x12] ss:$0 sm:$0xff]  ;;  %v1163_v29 = vld [vmem:[#allocation2 + $0x9] sm:$0x7f] }
  0x56   : > { %v670_v61 = vld [vmem:[#allocation3 + $0x12] sm:$0x3f] }
  0x57   : > { %v671_v62 = vld [vmem:[#allocation3 + $0x1a] sm:$0x3f]  ;;  %v672_v1 = vld [vmem:[#allocation3 + $0x22] sm:$0x3f]  ;;  %v689_v3 = vadd.f32 %v682_v55, %v670_v61 }
  0x58   : > { %v673_v2 = vld [vmem:[#allocation3 + $0x2a] sm:$0x3f]  ;;  %v674_v8 = vld [vmem:[#allocation3 + $0x32] sm:$0x3f]  ;;  %v690_v9 = vadd.f32 %v683_v59, %v671_v62  ;;  %v691_v10 = vadd.f32 %v684_v60, %v672_v1 }
  0x59   : > { %v692_v11 = vadd.f32 %v685_v53, %v673_v2  ;;  %v675_v12 = vld [vmem:[#allocation3 + $0x3a] sm:$0x3f]  ;;  %v871_v14 = vld [vmem:[#allocation3 + $0xa] sm:$0x3f]  ;;  %696 = vst [vmem:[#allocation3 + $0x12] sm:$0x3f] %v689_v3  ;;  %v693_v15 = vadd.f32 %v686_v22, %v674_v8  ;;  %v725_v53 = vmul.f32 %v2060_v50, %v706_v43  ;;  %v929_v3 = vmul.f32 %v2065_v56, %v908_v45 }
  0x5a   : > { %v694_v16 = vadd.f32 %v687_v57, %v675_v12  ;;  %697 = vst [vmem:[#allocation3 + $0x1a] sm:$0x3f] %v690_v9  ;;  %698 = vst [vmem:[#allocation3 + $0x22] sm:$0x3f] %v691_v10  ;;  %v892_v52 = vadd.f32 %v884_v5, %v871_v14  ;;  %v1090_v30 = vld [vmem:[#allocation3 + $0x1] sm:$0x7f]  ;;  %v1142_v10 = vmul.f32 %v1975_v26, %v1123_v4 }
  0x5b   : > { %699 = vst [vmem:[#allocation3 + $0x2a] sm:$0x3f] %v692_v11  ;;  %700 = vst [vmem:[#allocation3 + $0x32] sm:$0x3f] %v693_v15  ;;  %v1109_v44 = vadd.f32 %v1102_v18, %v1090_v30  ;;  %v744_v14 = vld [vmem:[#allocation2 + $0x10] sm:$0xff]  ;;  %v764_v15 = vmul.f32 %v2081_v19, %v1970_v25  ;;  %v766_v18 = vmul.f32 %v2081_v19, %v1979_v28 }
  0x5c   : > { %701 = vst [vmem:[#allocation3 + $0x3a] sm:$0x3f] %v694_v16  ;;  %900 = vst [vmem:[#allocation3 + $0xa] sm:$0x3f] %v892_v52  ;;  %v765_v16 = vmul.f32 %v2081_v19, %v1977_v27  ;;  %v953_v52 = vld [vmem:[#allocation2 + $0x9] sm:$0x7f]  ;;  %v763_v25 = vmul.f32 %v2081_v19, %v744_v14 }
  0x5d   : > { %1116 = vst [vmem:[#allocation3 + $0x1] sm:$0x7f] %v1109_v44  ;;  %v974_v44 = vmul.f32 %v2086_v20, %v953_v52 }
  0x60   : > { %v710_v54 = vld [vmem:[#allocation3 + $0x11] sm:$0x7f] }
  0x61   : > { %v711_v55 = vld [vmem:[#allocation3 + $0x19] sm:$0x7f]  ;;  %v712_v22 = vld [vmem:[#allocation3 + $0x21] sm:$0x7f]  ;;  %v729_v59 = vadd.f32 %v722_v46, %v710_v54  ;;  %v1182_v54 = vmul.f32 %v2154_v21, %v1163_v29 }
  0x62   : > { %v713_v57 = vld [vmem:[#allocation3 + $0x29] sm:$0x7f]  ;;  %v714_v60 = vld [vmem:[#allocation3 + $0x31] sm:$0x7f]  ;;  %v730_v61 = vadd.f32 %v723_v49, %v711_v55  ;;  %v731_v62 = vadd.f32 %v724_v51, %v712_v22  ;;  %v825_v29 = vld [vmem:[#allocation2 + $0x1a] sm:$0x3f] }
  0x63   : > { %v732_v1 = vadd.f32 %v725_v53, %v713_v57  ;;  %v715_v2 = vld [vmem:[#allocation3 + $0x39] sm:$0x7f]  ;;  %v916_v5 = vld [vmem:[#allocation3 + $0x9] sm:$0x7f]  ;;  %736 = vst [vmem:[#allocation3 + $0x11] sm:$0x7f] %v729_v59  ;;  %v733_v8 = vadd.f32 %v726_v47, %v714_v60 }
  0x64   : > { %v734_v9 = vadd.f32 %v727_v48, %v715_v2  ;;  %737 = vst [vmem:[#allocation3 + $0x19] sm:$0x7f] %v730_v61  ;;  %738 = vst [vmem:[#allocation3 + $0x21] sm:$0x7f] %v731_v62  ;;  %v937_v50 = vadd.f32 %v929_v3, %v916_v5  ;;  %v1130_v11 = vld [vmem:[#allocation3] sm:$0xff] }
  0x65   : > { %739 = vst [vmem:[#allocation3 + $0x29] sm:$0x7f] %v732_v1  ;;  %740 = vst [vmem:[#allocation3 + $0x31] sm:$0x7f] %v733_v8  ;;  %v1149_v12 = vadd.f32 %v1142_v10, %v1130_v11  ;;  %v783_v55 = vld [vmem:[#allocation2 + $0x9] sm:$0x7f] }
  0x66   : > { %741 = vst [vmem:[#allocation3 + $0x39] sm:$0x7f] %v734_v9  ;;  %945 = vst [vmem:[#allocation3 + $0x9] sm:$0x7f] %v937_v50  ;;  %v787_v57 = vld [vmem:[#allocation2 + $0x29] sm:$0x7f]  ;;  %v802_v3 = vmul.f32 %v2097_v6, %v783_v55 }
  0x67   : > { %1156 = vst [vmem:[#allocation3] sm:$0xff] %v1149_v12  ;;  %v788_v59 = vld [vmem:[#allocation2 + $0x31] sm:$0x7f]  ;;  %v785_v62 = vld [vmem:[#allocation2 + $0x19] sm:$0x7f]  ;;  %v806_v4 = vmul.f32 %v2097_v6, %v787_v57 }
  0x68   : > { %v784_v61 = vld [vmem:[#allocation2 + $0x11] sm:$0x7f]  ;;  %v786_v1 = vld [vmem:[#allocation2 + $0x21] sm:$0x7f]  ;;  %v998_v2 = vld [vmem:[#allocation2 + $0xa] sm:$0x3f]  ;;  %v807_v5 = vmul.f32 %v2097_v6, %v788_v59  ;;  %v804_v10 = vmul.f32 %v2097_v6, %v785_v62 }
  0x69   : > { %v2165_v8 = vld [vmem:[%s2354_s3 + $0x13] ss:$0 sm:$0xff]  ;;  %v803_v50 = vmul.f32 %v2097_v6, %v784_v61  ;;  %v805_v11 = vmul.f32 %v2097_v6, %v786_v1  ;;  %v1019_v52 = vmul.f32 %v2102_v7, %v998_v2 }
  0x6a   : > { %v750_v30 = vld [vmem:[#allocation3 + $0x10] sm:$0xff] }
  0x6b   : > { %v769_v33 = vadd.f32 %v762_v17, %v750_v30  ;;  %v751_v27 = vld [vmem:[#allocation3 + $0x18] sm:$0xff]  ;;  %v752_v42 = vld [vmem:[#allocation3 + $0x20] sm:$0xff] }
  0x6c   : > { %v753_v43 = vld [vmem:[#allocation3 + $0x28] sm:$0xff]  ;;  %v770_v45 = vadd.f32 %v763_v25, %v751_v27  ;;  %v771_v46 = vadd.f32 %v764_v15, %v752_v42  ;;  %v754_v47 = vld [vmem:[#allocation3 + $0x30] sm:$0xff] }
  0x6d   : > { %v772_v28 = vadd.f32 %v765_v16, %v753_v43  ;;  %v755_v48 = vld [vmem:[#allocation3 + $0x38] sm:$0xff]  ;;  %776 = vst [vmem:[#allocation3 + $0x10] sm:$0xff] %v769_v33  ;;  %v773_v49 = vadd.f32 %v766_v18, %v754_v47  ;;  %v961_v53 = vld [vmem:[#allocation3 + $0x8] sm:$0x7f]  ;;  %v828_v47 = vld [vmem:[#allocation2 + $0x32] sm:$0x3f] }
  0x6e   : > { %v774_v51 = vadd.f32 %v767_v23, %v755_v48  ;;  %777 = vst [vmem:[#allocation3 + $0x18] sm:$0xff] %v770_v45  ;;  %778 = vst [vmem:[#allocation3 + $0x20] sm:$0xff] %v771_v46  ;;  %v982_v19 = vadd.f32 %v974_v44, %v961_v53  ;;  %v1170_v22 = vld [vmem:[#allocation3] sm:$0x7f]  ;;  %v1203_v33 = vld [vmem:[#allocation2 + $0xa] sm:$0x3f]  ;;  %v847_v55 = vmul.f32 %v2112_v63, %v828_v47 }
  0x6f   : > { %779 = vst [vmem:[#allocation3 + $0x28] sm:$0xff] %v772_v28  ;;  %780 = vst [vmem:[#allocation3 + $0x30] sm:$0xff] %v773_v49  ;;  %v1189_v60 = vadd.f32 %v1182_v54, %v1170_v22  ;;  %v823_v44 = vld [vmem:[#allocation2 + $0xa] sm:$0x3f]  ;;  %v1222_v45 = vmul.f32 %v2165_v8, %v1203_v33  ;;  %v824_v48 = vld [vmem:[#allocation2 + $0x12] sm:$0x3f] }
  0x70   : > { %781 = vst [vmem:[#allocation3 + $0x38] sm:$0xff] %v774_v51  ;;  %990 = vst [vmem:[#allocation3 + $0x8] sm:$0x7f] %v982_v19  ;;  %v827_v46 = vld [vmem:[#allocation2 + $0x2a] sm:$0x3f]  ;;  %v842_v19 = vmul.f32 %v2112_v63, %v823_v44  ;;  %v843_v59 = vmul.f32 %v2112_v63, %v824_v48 }
  0x71   : > { %1196 = vst [vmem:[#allocation3] sm:$0x7f] %v1189_v60  ;;  %v826_v49 = vld [vmem:[#allocation2 + $0x22] sm:$0x3f]  ;;  %v1044_v53 = vld [vmem:[#allocation2 + $0x10] sm:$0x3f]  ;;  %v846_v54 = vmul.f32 %v2112_v63, %v827_v46  ;;  %v844_v60 = vmul.f32 %v2112_v63, %v825_v29 }
  0x72   : > { %v2178_v22 = vld [vmem:[%s2354_s3 + $0x14] ss:$0 sm:$0xff]  ;;  %v845_v61 = vmul.f32 %v2112_v63, %v826_v49  ;;  %v865_v33 = vld [vmem:[#allocation2 + $0x18] sm:$0x3f] }
  0x73   : > { %v864_v63 = vld [vmem:[#allocation2 + $0x10] sm:$0x3f]  ;;  %v886_v47 = vmul.f32 %v2051_v13, %v865_v33 }
  0x74   : > { %v790_v9 = vld [vmem:[#allocation3 + $0x10] sm:$0x7f]  ;;  %v885_v44 = vmul.f32 %v2051_v13, %v864_v63 }
  0x75   : > { %v809_v12 = vadd.f32 %v802_v3, %v790_v9  ;;  %v791_v14 = vld [vmem:[#allocation3 + $0x18] sm:$0x7f]  ;;  %v792_v15 = vld [vmem:[#allocation3 + $0x20] sm:$0x7f] }
  0x76   : > { %v793_v16 = vld [vmem:[#allocation3 + $0x28] sm:$0x7f]  ;;  %v810_v17 = vadd.f32 %v803_v50, %v791_v14  ;;  %v811_v18 = vadd.f32 %v804_v10, %v792_v15  ;;  %v794_v30 = vld [vmem:[#allocation3 + $0x30] sm:$0x7f] }
  0x77   : > { %v812_v23 = vadd.f32 %v805_v11, %v793_v16  ;;  %v795_v25 = vld [vmem:[#allocation3 + $0x38] sm:$0x7f]  ;;  %816 = vst [vmem:[#allocation3 + $0x10] sm:$0x7f] %v809_v12  ;;  %v813_v27 = vadd.f32 %v806_v4, %v794_v30  ;;  %v1006_v43 = vld [vmem:[#allocation3 + $0x8] sm:$0x3f]  ;;  %v1063_v4 = vmul.f32 %v2117_v0, %v1044_v53 }
  0x78   : > { %v814_v42 = vadd.f32 %v807_v5, %v795_v25  ;;  %817 = vst [vmem:[#allocation3 + $0x18] sm:$0x7f] %v810_v17  ;;  %818 = vst [vmem:[#allocation3 + $0x20] sm:$0x7f] %v811_v18  ;;  %v1027_v6 = vadd.f32 %v1019_v52, %v1006_v43  ;;  %v1210_v28 = vld [vmem:[#allocation3] sm:$0x3f] }
  0x79   : > { %819 = vst [vmem:[#allocation3 + $0x28] sm:$0x7f] %v812_v23  ;;  %820 = vst [vmem:[#allocation3 + $0x30] sm:$0x7f] %v813_v27  ;;  %v1229_v51 = vadd.f32 %v1222_v45, %v1210_v28  ;;  %v1244_v5 = vld [vmem:[#allocation2 + $0x10] sm:$0x3f] }
  0x7a   : > { %821 = vst [vmem:[#allocation3 + $0x38] sm:$0x7f] %v814_v42  ;;  %1035 = vst [vmem:[#allocation3 + $0x8] sm:$0x3f] %v1027_v6  ;;  %v1261_v17 = vmul.f32 %v2178_v22, %v1244_v5  ;;  %v867_v18 = vld [vmem:[#allocation2 + $0x28] sm:$0x3f] }
  0x7b   : > { %1236 = vst [vmem:[#allocation3] sm:$0x3f] %v1229_v51  ;;  %v868_v23 = vld [vmem:[#allocation2 + $0x30] sm:$0x3f]  ;;  %v869_v30 = vld [vmem:[#allocation2 + $0x38] sm:$0x3f]  ;;  %v888_v43 = vmul.f32 %v2051_v13, %v867_v18 }
  0x7c   : > { %v866_v27 = vld [vmem:[#allocation2 + $0x20] sm:$0x3f]  ;;  %v1084_v6 = vld [vmem:[#allocation2 + $0x10] sm:$0x7f]  ;;  %v889_v45 = vmul.f32 %v2051_v13, %v868_v23  ;;  %v890_v46 = vmul.f32 %v2051_v13, %v869_v30 }
  0x7d   : > { %v2192_v28 = vld [vmem:[%s2354_s3 + $0x15] ss:$0 sm:$0xff]  ;;  %v887_v48 = vmul.f32 %v2051_v13, %v866_v27 }
  0x7e   : > { %v830_v57 = vld [vmem:[#allocation3 + $0x10] sm:$0x3f] }
  0x7f   : > { %v849_v62 = vadd.f32 %v842_v19, %v830_v57  ;;  %v831_v1 = vld [vmem:[#allocation3 + $0x18] sm:$0x3f]  ;;  %v832_v2 = vld [vmem:[#allocation3 + $0x20] sm:$0x3f]  ;;  %v909_v13 = vld [vmem:[#allocation2 + $0x10] sm:$0x7f] }
  0x80   : > { %v833_v3 = vld [vmem:[#allocation3 + $0x28] sm:$0x3f]  ;;  %v850_v9 = vadd.f32 %v843_v59, %v831_v1  ;;  %v851_v50 = vadd.f32 %v844_v60, %v832_v2  ;;  %v834_v11 = vld [vmem:[#allocation3 + $0x30] sm:$0x3f] }
  0x81   : > { %v852_v10 = vadd.f32 %v845_v61, %v833_v3  ;;  %v835_v12 = vld [vmem:[#allocation3 + $0x38] sm:$0x3f]  ;;  %v1051_v14 = vld [vmem:[#allocation3 + $0xa] sm:$0x3f]  ;;  %856 = vst [vmem:[#allocation3 + $0x10] sm:$0x3f] %v849_v62  ;;  %v853_v15 = vadd.f32 %v846_v54, %v834_v11  ;;  %v1103_v54 = vmul.f32 %v2128_v58, %v1084_v6 }
  0x82   : > { %v854_v16 = vadd.f32 %v847_v55, %v835_v12  ;;  %v1070_v52 = vadd.f32 %v1063_v4, %v1051_v14  ;;  %857 = vst [vmem:[#allocation3 + $0x18] sm:$0x3f] %v850_v9  ;;  %858 = vst [vmem:[#allocation3 + $0x20] sm:$0x3f] %v851_v50  ;;  %v1250_v25 = vld [vmem:[#allocation3 + $0x2] sm:$0x3f] }
  0x83   : > { %859 = vst [vmem:[#allocation3 + $0x28] sm:$0x3f] %v852_v10  ;;  %860 = vst [vmem:[#allocation3 + $0x30] sm:$0x3f] %v853_v15  ;;  %v1267_v42 = vadd.f32 %v1261_v17, %v1250_v25  ;;  %v1279_v55 = vld [vmem:[#allocation2 + $0x10] sm:$0x7f]  ;;  %v1143_v17 = vmul.f32 %v1975_v26, %v1968_v24 }
  0x84   : > { %861 = vst [vmem:[#allocation3 + $0x38] sm:$0x3f] %v854_v16  ;;  %1077 = vst [vmem:[#allocation3 + $0xa] sm:$0x3f] %v1070_v52  ;;  %v1296_v5 = vmul.f32 %v2192_v28, %v1279_v55  ;;  %v913_v9 = vld [vmem:[#allocation2 + $0x30] sm:$0x7f]  ;;  %v930_v16 = vmul.f32 %v2065_v56, %v909_v13 }
  0x85   : > { %1273 = vst [vmem:[#allocation3 + $0x2] sm:$0x3f] %v1267_v42  ;;  %v914_v50 = vld [vmem:[#allocation2 + $0x38] sm:$0x7f]  ;;  %v911_v12 = vld [vmem:[#allocation2 + $0x20] sm:$0x7f]  ;;  %v934_v52 = vmul.f32 %v2065_v56, %v913_v9 }
  0x86   : > { %v910_v11 = vld [vmem:[#allocation2 + $0x18] sm:$0x7f]  ;;  %v912_v14 = vld [vmem:[#allocation2 + $0x28] sm:$0x7f]  ;;  %v935_v63 = vmul.f32 %v2065_v56, %v914_v50  ;;  %v932_v23 = vmul.f32 %v2065_v56, %v911_v12 }
  0x87   : > { %v931_v18 = vmul.f32 %v2065_v56, %v910_v11  ;;  %v933_v30 = vmul.f32 %v2065_v56, %v912_v14  ;;  %v954_v56 = vld [vmem:[#allocation2 + $0x11] sm:$0x7f]  ;;  %v955_v55 = vld [vmem:[#allocation2 + $0x19] sm:$0x7f] }
  0x88   : > { %v872_v29 = vld [vmem:[#allocation3 + $0x12] sm:$0x3f] }
  0x89   : > { %v873_v49 = vld [vmem:[#allocation3 + $0x1a] sm:$0x3f]  ;;  %v874_v51 = vld [vmem:[#allocation3 + $0x22] sm:$0x3f]  ;;  %v893_v19 = vadd.f32 %v885_v44, %v872_v29 }
  0x8a   : > { %v875_v53 = vld [vmem:[#allocation3 + $0x2a] sm:$0x3f]  ;;  %v894_v57 = vadd.f32 %v886_v47, %v873_v49  ;;  %v895_v59 = vadd.f32 %v887_v48, %v874_v51  ;;  %v876_v61 = vld [vmem:[#allocation3 + $0x32] sm:$0x3f]  ;;  %v1331_v48 = vmul.f32 %v1989_v31, %v1968_v24  ;;  %v975_v24 = vmul.f32 %v2086_v20, %v954_v56 }
  0x8b   : > { %v896_v60 = vadd.f32 %v888_v43, %v875_v53  ;;  %v877_v62 = vld [vmem:[#allocation3 + $0x3a] sm:$0x3f]  ;;  %v1091_v1 = vld [vmem:[#allocation3 + $0x9] sm:$0x7f]  ;;  %901 = vst [vmem:[#allocation3 + $0x12] sm:$0x3f] %v893_v19  ;;  %v897_v2 = vadd.f32 %v889_v45, %v876_v61 }
  0x8c   : > { %v898_v3 = vadd.f32 %v890_v46, %v877_v62  ;;  %v1110_v4 = vadd.f32 %v1103_v54, %v1091_v1  ;;  %902 = vst [vmem:[#allocation3 + $0x1a] sm:$0x3f] %v894_v57  ;;  %903 = vst [vmem:[#allocation3 + $0x22] sm:$0x3f] %v895_v59  ;;  %v1285_v10 = vld [vmem:[#allocation3 + $0x1] sm:$0x7f]  ;;  %v976_v1 = vmul.f32 %v2086_v20, %v955_v55 }
  0x8d   : > { %904 = vst [vmem:[#allocation3 + $0x2a] sm:$0x3f] %v896_v60  ;;  %905 = vst [vmem:[#allocation3 + $0x32] sm:$0x3f] %v897_v2  ;;  %v1302_v15 = vadd.f32 %v1296_v5, %v1285_v10  ;;  %v958_v53 = vld [vmem:[#allocation2 + $0x31] sm:$0x7f] }
  0x8e   : > { %906 = vst [vmem:[#allocation3 + $0x3a] sm:$0x3f] %v898_v3  ;;  %1117 = vst [vmem:[#allocation3 + $0x9] sm:$0x7f] %v1110_v4  ;;  %v959_v19 = vld [vmem:[#allocation2 + $0x39] sm:$0x7f]  ;;  %v979_v61 = vmul.f32 %v2086_v20, %v958_v53 }
  0x8f   : > { %1308 = vst [vmem:[#allocation3 + $0x1] sm:$0x7f] %v1302_v15  ;;  %v956_v57 = vld [vmem:[#allocation2 + $0x21] sm:$0x7f]  ;;  %v957_v59 = vld [vmem:[#allocation2 + $0x29] sm:$0x7f]  ;;  %v980_v62 = vmul.f32 %v2086_v20, %v959_v19 }
  0x90   : > { %v1164_v31 = vld [vmem:[#allocation2 + $0x11] sm:$0x7f]  ;;  %v977_v3 = vmul.f32 %v2086_v20, %v956_v57  ;;  %v978_v4 = vmul.f32 %v2086_v20, %v957_v59 }
  0x91   : > { %v2215_v2 = vld [vmem:[%s2354_s3 + $0x17] ss:$0 sm:$0xff] }
  0x92   : > { %v917_v25 = vld [vmem:[#allocation3 + $0x11] sm:$0x7f] }
  0x93   : > { %v918_v33 = vld [vmem:[#allocation3 + $0x19] sm:$0x7f]  ;;  %v919_v27 = vld [vmem:[#allocation3 + $0x21] sm:$0x7f]  ;;  %v938_v43 = vadd.f32 %v930_v16, %v917_v25 }
  0x94   : > { %v920_v42 = vld [vmem:[#allocation3 + $0x29] sm:$0x7f]  ;;  %v939_v6 = vadd.f32 %v931_v18, %v918_v33  ;;  %v940_v44 = vadd.f32 %v932_v23, %v919_v27  ;;  %v921_v46 = vld [vmem:[#allocation3 + $0x31] sm:$0x7f]  ;;  %v1004_v27 = vld [vmem:[#allocation2 + $0x3a] sm:$0x3f] }
  0x95   : > { %v941_v45 = vadd.f32 %v933_v30, %v920_v42  ;;  %v922_v47 = vld [vmem:[#allocation3 + $0x39] sm:$0x7f]  ;;  %v1131_v26 = vld [vmem:[#allocation3 + $0x8] sm:$0xff]  ;;  %946 = vst [vmem:[#allocation3 + $0x11] sm:$0x7f] %v938_v43  ;;  %v942_v29 = vadd.f32 %v934_v52, %v921_v46  ;;  %v1183_v52 = vmul.f32 %v2154_v21, %v1164_v31 }
  0x96   : > { %v943_v49 = vadd.f32 %v935_v63, %v922_v47  ;;  %v1150_v51 = vadd.f32 %v1143_v17, %v1131_v26  ;;  %947 = vst [vmem:[#allocation3 + $0x19] sm:$0x7f] %v939_v6  ;;  %948 = vst [vmem:[#allocation3 + $0x21] sm:$0x7f] %v940_v44  ;;  %v1320_v54 = vld [vmem:[#allocation3] sm:$0xff]  ;;  %v1025_v26 = vmul.f32 %v2102_v7, %v1004_v27 }
  0x97   : > { %949 = vst [vmem:[#allocation3 + $0x29] sm:$0x7f] %v941_v45  ;;  %950 = vst [vmem:[#allocation3 + $0x31] sm:$0x7f] %v942_v29  ;;  %v1337_v60 = vadd.f32 %v1331_v48, %v1320_v54  ;;  %v1349_v63 = vld [vmem:[#allocation2 + $0x11] sm:$0x7f] }
  0x98   : > { %951 = vst [vmem:[#allocation3 + $0x39] sm:$0x7f] %v943_v49  ;;  %1157 = vst [vmem:[#allocation3 + $0x8] sm:$0xff] %v1150_v51  ;;  %v999_v30 = vld [vmem:[#allocation2 + $0x12] sm:$0x3f]  ;;  %v1366_v25 = vmul.f32 %v2215_v2, %v1349_v63 }
  0x99   : > { %1343 = vst [vmem:[#allocation3] sm:$0xff] %v1337_v60  ;;  %v1003_v33 = vld [vmem:[#allocation2 + $0x32] sm:$0x3f]  ;;  %v1000_v43 = vld [vmem:[#allocation2 + $0x1a] sm:$0x3f]  ;;  %v1020_v46 = vmul.f32 %v2102_v7, %v999_v30 }
  0x9a   : > { %v1001_v6 = vld [vmem:[#allocation2 + $0x22] sm:$0x3f]  ;;  %v1002_v44 = vld [vmem:[#allocation2 + $0x2a] sm:$0x3f]  ;;  %v1204_v47 = vld [vmem:[#allocation2 + $0x12] sm:$0x3f]  ;;  %v1024_v48 = vmul.f32 %v2102_v7, %v1003_v33  ;;  %v1021_v29 = vmul.f32 %v2102_v7, %v1000_v43 }
  0x9b   : > { %v2228_v49 = vld [vmem:[%s2354_s3 + $0x18] ss:$0 sm:$0xff]  ;;  %v1022_v51 = vmul.f32 %v2102_v7, %v1001_v6  ;;  %v1023_v56 = vmul.f32 %v2102_v7, %v1002_v44  ;;  %v1223_v59 = vmul.f32 %v2165_v8, %v1204_v47 }
  0x9c   : > { %v962_v13 = vld [vmem:[#allocation3 + $0x10] sm:$0x7f]  ;;  %v1245_v63 = vld [vmem:[#allocation2 + $0x18] sm:$0x3f] }
  0x9d   : > { %v983_v5 = vadd.f32 %v975_v24, %v962_v13  ;;  %v963_v9 = vld [vmem:[#allocation3 + $0x18] sm:$0x7f]  ;;  %v964_v50 = vld [vmem:[#allocation3 + $0x20] sm:$0x7f] }
  0x9e   : > { %v965_v10 = vld [vmem:[#allocation3 + $0x28] sm:$0x7f]  ;;  %v984_v11 = vadd.f32 %v976_v1, %v963_v9  ;;  %v985_v12 = vadd.f32 %v977_v3, %v964_v50  ;;  %v966_v15 = vld [vmem:[#allocation3 + $0x30] sm:$0x7f]  ;;  %v1045_v50 = vld [vmem:[#allocation2 + $0x18] sm:$0x3f] }
  0x9f   : > { %v986_v14 = vadd.f32 %v978_v4, %v965_v10  ;;  %v967_v16 = vld [vmem:[#allocation3 + $0x38] sm:$0x7f]  ;;  %991 = vst [vmem:[#allocation3 + $0x10] sm:$0x7f] %v983_v5  ;;  %v987_v17 = vadd.f32 %v979_v61, %v966_v15  ;;  %v1171_v23 = vld [vmem:[#allocation3 + $0x8] sm:$0x7f] }
  0xa0   : > { %v988_v18 = vadd.f32 %v980_v62, %v967_v16  ;;  %992 = vst [vmem:[#allocation3 + $0x18] sm:$0x7f] %v984_v11  ;;  %993 = vst [vmem:[#allocation3 + $0x20] sm:$0x7f] %v985_v12  ;;  %v1190_v20 = vadd.f32 %v1183_v52, %v1171_v23  ;;  %v1355_v42 = vld [vmem:[#allocation3] sm:$0x7f]  ;;  %v1064_v52 = vmul.f32 %v2117_v0, %v1045_v50 }
  0xa1   : > { %994 = vst [vmem:[#allocation3 + $0x28] sm:$0x7f] %v986_v14  ;;  %995 = vst [vmem:[#allocation3 + $0x30] sm:$0x7f] %v987_v17  ;;  %v1372_v45 = vadd.f32 %v1366_v25, %v1355_v42  ;;  %v1384_v1 = vld [vmem:[#allocation2 + $0x12] sm:$0x3f]  ;;  %v1262_v42 = vmul.f32 %v2178_v22, %v1245_v63 }
  0xa2   : > { %996 = vst [vmem:[#allocation3 + $0x38] sm:$0x7f] %v988_v18  ;;  %1197 = vst [vmem:[#allocation3 + $0x8] sm:$0x7f] %v1190_v20  ;;  %v1048_v5 = vld [vmem:[#allocation2 + $0x30] sm:$0x3f]  ;;  %v1401_v9 = vmul.f32 %v2228_v49, %v1384_v1 }
  0xa3   : > { %1378 = vst [vmem:[#allocation3] sm:$0x7f] %v1372_v45  ;;  %v1049_v10 = vld [vmem:[#allocation2 + $0x38] sm:$0x3f]  ;;  %v1046_v12 = vld [vmem:[#allocation2 + $0x20] sm:$0x3f]  ;;  %v1067_v16 = vmul.f32 %v2117_v0, %v1048_v5 }
  0xa4   : > { %v1047_v14 = vld [vmem:[#allocation2 + $0x28] sm:$0x3f]  ;;  %v1068_v17 = vmul.f32 %v2117_v0, %v1049_v10  ;;  %v1065_v18 = vmul.f32 %v2117_v0, %v1046_v12  ;;  %v1867_v10 = vld [vmem:[#allocation2 + $0x18] sm:$0xff] }
  0xa5   : > { %v1066_v23 = vmul.f32 %v2117_v0, %v1047_v14  ;;  %v1085_v0 = vld [vmem:[#allocation2 + $0x18] sm:$0x7f] }
  0xa6   : > { %v1007_v53 = vld [vmem:[#allocation3 + $0x10] sm:$0x3f] }
  0xa7   : > { %v1008_v19 = vld [vmem:[#allocation3 + $0x18] sm:$0x3f]  ;;  %v1009_v54 = vld [vmem:[#allocation3 + $0x20] sm:$0x3f]  ;;  %v1028_v57 = vadd.f32 %v1020_v46, %v1007_v53  ;;  %v1104_v53 = vmul.f32 %v2128_v58, %v1085_v0 }
  0xa8   : > { %v1010_v55 = vld [vmem:[#allocation3 + $0x28] sm:$0x3f]  ;;  %v1011_v60 = vld [vmem:[#allocation3 + $0x30] sm:$0x3f]  ;;  %v1029_v31 = vadd.f32 %v1021_v29, %v1008_v19  ;;  %v1030_v61 = vadd.f32 %v1022_v51, %v1009_v54  ;;  %v1086_v29 = vld [vmem:[#allocation2 + $0x20] sm:$0x7f] }
  0xa9   : > { %v1012_v24 = vld [vmem:[#allocation3 + $0x38] sm:$0x3f]  ;;  %v1031_v62 = vadd.f32 %v1023_v56, %v1010_v55  ;;  %v1032_v3 = vadd.f32 %v1024_v48, %v1011_v60  ;;  %1036 = vst [vmem:[#allocation3 + $0x10] sm:$0x3f] %v1028_v57  ;;  %v1211_v13 = vld [vmem:[#allocation3 + $0x8] sm:$0x3f]  ;;  %v1105_v55 = vmul.f32 %v2128_v58, %v1086_v29 }
  0xaa   : > { %v1033_v4 = vadd.f32 %v1025_v26, %v1012_v24  ;;  %1037 = vst [vmem:[#allocation3 + $0x18] sm:$0x3f] %v1029_v31  ;;  %1038 = vst [vmem:[#allocation3 + $0x20] sm:$0x3f] %v1030_v61  ;;  %v1230_v7 = vadd.f32 %v1223_v59, %v1211_v13  ;;  %v1390_v11 = vld [vmem:[#allocation3] sm:$0x3f] }
  0xab   : > { %1039 = vst [vmem:[#allocation3 + $0x28] sm:$0x3f] %v1031_v62  ;;  %1040 = vst [vmem:[#allocation3 + $0x30] sm:$0x3f] %v1032_v3  ;;  %v1407_v15 = vadd.f32 %v1401_v9, %v1390_v11  ;;  %v1089_v26 = vld [vmem:[#allocation2 + $0x38] sm:$0x7f] }
  0xac   : > { %1041 = vst [vmem:[#allocation3 + $0x38] sm:$0x3f] %v1033_v4  ;;  %1237 = vst [vmem:[#allocation3 + $0x8] sm:$0x3f] %v1230_v7  ;;  %v1087_v51 = vld [vmem:[#allocation2 + $0x28] sm:$0x7f]  ;;  %v1108_v54 = vmul.f32 %v2128_v58, %v1089_v26 }
  0xad   : > { %1413 = vst [vmem:[#allocation3] sm:$0x3f] %v1407_v15  ;;  %v1088_v56 = vld [vmem:[#allocation2 + $0x30] sm:$0x7f]  ;;  %v1280_v19 = vld [vmem:[#allocation2 + $0x18] sm:$0x7f]  ;;  %v1106_v57 = vmul.f32 %v2128_v58, %v1087_v51 }
  0xae   : > { %v1107_v59 = vmul.f32 %v2128_v58, %v1088_v56  ;;  %v1297_v1 = vmul.f32 %v2192_v28, %v1280_v19  ;;  %v1866_v58 = vld [vmem:[%s2354_s3 + $0x16] ss:$0 sm:$0xff] }
  0xaf   : > { %v1332_v11 = vmul.f32 %v1867_v10, %v1866_v58 }
  0xb0   : > { %v1052_v20 = vld [vmem:[#allocation3 + $0x12] sm:$0x3f] }
  0xb1   : > { %v1053_v30 = vld [vmem:[#allocation3 + $0x1a] sm:$0x3f]  ;;  %v1054_v25 = vld [vmem:[#allocation3 + $0x22] sm:$0x3f]  ;;  %v1071_v27 = vadd.f32 %v1064_v52, %v1052_v20 }
  0xb2   : > { %v1055_v33 = vld [vmem:[#allocation3 + $0x2a] sm:$0x3f]  ;;  %v1056_v43 = vld [vmem:[#allocation3 + $0x32] sm:$0x3f]  ;;  %v1072_v6 = vadd.f32 %v1065_v18, %v1053_v30  ;;  %v1073_v44 = vadd.f32 %v1066_v23, %v1054_v25 }
  0xb3   : > { %v1074_v45 = vadd.f32 %v1067_v16, %v1055_v33  ;;  %v1075_v46 = vadd.f32 %v1068_v17, %v1056_v43  ;;  %1078 = vst [vmem:[#allocation3 + $0x12] sm:$0x3f] %v1071_v27  ;;  %v1251_v47 = vld [vmem:[#allocation3 + $0xa] sm:$0x3f]  ;;  %v1165_v33 = vld [vmem:[#allocation2 + $0x19] sm:$0x7f] }
  0xb4   : > { %1079 = vst [vmem:[#allocation3 + $0x1a] sm:$0x3f] %v1072_v6  ;;  %1080 = vst [vmem:[#allocation3 + $0x22] sm:$0x3f] %v1073_v44  ;;  %v1268_v48 = vadd.f32 %v1262_v42, %v1251_v47  ;;  %v1169_v27 = vld [vmem:[#allocation2 + $0x39] sm:$0x7f] }
  0xb5   : > { %1081 = vst [vmem:[#allocation3 + $0x2a] sm:$0x3f] %v1074_v45  ;;  %1082 = vst [vmem:[#allocation3 + $0x32] sm:$0x3f] %v1075_v46  ;;  %v1167_v42 = vld [vmem:[#allocation2 + $0x29] sm:$0x7f] }
  0xb6   : > { %1274 = vst [vmem:[#allocation3 + $0xa] sm:$0x3f] %v1268_v48  ;;  %v1168_v43 = vld [vmem:[#allocation2 + $0x31] sm:$0x7f]  ;;  %v1186_v6 = vmul.f32 %v2154_v21, %v1167_v42 }
  0xb7   : > { %v1187_v44 = vmul.f32 %v2154_v21, %v1168_v43 }
  0xba   : > { %v1092_v60 = vld [vmem:[#allocation3 + $0x11] sm:$0x7f] }
  0xbb   : > { %v1093_v24 = vld [vmem:[#allocation3 + $0x19] sm:$0x7f]  ;;  %v1094_v31 = vld [vmem:[#allocation3 + $0x21] sm:$0x7f]  ;;  %v1111_v62 = vadd.f32 %v1104_v53, %v1092_v60  ;;  %v1207_v60 = vld [vmem:[#allocation2 + $0x2a] sm:$0x3f] }
  0xbc   : > { %v1095_v61 = vld [vmem:[#allocation3 + $0x29] sm:$0x7f]  ;;  %v1096_v3 = vld [vmem:[#allocation3 + $0x31] sm:$0x7f]  ;;  %v1112_v4 = vadd.f32 %v1105_v55, %v1093_v24  ;;  %v1113_v13 = vadd.f32 %v1106_v57, %v1094_v31  ;;  %v1209_v57 = vld [vmem:[#allocation2 + $0x3a] sm:$0x3f] }
  0xbd   : > { %v1114_v7 = vadd.f32 %v1107_v59, %v1095_v61  ;;  %v1115_v5 = vadd.f32 %v1108_v54, %v1096_v3  ;;  %1118 = vst [vmem:[#allocation3 + $0x11] sm:$0x7f] %v1111_v62  ;;  %v1286_v9 = vld [vmem:[#allocation3 + $0x9] sm:$0x7f]  ;;  %v1206_v59 = vld [vmem:[#allocation2 + $0x22] sm:$0x3f]  ;;  %v1228_v62 = vmul.f32 %v2165_v8, %v1209_v57  ;;  %v1226_v3 = vmul.f32 %v2165_v8, %v1207_v60 }
  0xbe   : > { %1119 = vst [vmem:[#allocation3 + $0x19] sm:$0x7f] %v1112_v4  ;;  %1120 = vst [vmem:[#allocation3 + $0x21] sm:$0x7f] %v1113_v13  ;;  %v1303_v50 = vadd.f32 %v1297_v1, %v1286_v9  ;;  %v1208_v24 = vld [vmem:[#allocation2 + $0x32] sm:$0x3f]  ;;  %v1225_v1 = vmul.f32 %v2165_v8, %v1206_v59 }
  0xbf   : > { %1121 = vst [vmem:[#allocation3 + $0x29] sm:$0x7f] %v1114_v7  ;;  %1122 = vst [vmem:[#allocation3 + $0x31] sm:$0x7f] %v1115_v5  ;;  %v1385_v61 = vld [vmem:[#allocation2 + $0x1a] sm:$0x3f]  ;;  %v1227_v4 = vmul.f32 %v2165_v8, %v1208_v24 }
  0xc0   : > { %1309 = vst [vmem:[#allocation3 + $0x9] sm:$0x7f] %v1303_v50  ;;  %v1402_v58 = vmul.f32 %v2228_v49, %v1385_v61 }
  0xc4   : > { %v1132_v12 = vld [vmem:[#allocation3 + $0x10] sm:$0xff] }
  0xc5   : > { %v1133_v14 = vld [vmem:[#allocation3 + $0x18] sm:$0xff]  ;;  %v1134_v15 = vld [vmem:[#allocation3 + $0x20] sm:$0xff]  ;;  %v1151_v52 = vadd.f32 %v1994_v32, %v1132_v12 }
  0xc6   : > { %v1135_v16 = vld [vmem:[#allocation3 + $0x28] sm:$0xff]  ;;  %v1136_v63 = vld [vmem:[#allocation3 + $0x30] sm:$0xff]  ;;  %v1152_v17 = vadd.f32 %v2002_v34, %v1133_v14  ;;  %v1153_v18 = vadd.f32 %v2011_v36, %v1134_v15  ;;  %v1166_v32 = vld [vmem:[#allocation2 + $0x21] sm:$0x7f]  ;;  %v1184_v34 = vmul.f32 %v2154_v21, %v1165_v33 }
  0xc7   : > { %v1154_v23 = vadd.f32 %v2020_v38, %v1135_v16  ;;  %v1155_v20 = vadd.f32 %v2027_v40, %v1136_v63  ;;  %1158 = vst [vmem:[#allocation3 + $0x10] sm:$0xff] %v1151_v52  ;;  %v1321_v30 = vld [vmem:[#allocation3 + $0x8] sm:$0xff]  ;;  %v1350_v36 = vld [vmem:[#allocation2 + $0x19] sm:$0x7f]  ;;  %v1188_v38 = vmul.f32 %v2154_v21, %v1169_v27  ;;  %v1185_v40 = vmul.f32 %v2154_v21, %v1166_v32  ;;  %v2269_v15 = vld [vmem:[%s2355_s4] ss:$0 sm:$0xff] }
  0xc8   : > { %1159 = vst [vmem:[#allocation3 + $0x18] sm:$0xff] %v1152_v17  ;;  %1160 = vst [vmem:[#allocation3 + $0x20] sm:$0xff] %v1153_v18  ;;  %v1338_v25 = vadd.f32 %v1332_v11, %v1321_v30  ;;  %v1367_v26 = vmul.f32 %v2215_v2, %v1350_v36  ;;  %v1205_v21 = vld [vmem:[#allocation2 + $0x1a] sm:$0x3f]  ;;  %v1419_v63 = vld [vmem:[#allocation3] sm:$0xff] }
  0xc9   : > { %1161 = vst [vmem:[#allocation3 + $0x28] sm:$0xff] %v1154_v23  ;;  %1162 = vst [vmem:[#allocation3 + $0x30] sm:$0xff] %v1155_v20  ;;  %v1224_v31 = vmul.f32 %v2165_v8, %v1205_v21  ;;  %v1426_v16 = vld [vmem:[#allocation3 + $0x38] sm:$0xff]  ;;  %v1246_v20 = vld [vmem:[#allocation2 + $0x20] sm:$0x3f]  ;;  %v1434_v30 = vadd.f32 %v2269_v15, %v1419_v63 }
  0xca   : > { %1344 = vst [vmem:[#allocation3 + $0x8] sm:$0xff] %v1338_v25  ;;  %v1249_v18 = vld [vmem:[#allocation2 + $0x38] sm:$0x3f]  ;;  %v1441_v23 = vadd.f32 %v2269_v15, %v1426_v16  ;;  %v1247_v25 = vld [vmem:[#allocation2 + $0x28] sm:$0x3f]  ;;  %v1263_v32 = vmul.f32 %v2178_v22, %v1246_v20 }
  0xcb   : > { %v1248_v33 = vld [vmem:[#allocation2 + $0x30] sm:$0x3f]  ;;  %v1266_v27 = vmul.f32 %v2178_v22, %v1249_v18  ;;  %v1264_v43 = vmul.f32 %v2178_v22, %v1247_v25 }
  0xcc   : > { %v1457_v42 = vmul.f32 0.70710677, %v1441_v23 }
  0xce   : > { %v1172_v45 = vld [vmem:[#allocation3 + $0x10] sm:$0x7f]  ;;  %1850 = verf.f32 %v1457_v42 }
  0xcf   : > { %v1191_v46 = vadd.f32 %v1184_v34, %v1172_v45  ;;  %v1173_v47 = vld [vmem:[#allocation3 + $0x18] sm:$0x7f]  ;;  %v1174_v48 = vld [vmem:[#allocation3 + $0x20] sm:$0x7f]  ;;  %v1265_v34 = vmul.f32 %v2178_v22, %v1248_v33 }
  0xd0   : > { %v1175_v0 = vld [vmem:[#allocation3 + $0x28] sm:$0x7f]  ;;  %v1192_v29 = vadd.f32 %v1185_v40, %v1173_v47  ;;  %v1193_v51 = vadd.f32 %v1186_v6, %v1174_v48  ;;  %v1176_v53 = vld [vmem:[#allocation3 + $0x30] sm:$0x7f] }
  0xd1   : > { %v1194_v56 = vadd.f32 %v1187_v44, %v1175_v0  ;;  %1198 = vst [vmem:[#allocation3 + $0x10] sm:$0x7f] %v1191_v46  ;;  %v1195_v19 = vadd.f32 %v1188_v38, %v1176_v53  ;;  %v1356_v54 = vld [vmem:[#allocation3 + $0x8] sm:$0x7f]  ;;  %v1450_v38 = vmul.f32 0.70710677, %v1434_v30 }
  0xd2   : > { %1199 = vst [vmem:[#allocation3 + $0x18] sm:$0x7f] %v1192_v29  ;;  %1200 = vst [vmem:[#allocation3 + $0x20] sm:$0x7f] %v1193_v51  ;;  %v1373_v55 = vadd.f32 %v1367_v26, %v1356_v54  ;;  %v1283_v54 = vld [vmem:[#allocation2 + $0x30] sm:$0x7f] }
  0xd3   : > { %1201 = vst [vmem:[#allocation3 + $0x28] sm:$0x7f] %v1194_v56  ;;  %1202 = vst [vmem:[#allocation3 + $0x30] sm:$0x7f] %v1195_v19  ;;  %1852 = verf.f32 %v1450_v38  ;;  %v1281_v56 = vld [vmem:[#allocation2 + $0x20] sm:$0x7f]  ;;  %v1300_v59 = vmul.f32 %v2192_v28, %v1283_v54 }
  0xd4   : > { %1379 = vst [vmem:[#allocation3 + $0x8] sm:$0x7f] %v1373_v55  ;;  %v1282_v19 = vld [vmem:[#allocation2 + $0x28] sm:$0x7f]  ;;  %v1284_v55 = vld [vmem:[#allocation2 + $0x38] sm:$0x7f]  ;;  %v1298_v21 = vmul.f32 %v2192_v28, %v1281_v56 }
  0xd5   : > { %v1299_v57 = vmul.f32 %v2192_v28, %v1282_v19  ;;  %v1301_v60 = vmul.f32 %v2192_v28, %v1284_v55  ;;  %v1353_v38 = vld [vmem:[#allocation2 + $0x31] sm:$0x7f] }
  0xd6   : > { %v1388_v56 = vld [vmem:[#allocation2 + $0x32] sm:$0x3f] }
  0xd7   : > { %v1405_v54 = vmul.f32 %v2228_v49, %v1388_v56 }
  0xd8   : > { %v1212_v13 = vld [vmem:[#allocation3 + $0x10] sm:$0x3f] }
  0xd9   : > { %v1231_v7 = vadd.f32 %v1224_v31, %v1212_v13  ;;  %v1213_v5 = vld [vmem:[#allocation3 + $0x18] sm:$0x3f]  ;;  %v1214_v9 = vld [vmem:[#allocation3 + $0x20] sm:$0x3f] }
  0xda   : > { %v1215_v50 = vld [vmem:[#allocation3 + $0x28] sm:$0x3f]  ;;  %v1232_v10 = vadd.f32 %v1225_v1, %v1213_v5  ;;  %v1233_v11 = vadd.f32 %v1226_v3, %v1214_v9  ;;  %v1216_v14 = vld [vmem:[#allocation3 + $0x30] sm:$0x3f] }
  0xdb   : > { %v1234_v12 = vadd.f32 %v1227_v4, %v1215_v50  ;;  %1238 = vst [vmem:[#allocation3 + $0x10] sm:$0x3f] %v1231_v7  ;;  %v1235_v52 = vadd.f32 %v1228_v62, %v1216_v14  ;;  %v1391_v8 = vld [vmem:[#allocation3 + $0x8] sm:$0x3f]  ;;  %v1851_v7 = vpop.eup %1850  ;;  %v1442_v14 = vmul.f32 0.5, %v1434_v30 }
  0xdc   : > { %1239 = vst [vmem:[#allocation3 + $0x18] sm:$0x3f] %v1232_v10  ;;  %1240 = vst [vmem:[#allocation3 + $0x20] sm:$0x3f] %v1233_v11  ;;  %v1408_v17 = vadd.f32 %v1402_v58, %v1391_v8  ;;  %v1473_v9 = vadd.f32 1.0, %v1851_v7  ;;  %v1449_v11 = vmul.f32 0.5, %v1441_v23 }
  0xdd   : > { %1241 = vst [vmem:[#allocation3 + $0x28] sm:$0x3f] %v1234_v12  ;;  %1242 = vst [vmem:[#allocation3 + $0x30] sm:$0x3f] %v1235_v52  ;;  %v1853_v5 = vpop.eup %1852 }
  0xde   : > { %1414 = vst [vmem:[#allocation3 + $0x8] sm:$0x3f] %v1408_v17  ;;  %v1466_v58 = vadd.f32 1.0, %v1853_v5  ;;  %v2285_v17 = vmul.f32 %v1473_v9, %v1449_v11 }
  0xe0   : > { %v2295_v23 = vmul.f32 %v1466_v58, %v1442_v14 }
  0xe2   : > { %v1252_v36 = vld [vmem:[#allocation3 + $0x12] sm:$0x3f] }
  0xe3   : > { %v1253_v40 = vld [vmem:[#allocation3 + $0x1a] sm:$0x3f]  ;;  %v1254_v6 = vld [vmem:[#allocation3 + $0x22] sm:$0x3f]  ;;  %v1269_v45 = vadd.f32 %v1263_v32, %v1252_v36  ;;  %v1352_v36 = vld [vmem:[#allocation2 + $0x29] sm:$0x7f] }
  0xe4   : > { %v1255_v44 = vld [vmem:[#allocation3 + $0x2a] sm:$0x3f]  ;;  %v1270_v46 = vadd.f32 %v1264_v43, %v1253_v40  ;;  %v1271_v47 = vadd.f32 %v1265_v34, %v1254_v6  ;;  %v1425_v0 = vld [vmem:[#allocation3 + $0x30] sm:$0xff]  ;;  %v1351_v34 = vld [vmem:[#allocation2 + $0x21] sm:$0x7f]  ;;  %v1370_v40 = vmul.f32 %v2215_v2, %v1353_v38 }
  0xe5   : > { %v1272_v48 = vadd.f32 %v1266_v27, %v1255_v44  ;;  %1275 = vst [vmem:[#allocation3 + $0x12] sm:$0x3f] %v1269_v45  ;;  %v1420_v26 = vld [vmem:[#allocation3 + $0x8] sm:$0xff]  ;;  %v1440_v29 = vadd.f32 %v2269_v15, %v1425_v0 }
  0xe6   : > { %1276 = vst [vmem:[#allocation3 + $0x1a] sm:$0x3f] %v1270_v46  ;;  %1277 = vst [vmem:[#allocation3 + $0x22] sm:$0x3f] %v1271_v47  ;;  %v1435_v22 = vadd.f32 %v2269_v15, %v1420_v26 }
  0xe7   : > { %1278 = vst [vmem:[#allocation3 + $0x2a] sm:$0x3f] %v1272_v48  ;;  %v1456_v51 = vmul.f32 0.70710677, %v1440_v29  ;;  %v1448_v28 = vmul.f32 0.5, %v1440_v29 }
  0xe8   : > { %v1451_v53 = vmul.f32 0.70710677, %v1435_v22  ;;  %v1443_v16 = vmul.f32 0.5, %v1435_v22  ;;  %v1386_v22 = vld [vmem:[#allocation2 + $0x22] sm:$0x3f] }
  0xe9   : > { %1854 = verf.f32 %v1456_v51  ;;  %v1387_v51 = vld [vmem:[#allocation2 + $0x2a] sm:$0x3f]  ;;  %v1403_v19 = vmul.f32 %v2228_v49, %v1386_v22 }
  0xea   : > { %1856 = verf.f32 %v1451_v53  ;;  %v1389_v53 = vld [vmem:[#allocation2 + $0x3a] sm:$0x3f] }
  0xeb   : > { %v1406_v55 = vmul.f32 %v2228_v49, %v1389_v53  ;;  %v1519_v53 = vmul.f32 %v2285_v17, %v2285_v17 }
  0xec   : > { %v1287_v24 = vld [vmem:[#allocation3 + $0x11] sm:$0x7f] }
  0xed   : > { %v1288_v31 = vld [vmem:[#allocation3 + $0x19] sm:$0x7f]  ;;  %v1289_v61 = vld [vmem:[#allocation3 + $0x21] sm:$0x7f]  ;;  %v1304_v1 = vadd.f32 %v1298_v21, %v1287_v24 }
  0xee   : > { %v1290_v62 = vld [vmem:[#allocation3 + $0x29] sm:$0x7f]  ;;  %v1305_v3 = vadd.f32 %v1299_v57, %v1288_v31  ;;  %v1306_v4 = vadd.f32 %v1300_v59, %v1289_v61 }
  0xef   : > { %v1307_v13 = vadd.f32 %v1301_v60, %v1290_v62  ;;  %1310 = vst [vmem:[#allocation3 + $0x11] sm:$0x7f] %v1304_v1 }
  0xf0   : > { %1311 = vst [vmem:[#allocation3 + $0x19] sm:$0x7f] %v1305_v3  ;;  %1312 = vst [vmem:[#allocation3 + $0x21] sm:$0x7f] %v1306_v4 }
  0xf1   : > { %1313 = vst [vmem:[#allocation3 + $0x29] sm:$0x7f] %v1307_v13 }
  0xf3   : > { %v1855_v50 = vpop.eup %1854 }
  0xf4   : > { %v1857_v10 = vpop.eup %1856  ;;  %v1472_v12 = vadd.f32 1.0, %v1855_v50 }
  0xf5   : > { %v1467_v52 = vadd.f32 1.0, %v1857_v10 }
  0xf6   : > { %v1322_v8 = vld [vmem:[#allocation3 + $0x10] sm:$0xff]  ;;  %v2283_v63 = vmul.f32 %v1472_v12, %v1448_v28 }
  0xf7   : > { %v1323_v18 = vld [vmem:[#allocation3 + $0x18] sm:$0xff]  ;;  %v1324_v20 = vld [vmem:[#allocation3 + $0x20] sm:$0xff]  ;;  %v1339_v33 = vadd.f32 %v2006_v35, %v1322_v8  ;;  %v2297_v30 = vmul.f32 %v1467_v52, %v1443_v16 }
  0xf8   : > { %v1325_v25 = vld [vmem:[#allocation3 + $0x28] sm:$0xff]  ;;  %v1340_v27 = vadd.f32 %v2015_v37, %v1323_v18  ;;  %v1341_v32 = vadd.f32 %v2024_v39, %v1324_v20  ;;  %v1818_v35 = vpack.c.bf16 %v2285_v17, %v2283_v63  ;;  %v1354_v37 = vld [vmem:[#allocation2 + $0x39] sm:$0x7f]  ;;  %v1368_v39 = vmul.f32 %v2215_v2, %v1351_v34 }
  0xf9   : > { %v1342_v42 = vadd.f32 %v2030_v41, %v1325_v25  ;;  %1345 = vst [vmem:[#allocation3 + $0x10] sm:$0xff] %v1339_v33  ;;  %v1803_v43 = vpack.c.bf16 %v2297_v30, %v2295_v23  ;;  %v1369_v41 = vmul.f32 %v2215_v2, %v1352_v36  ;;  %v1371_v6 = vmul.f32 %v2215_v2, %v1354_v37 }
  0xfa   : > { %1346 = vst [vmem:[#allocation3 + $0x18] sm:$0xff] %v1340_v27  ;;  %1347 = vst [vmem:[#allocation3 + $0x20] sm:$0xff] %v1341_v32  ;;  %v1404_v2 = vmul.f32 %v2228_v49, %v1387_v51  ;;  %v1513_v14 = vmul.f32 %v2297_v30, %v2297_v30  ;;  %v1512_v18 = vmul.f32 %v2295_v23, %v2295_v23 }
  0xfb   : > { %1348 = vst [vmem:[#allocation3 + $0x28] sm:$0xff] %v1342_v42  ;;  %1825 = vst [vmem:[%s2293_s15 + $0x18] sm:$0xff] %v1818_v35   ;;  %v1498_v33 = vadd.f32 %v2297_v30, %v2295_v23 }
  0xfc   : > { %1804 = vst [vmem:[%s2293_s15] sm:$0xff] %v1803_v43   ;;  %v1520_v36 = vadd.f32 %v1513_v14, %v1512_v18 }
 0x100   : > { %v1357_v44 = vld [vmem:[#allocation3 + $0x10] sm:$0x7f] }
 0x101   : > { %v1358_v45 = vld [vmem:[#allocation3 + $0x18] sm:$0x7f]  ;;  %v1359_v46 = vld [vmem:[#allocation3 + $0x20] sm:$0x7f]  ;;  %v1374_v48 = vadd.f32 %v1368_v39, %v1357_v44 }
 0x102   : > { %v1360_v47 = vld [vmem:[#allocation3 + $0x28] sm:$0x7f]  ;;  %v1375_v0 = vadd.f32 %v1369_v41, %v1358_v45  ;;  %v1376_v26 = vadd.f32 %v1370_v40, %v1359_v46 }
 0x103   : > { %v1377_v29 = vadd.f32 %v1371_v6, %v1360_v47  ;;  %1380 = vst [vmem:[#allocation3 + $0x10] sm:$0x7f] %v1374_v48 }
 0x104   : > { %1381 = vst [vmem:[#allocation3 + $0x18] sm:$0x7f] %v1375_v0  ;;  %1382 = vst [vmem:[#allocation3 + $0x20] sm:$0x7f] %v1376_v26 }
 0x105   : > { %1383 = vst [vmem:[#allocation3 + $0x28] sm:$0x7f] %v1377_v29  ;;  %v1518_v29 = vmul.f32 %v2283_v63, %v2283_v63 }
 0x10a   : > { %v1392_v21 = vld [vmem:[#allocation3 + $0x10] sm:$0x3f] }
 0x10b   : > { %v1393_v57 = vld [vmem:[#allocation3 + $0x18] sm:$0x3f]  ;;  %v1394_v59 = vld [vmem:[#allocation3 + $0x20] sm:$0x3f]  ;;  %v1409_v24 = vadd.f32 %v1403_v19, %v1392_v21 }
 0x10c   : > { %v1395_v60 = vld [vmem:[#allocation3 + $0x28] sm:$0x3f]  ;;  %v1410_v31 = vadd.f32 %v1404_v2, %v1393_v57  ;;  %v1411_v61 = vadd.f32 %v1405_v54, %v1394_v59 }
 0x10d   : > { %v1412_v62 = vadd.f32 %v1406_v55, %v1395_v60  ;;  %1415 = vst [vmem:[#allocation3 + $0x10] sm:$0x3f] %v1409_v24 }
 0x10e   : > { %1416 = vst [vmem:[#allocation3 + $0x18] sm:$0x3f] %v1410_v31  ;;  %1417 = vst [vmem:[#allocation3 + $0x20] sm:$0x3f] %v1411_v61 }
 0x10f   : > { %1418 = vst [vmem:[#allocation3 + $0x28] sm:$0x3f] %v1412_v62 }
 0x114   : > { %v1421_v1 = vld [vmem:[#allocation3 + $0x10] sm:$0xff] }
 0x115   : > { %v1422_v3 = vld [vmem:[#allocation3 + $0x18] sm:$0xff]  ;;  %v1436_v4 = vadd.f32 %v2269_v15, %v1421_v1  ;;  %v1423_v13 = vld [vmem:[#allocation3 + $0x20] sm:$0xff] }
 0x116   : > { %v1424_v7 = vld [vmem:[#allocation3 + $0x28] sm:$0xff]  ;;  %v1437_v49 = vadd.f32 %v2269_v15, %v1422_v3  ;;  %v1438_v5 = vadd.f32 %v2269_v15, %v1423_v13 }
 0x117   : > { %v1439_v9 = vadd.f32 %v2269_v15, %v1424_v7  ;;  %v1452_v50 = vmul.f32 0.70710677, %v1436_v4  ;;  %v1444_v16 = vmul.f32 0.5, %v1436_v4 }
 0x118   : > { %v1453_v58 = vmul.f32 0.70710677, %v1437_v49  ;;  %v1454_v10 = vmul.f32 0.70710677, %v1438_v5  ;;  %v1445_v15 = vmul.f32 0.5, %v1437_v49  ;;  %v1446_v32 = vmul.f32 0.5, %v1438_v5 }
 0x119   : > { %1858 = verf.f32 %v1452_v50  ;;  %v1455_v28 = vmul.f32 0.70710677, %v1439_v9  ;;  %v1447_v43 = vmul.f32 0.5, %v1439_v9 }
 0x11a   : > { %1860 = verf.f32 %v1453_v58 }
 0x11b   : > { %1862 = verf.f32 %v1454_v10 }
 0x11c   : > { %1864 = verf.f32 %v1455_v28 }
 0x123   : > { %v1859_v11 = vpop.eup %1858 }
 0x124   : > { %v1861_v12 = vpop.eup %1860  ;;  %v1468_v52 = vadd.f32 1.0, %v1859_v11 }
 0x125   : > { %v1863_v8 = vpop.eup %1862  ;;  %v1469_v20 = vadd.f32 1.0, %v1861_v12 }
 0x126   : > { %v1865_v25 = vpop.eup %1864  ;;  %v1476_v27 = vmul.f32 %v1468_v52, %v1444_v16  ;;  %v1470_v42 = vadd.f32 1.0, %v1863_v8 }
 0x127   : > { %v1477_v35 = vmul.f32 %v1469_v20, %v1445_v15  ;;  %v1471_v34 = vadd.f32 1.0, %v1865_v25 }
 0x128   : > { %v1499_v38 = vadd.f32 %v1498_v33, %v1476_v27  ;;  %v1514_v37 = vmul.f32 %v1476_v27, %v1476_v27  ;;  %v1478_v39 = vmul.f32 %v1470_v42, %v1446_v32 }
 0x129   : > { %v1808_v41 = vpack.c.bf16 %v1477_v35, %v1476_v27  ;;  %v1479_v40 = vmul.f32 %v1471_v34, %v1447_v43  ;;  %v1515_v44 = vmul.f32 %v1477_v35, %v1477_v35 }
 0x12a   : > { %v1500_v6 = vadd.f32 %v1499_v38, %v1477_v35  ;;  %v1521_v45 = vadd.f32 %v1520_v36, %v1514_v37  ;;  %v1516_v47 = vmul.f32 %v1478_v39, %v1478_v39 }
 0x12b   : > { %1823 = vst [vmem:[%s2293_s15 + $0x8] sm:$0xff] %v1808_v41   ;;  %v1813_v46 = vpack.c.bf16 %v1479_v40, %v1478_v39  ;;  %v1517_v0 = vmul.f32 %v1479_v40, %v1479_v40 }
 0x12c   : > { %v1522_v23 = vadd.f32 %v1521_v45, %v1515_v44  ;;  %v1501_v30 = vadd.f32 %v1500_v6, %v1478_v39 }
 0x12d   : > { %1824 = vst [vmem:[%s2293_s15 + $0x10] sm:$0xff] %v1813_v46  }
 0x12e   : > { %v1502_v48 = vadd.f32 %v1501_v30, %v1479_v40  ;;  %v1523_v26 = vadd.f32 %v1522_v23, %v1516_v47 }
 0x130   : > { %v1503_v22 = vadd.f32 %v1502_v48, %v2283_v63  ;;  %v1524_v51 = vadd.f32 %v1523_v26, %v1517_v0 }
 0x132   : > { %v1504_v56 = vadd.f32 %v1503_v22, %v2285_v17  ;;  %v1525_v19 = vadd.f32 %v1524_v51, %v1518_v29 }
 0x134   : > { %v1505_v2 = vrot.slane %v1504_v56, 4  ;;  %v1526_v54 = vadd.f32 %v1525_v19, %v1519_v53 }
 0x136   : > { %v1506_v55 = vadd.f32 %v1505_v2, %v1504_v56  ;;  %v1527_v21 = vrot.slane %v1526_v54, 4 }
 0x138   : > { %v1507_v57 = vrot.slane %v1506_v55, 2  ;;  %v1528_v59 = vadd.f32 %v1527_v21, %v1526_v54 }
 0x13a   : > { %v1508_v60 = vadd.f32 %v1507_v57, %v1506_v55  ;;  %v1529_v24 = vrot.slane %v1528_v59, 2 }
 0x13c   : > { %v1509_v31 = vrot.slane %v1508_v60, 1  ;;  %v1530_v61 = vadd.f32 %v1529_v24, %v1528_v59 }
 0x13e   : > { %v1510_v63 = vadd.f32 %v1509_v31, %v1508_v60  ;;  %v1531_v62 = vrot.slane %v1530_v61, 1 }
 0x140   : > { %1511 = vst [vmem:[%s395_s17] sm:$0x1] %v1510_v63  ;;  %v1532_v17 = vadd.f32 %v1531_v62, %v1530_v61 }
 0x142   : > { %1533 = vst [vmem:[%s401_s20] sm:$0x1] %v1532_v17 }
 0x143 PF: > { %s18_s26 = sadd.s32 1, %s1890_s26   ;;  %s2359_s24 = smov %s1886_s25 }
 0x144   : > { %p15_p5 = scmp.ge.s32.totalorder %s18_s26, 4   ;;  %s2360_s25 = smov %s2362_s27 }
 0x146   :  { %17 = sbr.rel (!%p15_p5) target bundleno = 2 (0x2), region = 110 }

</bundles_post_ra>
